<compile_context>
chip_gen: v6e
topology: v6e:2x2x1
jax: 0.10.0
libtpu: 0.0.40
codegen_flags: <defaults>
</compile_context>

<pallas_src>
import functools

import jax
import jax.numpy as jnp
from jax import lax
from jax.experimental import pallas as pl
from jax.experimental.pallas import tpu as pltpu

KSIZE = 7
PAD = (KSIZE - 1) // 2


def _round_up(v, m):
    return (v + m - 1) // m * m


def _pick_batch_block(n, per_batch_bytes):
    # Fold batches while per-step work is tiny, but keep >= 2 grid steps
    # (when n allows) so both v7x TensorCores receive parallel work.
    nb = 1
    while (n % (2 * nb) == 0 and n // (2 * nb) >= 2
           and per_batch_bytes * nb < (128 << 10)):
        nb *= 2
    return nb


def spatial_gate_kernel(x_ref, w_ref, b_ref, o_ref, pad_ref, *, C, H, W, NB, CB):
    """One grid step handles NB batch elements; x_ref/o_ref are (NB, C, H*W)."""
    HW = H * W
    nchunk = C // CB
    inv_c = 1.0 / C

    for b in range(NB):  # static unroll over batch elements in this block
        # ---- 1) ChannelPool: max & mean over C, streamed in channel chunks ----
        def red_body(i, carry):
            m, s = carry
            start = i * CB
            if CB % 8 == 0:
                start = pl.multiple_of(start, 8)
            xc = x_ref[b, pl.ds(start, CB), :]                    # (CB, HW)
            m = jnp.maximum(m, jnp.max(xc, axis=0, keepdims=True))
            s = s + jnp.sum(xc, axis=0, keepdims=True)
            return m, s

        m0 = jnp.full((1, HW), -jnp.inf, dtype=jnp.float32)
        s0 = jnp.zeros((1, HW), dtype=jnp.float32)
        xmax, xsum = lax.fori_loop(0, nchunk, red_body, (m0, s0),
                                   unroll=min(nchunk, 8))
        xmean = xsum * inv_c                                      # (1, HW)

        # ---- 2) (8,128)-aligned zero-padded scratch; write cmp interior ----
        pad_ref[...] = jnp.zeros_like(pad_ref)
        for ch, src in ((0, xmax), (1, xmean)):
            for h in range(H):
                # tiny layout plumbing: flat lane row -> 2D interior row
                pad_ref[ch, PAD + h:PAD + h + 1, PAD:PAD + W] = (
                    src[:, h * W:(h + 1) * W])

        # ---- 3) 7x7 conv: hoist lane (dx) shifts; dy is a cheap sublane slice ----
        acc = jnp.zeros((H, W), dtype=jnp.float32)
        for c in range(2):
            for dx in range(KSIZE):
                plane = pad_ref[c, 0:H + 2 * PAD, dx:dx + W]       # (H+6, W)
                for dy in range(KSIZE):
                    wv = w_ref[c * KSIZE * KSIZE + dy * KSIZE + dx]  # SMEM scalar
                    acc = acc + wv * plane[dy:dy + H, :]
        acc = acc + b_ref[0]
        scale = jax.nn.sigmoid(acc)                                # (H, W)

        # back to lane-dense flat layout (tiny tensor, layout plumbing only)
        scale_flat = jnp.concatenate(
            [scale[h:h + 1, :] for h in range(H)], axis=1)         # (1, HW)
        scale_b = jnp.broadcast_to(scale_flat, (CB, HW))           # hoisted bcast

        # ---- 4) gate multiply, streamed per channel chunk, lane-dense stores ----
        def mul_body(i, _):
            start = i * CB
            if CB % 8 == 0:
                start = pl.multiple_of(start, 8)
            xc = x_ref[b, pl.ds(start, CB), :]
            o_ref[b, pl.ds(start, CB), :] = (xc * scale_b).astype(o_ref.dtype)
            return 0

        lax.fori_loop(0, nchunk, mul_body, 0, unroll=min(nchunk, 8))


@jax.jit
def spatial_gate(x, weight, bias):
    # x: (N, C, H, W); weight: (2, 7, 7) == Conv2d(2,1,7).weight[0]; bias: (1,)
    N, C, H, W = x.shape
    HW = H * W
    itemsize = x.dtype.itemsize

    # lane-dense view of the dominant traffic (free contiguous reshape)
    x_flat = x.reshape(N, C, HW)
    w_flat = weight.reshape(-1).astype(jnp.float32)    # (98,) scalars in SMEM
    b_flat = bias.reshape(-1).astype(jnp.float32)      # (1,)

    NB = _pick_batch_block(N, C * HW * itemsize)
    CB = 8 if C % 8 == 0 else C                        # channel chunk (sublanes)
    Hp = _round_up(H + 2 * PAD, 8)
    Wp = _round_up(W + 2 * PAD, 128)

    block_bytes = NB * C * HW * itemsize
    scratch_bytes = 2 * Hp * Wp * 4
    # in + out, each double-buffered, + conv scratch + slack.
    vmem_needed = 4 * block_bytes + scratch_bytes + (2 << 20)
    vmem_limit = int(min(max(vmem_needed, 16 << 20), 64 << 20))
    # TODO(synk): if 4*block_bytes approaches 64 MiB (v7x physical VMEM), add a
    # C-tiling pass (scale kept in a VMEM scratch) instead of growing the block.

    cost = pl.CostEstimate(
        flops=int(N * H * W * (2 * 2 * KSIZE * KSIZE + 3 * C)),
        transcendentals=int(N * H * W),
        bytes_accessed=int(2 * N * C * HW * itemsize + 4 * (2 * KSIZE * KSIZE + 1)),
    )

    kernel = functools.partial(spatial_gate_kernel, C=C, H=H, W=W, NB=NB, CB=CB)

    out_flat = pl.pallas_call(
        kernel,
        out_shape=jax.ShapeDtypeStruct((N, C, HW), x.dtype),
        grid=(N // NB,),
        in_specs=[
            pl.BlockSpec((NB, C, HW), lambda n: (n, 0, 0)),
            pl.BlockSpec(memory_space=pltpu.MemorySpace.SMEM),
            pl.BlockSpec(memory_space=pltpu.MemorySpace.SMEM),
        ],
        out_specs=pl.BlockSpec((NB, C, HW), lambda n: (n, 0, 0)),
        scratch_shapes=[pltpu.VMEM((2, Hp, Wp), jnp.float32)],
        compiler_params=pltpu.CompilerParams(
            dimension_semantics=("parallel",),
            vmem_limit_bytes=vmem_limit),
        cost_estimate=cost,
    )(x_flat, w_flat, b_flat)

    return out_flat.reshape(N, C, H, W)


def spatial_gate_reference(x, weight, bias):
    # Pure-JAX reference (matches torch semantics).
    xmax = jnp.max(x, axis=1, keepdims=True)
    xmean = jnp.mean(x, axis=1, keepdims=True)
    cmp = jnp.concatenate([xmax, xmean], axis=1)          # (N, 2, H, W)
    w4 = weight[None]                                     # (1, 2, 7, 7) OIHW
    out = jax.lax.conv_general_dilated(
        cmp, w4, window_strides=(1, 1), padding=((PAD, PAD), (PAD, PAD)),
        dimension_numbers=("NCHW", "OIHW", "NCHW"))
    out = out + bias.reshape(1, 1, 1, 1)
    return x * jax.nn.sigmoid(out)


if __name__ == "__main__":
    key = jax.random.PRNGKey(0)
    kx, kw, kb = jax.random.split(key, 3)

    # Deterministic synthetic Conv2d(2, 1, 7) parameters.
    weight = jax.random.normal(kw, (2, KSIZE, KSIZE), dtype=jnp.float32) * 0.1
    bias = jax.random.normal(kb, (1,), dtype=jnp.float32) * 0.1

    # Shape 1: module-implied small shape (exercises NB=1, single C chunk).
    N, C, H, W = 2, 4, 16, 16
    x = jax.random.normal(kx, (N, C, H, W), dtype=jnp.float32)
    out = jax.block_until_ready(spatial_gate(x, weight, bias))
    ref = spatial_gate_reference(x, weight, bias)
    assert out.shape == (N, C, H, W)
    assert jnp.allclose(out, ref, atol=1e-5, rtol=1e-5), "mismatch vs reference (shape 1)"

    # Shape 2: exercises the batched-block (NB>1) and chunked-channel paths.
    N2, C2, H2, W2 = 8, 16, 16, 16
    x2 = jax.random.normal(kx, (N2, C2, H2, W2), dtype=jnp.float32)
    out2 = jax.block_until_ready(spatial_gate(x2, weight, bias))
    ref2 = spatial_gate_reference(x2, weight, bias)
    assert jnp.allclose(out2, ref2, atol=1e-5, rtol=1e-5), "mismatch vs reference (shape 2)"

    print("KERNEL_OK")
</pallas_src>

<mosaic_0001>
module attributes {stable_mosaic.version = 11 : i64} {
  func.func @spatial_gate_kernel(%arg0: i32, %arg1: memref<1x4x256xf32, #tpu.memory_space<vmem>>, %arg2: memref<98xf32, #tpu.memory_space<smem>>, %arg3: memref<1xf32, #tpu.memory_space<smem>>, %arg4: memref<1x4x256xf32, #tpu.memory_space<vmem>>, %arg5: memref<2x24x128xf32, #tpu.memory_space<vmem>>) attributes {dimension_semantics = [#tpu.dimension_semantics<parallel>], iteration_bounds = array<i64: 2>, scalar_prefetch = 0 : i64, scratch_operands = 1 : i64, tpu.core_type = #tpu.core_type<tc>, window_params = [{transform_indices = @transform_0, window_bounds = array<i64: 1, 4, 256>}, {transform_indices = @transform_1, window_bounds = array<i64: 98>}, {transform_indices = @transform_2, window_bounds = array<i64: 1>}, {transform_indices = @transform_3, window_bounds = array<i64: 1, 4, 256>}]} {
    %cst = arith.constant 0xFF800000 : f32
    %0 = vector.broadcast %cst : f32 to vector<1x256xf32>
    %cst_0 = arith.constant 0.000000e+00 : f32
    %1 = vector.broadcast %cst_0 : f32 to vector<1x256xf32>
    %c0_i32 = arith.constant 0 : i32
    %c4_i32 = arith.constant 4 : i32
    %2 = arith.muli %c0_i32, %c4_i32 : i32
    %c0 = arith.constant 0 : index
    %3 = arith.index_cast %2 : i32 to index
    %c0_1 = arith.constant 0 : index
    %4 = vector.load %arg1[%c0, %3, %c0_1] : memref<1x4x256xf32, #tpu.memory_space<vmem>>, vector<1x4x256xf32>
    %5 = vector.shape_cast %4 : vector<1x4x256xf32> to vector<4x256xf32>
    %cst_2 = arith.constant dense<0xFF800000> : vector<256xf32>
    %6 = vector.multi_reduction <maximumf>, %5, %cst_2 [0] : vector<4x256xf32> to vector<256xf32>
    %7 = vector.shape_cast %6 : vector<256xf32> to vector<1x256xf32>
    %8 = arith.maximumf %0, %7 : vector<1x256xf32>
    %cst_3 = arith.constant dense<0.000000e+00> : vector<256xf32>
    %9 = vector.multi_reduction <add>, %5, %cst_3 [0] : vector<4x256xf32> to vector<256xf32>
    %10 = vector.shape_cast %9 : vector<256xf32> to vector<1x256xf32>
    %11 = arith.addf %1, %10 : vector<1x256xf32>
    %c1_i32 = arith.constant 1 : i32
    %cst_4 = arith.constant 2.500000e-01 : f32
    %12 = vector.broadcast %cst_4 : f32 to vector<1x256xf32>
    %13 = arith.mulf %11, %12 : vector<1x256xf32>
    %cst_5 = arith.constant 0.000000e+00 : f32
    %14 = vector.broadcast %cst_5 : f32 to vector<2x24x128xf32>
    %c0_6 = arith.constant 0 : index
    %c0_7 = arith.constant 0 : index
    %c0_8 = arith.constant 0 : index
    %15 = vector.load %arg5[%c0_6, %c0_7, %c0_8] : memref<2x24x128xf32, #tpu.memory_space<vmem>>, vector<2x24x128xf32>
    tpu.vector_store %arg5[%c0_6, %c0_7, %c0_8], %14 {strides = array<i32>} : memref<2x24x128xf32, #tpu.memory_space<vmem>>, vector<2x24x128xf32>,
    %16 = vector.extract_strided_slice %8 {offsets = [0, 0], sizes = [1, 16], strides = [1, 1]} : vector<1x256xf32> to vector<1x16xf32>
    %c0_9 = arith.constant 0 : index
    %c3 = arith.constant 3 : index
    %c3_10 = arith.constant 3 : index
    %17 = vector.load %arg5[%c0_9, %c3, %c3_10] : memref<2x24x128xf32, #tpu.memory_space<vmem>>, vector<1x1x16xf32>
    %18 = vector.shape_cast %17 : vector<1x1x16xf32> to vector<1x16xf32>
    %19 = vector.shape_cast %16 : vector<1x16xf32> to vector<1x1x16xf32>
    tpu.vector_store %arg5[%c0_9, %c3, %c3_10], %19 {strides = array<i32>} : memref<2x24x128xf32, #tpu.memory_space<vmem>>, vector<1x1x16xf32>,
    %20 = vector.extract_strided_slice %8 {offsets = [0, 16], sizes = [1, 16], strides = [1, 1]} : vector<1x256xf32> to vector<1x16xf32>
    %c0_11 = arith.constant 0 : index
    %c4 = arith.constant 4 : index
    %c3_12 = arith.constant 3 : index
    %21 = vector.load %arg5[%c0_11, %c4, %c3_12] : memref<2x24x128xf32, #tpu.memory_space<vmem>>, vector<1x1x16xf32>
    %22 = vector.shape_cast %21 : vector<1x1x16xf32> to vector<1x16xf32>
    %23 = vector.shape_cast %20 : vector<1x16xf32> to vector<1x1x16xf32>
    tpu.vector_store %arg5[%c0_11, %c4, %c3_12], %23 {strides = array<i32>} : memref<2x24x128xf32, #tpu.memory_space<vmem>>, vector<1x1x16xf32>,
    %24 = vector.extract_strided_slice %8 {offsets = [0, 32], sizes = [1, 16], strides = [1, 1]} : vector<1x256xf32> to vector<1x16xf32>
    %c0_13 = arith.constant 0 : index
    %c5 = arith.constant 5 : index
    %c3_14 = arith.constant 3 : index
    %25 = vector.load %arg5[%c0_13, %c5, %c3_14] : memref<2x24x128xf32, #tpu.memory_space<vmem>>, vector<1x1x16xf32>
    %26 = vector.shape_cast %25 : vector<1x1x16xf32> to vector<1x16xf32>
    %27 = vector.shape_cast %24 : vector<1x16xf32> to vector<1x1x16xf32>
    tpu.vector_store %arg5[%c0_13, %c5, %c3_14], %27 {strides = array<i32>} : memref<2x24x128xf32, #tpu.memory_space<vmem>>, vector<1x1x16xf32>,
    %28 = vector.extract_strided_slice %8 {offsets = [0, 48], sizes = [1, 16], strides = [1, 1]} : vector<1x256xf32> to vector<1x16xf32>
    %c0_15 = arith.constant 0 : index
    %c6 = arith.constant 6 : index
    %c3_16 = arith.constant 3 : index
    %29 = vector.load %arg5[%c0_15, %c6, %c3_16] : memref<2x24x128xf32, #tpu.memory_space<vmem>>, vector<1x1x16xf32>
    %30 = vector.shape_cast %29 : vector<1x1x16xf32> to vector<1x16xf32>
    %31 = vector.shape_cast %28 : vector<1x16xf32> to vector<1x1x16xf32>
    tpu.vector_store %arg5[%c0_15, %c6, %c3_16], %31 {strides = array<i32>} : memref<2x24x128xf32, #tpu.memory_space<vmem>>, vector<1x1x16xf32>,
    %32 = vector.extract_strided_slice %8 {offsets = [0, 64], sizes = [1, 16], strides = [1, 1]} : vector<1x256xf32> to vector<1x16xf32>
    %c0_17 = arith.constant 0 : index
    %c7 = arith.constant 7 : index
    %c3_18 = arith.constant 3 : index
    %33 = vector.load %arg5[%c0_17, %c7, %c3_18] : memref<2x24x128xf32, #tpu.memory_space<vmem>>, vector<1x1x16xf32>
    %34 = vector.shape_cast %33 : vector<1x1x16xf32> to vector<1x16xf32>
    %35 = vector.shape_cast %32 : vector<1x16xf32> to vector<1x1x16xf32>
    tpu.vector_store %arg5[%c0_17, %c7, %c3_18], %35 {strides = array<i32>} : memref<2x24x128xf32, #tpu.memory_space<vmem>>, vector<1x1x16xf32>,
    %36 = vector.extract_strided_slice %8 {offsets = [0, 80], sizes = [1, 16], strides = [1, 1]} : vector<1x256xf32> to vector<1x16xf32>
    %c0_19 = arith.constant 0 : index
    %c8 = arith.constant 8 : index
    %c3_20 = arith.constant 3 : index
    %37 = vector.load %arg5[%c0_19, %c8, %c3_20] : memref<2x24x128xf32, #tpu.memory_space<vmem>>, vector<1x1x16xf32>
    %38 = vector.shape_cast %37 : vector<1x1x16xf32> to vector<1x16xf32>
    %39 = vector.shape_cast %36 : vector<1x16xf32> to vector<1x1x16xf32>
    tpu.vector_store %arg5[%c0_19, %c8, %c3_20], %39 {strides = array<i32>} : memref<2x24x128xf32, #tpu.memory_space<vmem>>, vector<1x1x16xf32>,
    %40 = vector.extract_strided_slice %8 {offsets = [0, 96], sizes = [1, 16], strides = [1, 1]} : vector<1x256xf32> to vector<1x16xf32>
    %c0_21 = arith.constant 0 : index
    %c9 = arith.constant 9 : index
    %c3_22 = arith.constant 3 : index
    %41 = vector.load %arg5[%c0_21, %c9, %c3_22] : memref<2x24x128xf32, #tpu.memory_space<vmem>>, vector<1x1x16xf32>
    %42 = vector.shape_cast %41 : vector<1x1x16xf32> to vector<1x16xf32>
    %43 = vector.shape_cast %40 : vector<1x16xf32> to vector<1x1x16xf32>
    tpu.vector_store %arg5[%c0_21, %c9, %c3_22], %43 {strides = array<i32>} : memref<2x24x128xf32, #tpu.memory_space<vmem>>, vector<1x1x16xf32>,
    %44 = vector.extract_strided_slice %8 {offsets = [0, 112], sizes = [1, 16], strides = [1, 1]} : vector<1x256xf32> to vector<1x16xf32>
    %c0_23 = arith.constant 0 : index
    %c10 = arith.constant 10 : index
    %c3_24 = arith.constant 3 : index
    %45 = vector.load %arg5[%c0_23, %c10, %c3_24] : memref<2x24x128xf32, #tpu.memory_space<vmem>>, vector<1x1x16xf32>
    %46 = vector.shape_cast %45 : vector<1x1x16xf32> to vector<1x16xf32>
    %47 = vector.shape_cast %44 : vector<1x16xf32> to vector<1x1x16xf32>
    tpu.vector_store %arg5[%c0_23, %c10, %c3_24], %47 {strides = array<i32>} : memref<2x24x128xf32, #tpu.memory_space<vmem>>, vector<1x1x16xf32>,
    %48 = vector.extract_strided_slice %8 {offsets = [0, 128], sizes = [1, 16], strides = [1, 1]} : vector<1x256xf32> to vector<1x16xf32>
    %c0_25 = arith.constant 0 : index
    %c11 = arith.constant 11 : index
    %c3_26 = arith.constant 3 : index
    %49 = vector.load %arg5[%c0_25, %c11, %c3_26] : memref<2x24x128xf32, #tpu.memory_space<vmem>>, vector<1x1x16xf32>
    %50 = vector.shape_cast %49 : vector<1x1x16xf32> to vector<1x16xf32>
    %51 = vector.shape_cast %48 : vector<1x16xf32> to vector<1x1x16xf32>
    tpu.vector_store %arg5[%c0_25, %c11, %c3_26], %51 {strides = array<i32>} : memref<2x24x128xf32, #tpu.memory_space<vmem>>, vector<1x1x16xf32>,
    %52 = vector.extract_strided_slice %8 {offsets = [0, 144], sizes = [1, 16], strides = [1, 1]} : vector<1x256xf32> to vector<1x16xf32>
    %c0_27 = arith.constant 0 : index
    %c12 = arith.constant 12 : index
    %c3_28 = arith.constant 3 : index
    %53 = vector.load %arg5[%c0_27, %c12, %c3_28] : memref<2x24x128xf32, #tpu.memory_space<vmem>>, vector<1x1x16xf32>
    %54 = vector.shape_cast %53 : vector<1x1x16xf32> to vector<1x16xf32>
    %55 = vector.shape_cast %52 : vector<1x16xf32> to vector<1x1x16xf32>
    tpu.vector_store %arg5[%c0_27, %c12, %c3_28], %55 {strides = array<i32>} : memref<2x24x128xf32, #tpu.memory_space<vmem>>, vector<1x1x16xf32>,
    %56 = vector.extract_strided_slice %8 {offsets = [0, 160], sizes = [1, 16], strides = [1, 1]} : vector<1x256xf32> to vector<1x16xf32>
    %c0_29 = arith.constant 0 : index
    %c13 = arith.constant 13 : index
    %c3_30 = arith.constant 3 : index
    %57 = vector.load %arg5[%c0_29, %c13, %c3_30] : memref<2x24x128xf32, #tpu.memory_space<vmem>>, vector<1x1x16xf32>
    %58 = vector.shape_cast %57 : vector<1x1x16xf32> to vector<1x16xf32>
    %59 = vector.shape_cast %56 : vector<1x16xf32> to vector<1x1x16xf32>
    tpu.vector_store %arg5[%c0_29, %c13, %c3_30], %59 {strides = array<i32>} : memref<2x24x128xf32, #tpu.memory_space<vmem>>, vector<1x1x16xf32>,
    %60 = vector.extract_strided_slice %8 {offsets = [0, 176], sizes = [1, 16], strides = [1, 1]} : vector<1x256xf32> to vector<1x16xf32>
    %c0_31 = arith.constant 0 : index
    %c14 = arith.constant 14 : index
    %c3_32 = arith.constant 3 : index
    %61 = vector.load %arg5[%c0_31, %c14, %c3_32] : memref<2x24x128xf32, #tpu.memory_space<vmem>>, vector<1x1x16xf32>
    %62 = vector.shape_cast %61 : vector<1x1x16xf32> to vector<1x16xf32>
    %63 = vector.shape_cast %60 : vector<1x16xf32> to vector<1x1x16xf32>
    tpu.vector_store %arg5[%c0_31, %c14, %c3_32], %63 {strides = array<i32>} : memref<2x24x128xf32, #tpu.memory_space<vmem>>, vector<1x1x16xf32>,
    %64 = vector.extract_strided_slice %8 {offsets = [0, 192], sizes = [1, 16], strides = [1, 1]} : vector<1x256xf32> to vector<1x16xf32>
    %c0_33 = arith.constant 0 : index
    %c15 = arith.constant 15 : index
    %c3_34 = arith.constant 3 : index
    %65 = vector.load %arg5[%c0_33, %c15, %c3_34] : memref<2x24x128xf32, #tpu.memory_space<vmem>>, vector<1x1x16xf32>
    %66 = vector.shape_cast %65 : vector<1x1x16xf32> to vector<1x16xf32>
    %67 = vector.shape_cast %64 : vector<1x16xf32> to vector<1x1x16xf32>
    tpu.vector_store %arg5[%c0_33, %c15, %c3_34], %67 {strides = array<i32>} : memref<2x24x128xf32, #tpu.memory_space<vmem>>, vector<1x1x16xf32>,
    %68 = vector.extract_strided_slice %8 {offsets = [0, 208], sizes = [1, 16], strides = [1, 1]} : vector<1x256xf32> to vector<1x16xf32>
    %c0_35 = arith.constant 0 : index
    %c16 = arith.constant 16 : index
    %c3_36 = arith.constant 3 : index
    %69 = vector.load %arg5[%c0_35, %c16, %c3_36] : memref<2x24x128xf32, #tpu.memory_space<vmem>>, vector<1x1x16xf32>
    %70 = vector.shape_cast %69 : vector<1x1x16xf32> to vector<1x16xf32>
    %71 = vector.shape_cast %68 : vector<1x16xf32> to vector<1x1x16xf32>
    tpu.vector_store %arg5[%c0_35, %c16, %c3_36], %71 {strides = array<i32>} : memref<2x24x128xf32, #tpu.memory_space<vmem>>, vector<1x1x16xf32>,
    %72 = vector.extract_strided_slice %8 {offsets = [0, 224], sizes = [1, 16], strides = [1, 1]} : vector<1x256xf32> to vector<1x16xf32>
    %c0_37 = arith.constant 0 : index
    %c17 = arith.constant 17 : index
    %c3_38 = arith.constant 3 : index
    %73 = vector.load %arg5[%c0_37, %c17, %c3_38] : memref<2x24x128xf32, #tpu.memory_space<vmem>>, vector<1x1x16xf32>
    %74 = vector.shape_cast %73 : vector<1x1x16xf32> to vector<1x16xf32>
    %75 = vector.shape_cast %72 : vector<1x16xf32> to vector<1x1x16xf32>
    tpu.vector_store %arg5[%c0_37, %c17, %c3_38], %75 {strides = array<i32>} : memref<2x24x128xf32, #tpu.memory_space<vmem>>, vector<1x1x16xf32>,
    %76 = vector.extract_strided_slice %8 {offsets = [0, 240], sizes = [1, 16], strides = [1, 1]} : vector<1x256xf32> to vector<1x16xf32>
    %c0_39 = arith.constant 0 : index
    %c18 = arith.constant 18 : index
    %c3_40 = arith.constant 3 : index
    %77 = vector.load %arg5[%c0_39, %c18, %c3_40] : memref<2x24x128xf32, #tpu.memory_space<vmem>>, vector<1x1x16xf32>
    %78 = vector.shape_cast %77 : vector<1x1x16xf32> to vector<1x16xf32>
    %79 = vector.shape_cast %76 : vector<1x16xf32> to vector<1x1x16xf32>
    tpu.vector_store %arg5[%c0_39, %c18, %c3_40], %79 {strides = array<i32>} : memref<2x24x128xf32, #tpu.memory_space<vmem>>, vector<1x1x16xf32>,
    %80 = vector.extract_strided_slice %13 {offsets = [0, 0], sizes = [1, 16], strides = [1, 1]} : vector<1x256xf32> to vector<1x16xf32>
    %c1 = arith.constant 1 : index
    %c3_41 = arith.constant 3 : index
    %c3_42 = arith.constant 3 : index
    %81 = vector.load %arg5[%c1, %c3_41, %c3_42] : memref<2x24x128xf32, #tpu.memory_space<vmem>>, vector<1x1x16xf32>
    %82 = vector.shape_cast %81 : vector<1x1x16xf32> to vector<1x16xf32>
    %83 = vector.shape_cast %80 : vector<1x16xf32> to vector<1x1x16xf32>
    tpu.vector_store %arg5[%c1, %c3_41, %c3_42], %83 {strides = array<i32>} : memref<2x24x128xf32, #tpu.memory_space<vmem>>, vector<1x1x16xf32>,
    %84 = vector.extract_strided_slice %13 {offsets = [0, 16], sizes = [1, 16], strides = [1, 1]} : vector<1x256xf32> to vector<1x16xf32>
    %c1_43 = arith.constant 1 : index
    %c4_44 = arith.constant 4 : index
    %c3_45 = arith.constant 3 : index
    %85 = vector.load %arg5[%c1_43, %c4_44, %c3_45] : memref<2x24x128xf32, #tpu.memory_space<vmem>>, vector<1x1x16xf32>
    %86 = vector.shape_cast %85 : vector<1x1x16xf32> to vector<1x16xf32>
    %87 = vector.shape_cast %84 : vector<1x16xf32> to vector<1x1x16xf32>
    tpu.vector_store %arg5[%c1_43, %c4_44, %c3_45], %87 {strides = array<i32>} : memref<2x24x128xf32, #tpu.memory_space<vmem>>, vector<1x1x16xf32>,
    %88 = vector.extract_strided_slice %13 {offsets = [0, 32], sizes = [1, 16], strides = [1, 1]} : vector<1x256xf32> to vector<1x16xf32>
    %c1_46 = arith.constant 1 : index
    %c5_47 = arith.constant 5 : index
    %c3_48 = arith.constant 3 : index
    %89 = vector.load %arg5[%c1_46, %c5_47, %c3_48] : memref<2x24x128xf32, #tpu.memory_space<vmem>>, vector<1x1x16xf32>
    %90 = vector.shape_cast %89 : vector<1x1x16xf32> to vector<1x16xf32>
    %91 = vector.shape_cast %88 : vector<1x16xf32> to vector<1x1x16xf32>
    tpu.vector_store %arg5[%c1_46, %c5_47, %c3_48], %91 {strides = array<i32>} : memref<2x24x128xf32, #tpu.memory_space<vmem>>, vector<1x1x16xf32>,
    %92 = vector.extract_strided_slice %13 {offsets = [0, 48], sizes = [1, 16], strides = [1, 1]} : vector<1x256xf32> to vector<1x16xf32>
    %c1_49 = arith.constant 1 : index
    %c6_50 = arith.constant 6 : index
    %c3_51 = arith.constant 3 : index
    %93 = vector.load %arg5[%c1_49, %c6_50, %c3_51] : memref<2x24x128xf32, #tpu.memory_space<vmem>>, vector<1x1x16xf32>
    %94 = vector.shape_cast %93 : vector<1x1x16xf32> to vector<1x16xf32>
    %95 = vector.shape_cast %92 : vector<1x16xf32> to vector<1x1x16xf32>
    tpu.vector_store %arg5[%c1_49, %c6_50, %c3_51], %95 {strides = array<i32>} : memref<2x24x128xf32, #tpu.memory_space<vmem>>, vector<1x1x16xf32>,
    %96 = vector.extract_strided_slice %13 {offsets = [0, 64], sizes = [1, 16], strides = [1, 1]} : vector<1x256xf32> to vector<1x16xf32>
    %c1_52 = arith.constant 1 : index
    %c7_53 = arith.constant 7 : index
    %c3_54 = arith.constant 3 : index
    %97 = vector.load %arg5[%c1_52, %c7_53, %c3_54] : memref<2x24x128xf32, #tpu.memory_space<vmem>>, vector<1x1x16xf32>
    %98 = vector.shape_cast %97 : vector<1x1x16xf32> to vector<1x16xf32>
    %99 = vector.shape_cast %96 : vector<1x16xf32> to vector<1x1x16xf32>
    tpu.vector_store %arg5[%c1_52, %c7_53, %c3_54], %99 {strides = array<i32>} : memref<2x24x128xf32, #tpu.memory_space<vmem>>, vector<1x1x16xf32>,
    %100 = vector.extract_strided_slice %13 {offsets = [0, 80], sizes = [1, 16], strides = [1, 1]} : vector<1x256xf32> to vector<1x16xf32>
    %c1_55 = arith.constant 1 : index
    %c8_56 = arith.constant 8 : index
    %c3_57 = arith.constant 3 : index
    %101 = vector.load %arg5[%c1_55, %c8_56, %c3_57] : memref<2x24x128xf32, #tpu.memory_space<vmem>>, vector<1x1x16xf32>
    %102 = vector.shape_cast %101 : vector<1x1x16xf32> to vector<1x16xf32>
    %103 = vector.shape_cast %100 : vector<1x16xf32> to vector<1x1x16xf32>
    tpu.vector_store %arg5[%c1_55, %c8_56, %c3_57], %103 {strides = array<i32>} : memref<2x24x128xf32, #tpu.memory_space<vmem>>, vector<1x1x16xf32>,
    %104 = vector.extract_strided_slice %13 {offsets = [0, 96], sizes = [1, 16], strides = [1, 1]} : vector<1x256xf32> to vector<1x16xf32>
    %c1_58 = arith.constant 1 : index
    %c9_59 = arith.constant 9 : index
    %c3_60 = arith.constant 3 : index
    %105 = vector.load %arg5[%c1_58, %c9_59, %c3_60] : memref<2x24x128xf32, #tpu.memory_space<vmem>>, vector<1x1x16xf32>
    %106 = vector.shape_cast %105 : vector<1x1x16xf32> to vector<1x16xf32>
    %107 = vector.shape_cast %104 : vector<1x16xf32> to vector<1x1x16xf32>
    tpu.vector_store %arg5[%c1_58, %c9_59, %c3_60], %107 {strides = array<i32>} : memref<2x24x128xf32, #tpu.memory_space<vmem>>, vector<1x1x16xf32>,
    %108 = vector.extract_strided_slice %13 {offsets = [0, 112], sizes = [1, 16], strides = [1, 1]} : vector<1x256xf32> to vector<1x16xf32>
    %c1_61 = arith.constant 1 : index
    %c10_62 = arith.constant 10 : index
    %c3_63 = arith.constant 3 : index
    %109 = vector.load %arg5[%c1_61, %c10_62, %c3_63] : memref<2x24x128xf32, #tpu.memory_space<vmem>>, vector<1x1x16xf32>
    %110 = vector.shape_cast %109 : vector<1x1x16xf32> to vector<1x16xf32>
    %111 = vector.shape_cast %108 : vector<1x16xf32> to vector<1x1x16xf32>
    tpu.vector_store %arg5[%c1_61, %c10_62, %c3_63], %111 {strides = array<i32>} : memref<2x24x128xf32, #tpu.memory_space<vmem>>, vector<1x1x16xf32>,
    %112 = vector.extract_strided_slice %13 {offsets = [0, 128], sizes = [1, 16], strides = [1, 1]} : vector<1x256xf32> to vector<1x16xf32>
    %c1_64 = arith.constant 1 : index
    %c11_65 = arith.constant 11 : index
    %c3_66 = arith.constant 3 : index
    %113 = vector.load %arg5[%c1_64, %c11_65, %c3_66] : memref<2x24x128xf32, #tpu.memory_space<vmem>>, vector<1x1x16xf32>
    %114 = vector.shape_cast %113 : vector<1x1x16xf32> to vector<1x16xf32>
    %115 = vector.shape_cast %112 : vector<1x16xf32> to vector<1x1x16xf32>
    tpu.vector_store %arg5[%c1_64, %c11_65, %c3_66], %115 {strides = array<i32>} : memref<2x24x128xf32, #tpu.memory_space<vmem>>, vector<1x1x16xf32>,
    %116 = vector.extract_strided_slice %13 {offsets = [0, 144], sizes = [1, 16], strides = [1, 1]} : vector<1x256xf32> to vector<1x16xf32>
    %c1_67 = arith.constant 1 : index
    %c12_68 = arith.constant 12 : index
    %c3_69 = arith.constant 3 : index
    %117 = vector.load %arg5[%c1_67, %c12_68, %c3_69] : memref<2x24x128xf32, #tpu.memory_space<vmem>>, vector<1x1x16xf32>
    %118 = vector.shape_cast %117 : vector<1x1x16xf32> to vector<1x16xf32>
    %119 = vector.shape_cast %116 : vector<1x16xf32> to vector<1x1x16xf32>
    tpu.vector_store %arg5[%c1_67, %c12_68, %c3_69], %119 {strides = array<i32>} : memref<2x24x128xf32, #tpu.memory_space<vmem>>, vector<1x1x16xf32>,
    %120 = vector.extract_strided_slice %13 {offsets = [0, 160], sizes = [1, 16], strides = [1, 1]} : vector<1x256xf32> to vector<1x16xf32>
    %c1_70 = arith.constant 1 : index
    %c13_71 = arith.constant 13 : index
    %c3_72 = arith.constant 3 : index
    %121 = vector.load %arg5[%c1_70, %c13_71, %c3_72] : memref<2x24x128xf32, #tpu.memory_space<vmem>>, vector<1x1x16xf32>
    %122 = vector.shape_cast %121 : vector<1x1x16xf32> to vector<1x16xf32>
    %123 = vector.shape_cast %120 : vector<1x16xf32> to vector<1x1x16xf32>
    tpu.vector_store %arg5[%c1_70, %c13_71, %c3_72], %123 {strides = array<i32>} : memref<2x24x128xf32, #tpu.memory_space<vmem>>, vector<1x1x16xf32>,
    %124 = vector.extract_strided_slice %13 {offsets = [0, 176], sizes = [1, 16], strides = [1, 1]} : vector<1x256xf32> to vector<1x16xf32>
    %c1_73 = arith.constant 1 : index
    %c14_74 = arith.constant 14 : index
    %c3_75 = arith.constant 3 : index
    %125 = vector.load %arg5[%c1_73, %c14_74, %c3_75] : memref<2x24x128xf32, #tpu.memory_space<vmem>>, vector<1x1x16xf32>
    %126 = vector.shape_cast %125 : vector<1x1x16xf32> to vector<1x16xf32>
    %127 = vector.shape_cast %124 : vector<1x16xf32> to vector<1x1x16xf32>
    tpu.vector_store %arg5[%c1_73, %c14_74, %c3_75], %127 {strides = array<i32>} : memref<2x24x128xf32, #tpu.memory_space<vmem>>, vector<1x1x16xf32>,
    %128 = vector.extract_strided_slice %13 {offsets = [0, 192], sizes = [1, 16], strides = [1, 1]} : vector<1x256xf32> to vector<1x16xf32>
    %c1_76 = arith.constant 1 : index
    %c15_77 = arith.constant 15 : index
    %c3_78 = arith.constant 3 : index
    %129 = vector.load %arg5[%c1_76, %c15_77, %c3_78] : memref<2x24x128xf32, #tpu.memory_space<vmem>>, vector<1x1x16xf32>
    %130 = vector.shape_cast %129 : vector<1x1x16xf32> to vector<1x16xf32>
    %131 = vector.shape_cast %128 : vector<1x16xf32> to vector<1x1x16xf32>
    tpu.vector_store %arg5[%c1_76, %c15_77, %c3_78], %131 {strides = array<i32>} : memref<2x24x128xf32, #tpu.memory_space<vmem>>, vector<1x1x16xf32>,
    %132 = vector.extract_strided_slice %13 {offsets = [0, 208], sizes = [1, 16], strides = [1, 1]} : vector<1x256xf32> to vector<1x16xf32>
    %c1_79 = arith.constant 1 : index
    %c16_80 = arith.constant 16 : index
    %c3_81 = arith.constant 3 : index
    %133 = vector.load %arg5[%c1_79, %c16_80, %c3_81] : memref<2x24x128xf32, #tpu.memory_space<vmem>>, vector<1x1x16xf32>
    %134 = vector.shape_cast %133 : vector<1x1x16xf32> to vector<1x16xf32>
    %135 = vector.shape_cast %132 : vector<1x16xf32> to vector<1x1x16xf32>
    tpu.vector_store %arg5[%c1_79, %c16_80, %c3_81], %135 {strides = array<i32>} : memref<2x24x128xf32, #tpu.memory_space<vmem>>, vector<1x1x16xf32>,
    %136 = vector.extract_strided_slice %13 {offsets = [0, 224], sizes = [1, 16], strides = [1, 1]} : vector<1x256xf32> to vector<1x16xf32>
    %c1_82 = arith.constant 1 : index
    %c17_83 = arith.constant 17 : index
    %c3_84 = arith.constant 3 : index
    %137 = vector.load %arg5[%c1_82, %c17_83, %c3_84] : memref<2x24x128xf32, #tpu.memory_space<vmem>>, vector<1x1x16xf32>
    %138 = vector.shape_cast %137 : vector<1x1x16xf32> to vector<1x16xf32>
    %139 = vector.shape_cast %136 : vector<1x16xf32> to vector<1x1x16xf32>
    tpu.vector_store %arg5[%c1_82, %c17_83, %c3_84], %139 {strides = array<i32>} : memref<2x24x128xf32, #tpu.memory_space<vmem>>, vector<1x1x16xf32>,
    %140 = vector.extract_strided_slice %13 {offsets = [0, 240], sizes = [1, 16], strides = [1, 1]} : vector<1x256xf32> to vector<1x16xf32>
    %c1_85 = arith.constant 1 : index
    %c18_86 = arith.constant 18 : index
    %c3_87 = arith.constant 3 : index
    %141 = vector.load %arg5[%c1_85, %c18_86, %c3_87] : memref<2x24x128xf32, #tpu.memory_space<vmem>>, vector<1x1x16xf32>
    %142 = vector.shape_cast %141 : vector<1x1x16xf32> to vector<1x16xf32>
    %143 = vector.shape_cast %140 : vector<1x16xf32> to vector<1x1x16xf32>
    tpu.vector_store %arg5[%c1_85, %c18_86, %c3_87], %143 {strides = array<i32>} : memref<2x24x128xf32, #tpu.memory_space<vmem>>, vector<1x1x16xf32>,
    %cst_88 = arith.constant 0.000000e+00 : f32
    %144 = vector.broadcast %cst_88 : f32 to vector<16x16xf32>
    %c0_89 = arith.constant 0 : index
    %c0_90 = arith.constant 0 : index
    %c0_91 = arith.constant 0 : index
    %145 = vector.load %arg5[%c0_89, %c0_90, %c0_91] : memref<2x24x128xf32, #tpu.memory_space<vmem>>, vector<1x22x16xf32>
    %146 = vector.shape_cast %145 : vector<1x22x16xf32> to vector<22x16xf32>
    %c0_92 = arith.constant 0 : index
    %147 = memref.load %arg2[%c0_92] : memref<98xf32, #tpu.memory_space<smem>>
    %148 = vector.extract_strided_slice %146 {offsets = [0, 0], sizes = [16, 16], strides = [1, 1]} : vector<22x16xf32> to vector<16x16xf32>
    %149 = vector.broadcast %147 : f32 to vector<16x16xf32>
    %150 = arith.mulf %149, %148 : vector<16x16xf32>
    %151 = arith.addf %144, %150 : vector<16x16xf32>
    %c7_93 = arith.constant 7 : index
    %152 = memref.load %arg2[%c7_93] : memref<98xf32, #tpu.memory_space<smem>>
    %153 = vector.extract_strided_slice %146 {offsets = [1, 0], sizes = [16, 16], strides = [1, 1]} : vector<22x16xf32> to vector<16x16xf32>
    %154 = vector.broadcast %152 : f32 to vector<16x16xf32>
    %155 = arith.mulf %154, %153 : vector<16x16xf32>
    %156 = arith.addf %151, %155 : vector<16x16xf32>
    %c14_94 = arith.constant 14 : index
    %157 = memref.load %arg2[%c14_94] : memref<98xf32, #tpu.memory_space<smem>>
    %158 = vector.extract_strided_slice %146 {offsets = [2, 0], sizes = [16, 16], strides = [1, 1]} : vector<22x16xf32> to vector<16x16xf32>
    %159 = vector.broadcast %157 : f32 to vector<16x16xf32>
    %160 = arith.mulf %159, %158 : vector<16x16xf32>
    %161 = arith.addf %156, %160 : vector<16x16xf32>
    %c21 = arith.constant 21 : index
    %162 = memref.load %arg2[%c21] : memref<98xf32, #tpu.memory_space<smem>>
    %163 = vector.extract_strided_slice %146 {offsets = [3, 0], sizes = [16, 16], strides = [1, 1]} : vector<22x16xf32> to vector<16x16xf32>
    %164 = vector.broadcast %162 : f32 to vector<16x16xf32>
    %165 = arith.mulf %164, %163 : vector<16x16xf32>
    %166 = arith.addf %161, %165 : vector<16x16xf32>
    %c28 = arith.constant 28 : index
    %167 = memref.load %arg2[%c28] : memref<98xf32, #tpu.memory_space<smem>>
    %168 = vector.extract_strided_slice %146 {offsets = [4, 0], sizes = [16, 16], strides = [1, 1]} : vector<22x16xf32> to vector<16x16xf32>
    %169 = vector.broadcast %167 : f32 to vector<16x16xf32>
    %170 = arith.mulf %169, %168 : vector<16x16xf32>
    %171 = arith.addf %166, %170 : vector<16x16xf32>
    %c35 = arith.constant 35 : index
    %172 = memref.load %arg2[%c35] : memref<98xf32, #tpu.memory_space<smem>>
    %173 = vector.extract_strided_slice %146 {offsets = [5, 0], sizes = [16, 16], strides = [1, 1]} : vector<22x16xf32> to vector<16x16xf32>
    %174 = vector.broadcast %172 : f32 to vector<16x16xf32>
    %175 = arith.mulf %174, %173 : vector<16x16xf32>
    %176 = arith.addf %171, %175 : vector<16x16xf32>
    %c42 = arith.constant 42 : index
    %177 = memref.load %arg2[%c42] : memref<98xf32, #tpu.memory_space<smem>>
    %178 = vector.extract_strided_slice %146 {offsets = [6, 0], sizes = [16, 16], strides = [1, 1]} : vector<22x16xf32> to vector<16x16xf32>
    %179 = vector.broadcast %177 : f32 to vector<16x16xf32>
    %180 = arith.mulf %179, %178 : vector<16x16xf32>
    %181 = arith.addf %176, %180 : vector<16x16xf32>
    %c0_95 = arith.constant 0 : index
    %c0_96 = arith.constant 0 : index
    %c1_97 = arith.constant 1 : index
    %182 = vector.load %arg5[%c0_95, %c0_96, %c1_97] : memref<2x24x128xf32, #tpu.memory_space<vmem>>, vector<1x22x16xf32>
    %183 = vector.shape_cast %182 : vector<1x22x16xf32> to vector<22x16xf32>
    %c1_98 = arith.constant 1 : index
    %184 = memref.load %arg2[%c1_98] : memref<98xf32, #tpu.memory_space<smem>>
    %185 = vector.extract_strided_slice %183 {offsets = [0, 0], sizes = [16, 16], strides = [1, 1]} : vector<22x16xf32> to vector<16x16xf32>
    %186 = vector.broadcast %184 : f32 to vector<16x16xf32>
    %187 = arith.mulf %186, %185 : vector<16x16xf32>
    %188 = arith.addf %181, %187 : vector<16x16xf32>
    %c8_99 = arith.constant 8 : index
    %189 = memref.load %arg2[%c8_99] : memref<98xf32, #tpu.memory_space<smem>>
    %190 = vector.extract_strided_slice %183 {offsets = [1, 0], sizes = [16, 16], strides = [1, 1]} : vector<22x16xf32> to vector<16x16xf32>
    %191 = vector.broadcast %189 : f32 to vector<16x16xf32>
    %192 = arith.mulf %191, %190 : vector<16x16xf32>
    %193 = arith.addf %188, %192 : vector<16x16xf32>
    %c15_100 = arith.constant 15 : index
    %194 = memref.load %arg2[%c15_100] : memref<98xf32, #tpu.memory_space<smem>>
    %195 = vector.extract_strided_slice %183 {offsets = [2, 0], sizes = [16, 16], strides = [1, 1]} : vector<22x16xf32> to vector<16x16xf32>
    %196 = vector.broadcast %194 : f32 to vector<16x16xf32>
    %197 = arith.mulf %196, %195 : vector<16x16xf32>
    %198 = arith.addf %193, %197 : vector<16x16xf32>
    %c22 = arith.constant 22 : index
    %199 = memref.load %arg2[%c22] : memref<98xf32, #tpu.memory_space<smem>>
    %200 = vector.extract_strided_slice %183 {offsets = [3, 0], sizes = [16, 16], strides = [1, 1]} : vector<22x16xf32> to vector<16x16xf32>
    %201 = vector.broadcast %199 : f32 to vector<16x16xf32>
    %202 = arith.mulf %201, %200 : vector<16x16xf32>
    %203 = arith.addf %198, %202 : vector<16x16xf32>
    %c29 = arith.constant 29 : index
    %204 = memref.load %arg2[%c29] : memref<98xf32, #tpu.memory_space<smem>>
    %205 = vector.extract_strided_slice %183 {offsets = [4, 0], sizes = [16, 16], strides = [1, 1]} : vector<22x16xf32> to vector<16x16xf32>
    %206 = vector.broadcast %204 : f32 to vector<16x16xf32>
    %207 = arith.mulf %206, %205 : vector<16x16xf32>
    %208 = arith.addf %203, %207 : vector<16x16xf32>
    %c36 = arith.constant 36 : index
    %209 = memref.load %arg2[%c36] : memref<98xf32, #tpu.memory_space<smem>>
    %210 = vector.extract_strided_slice %183 {offsets = [5, 0], sizes = [16, 16], strides = [1, 1]} : vector<22x16xf32> to vector<16x16xf32>
    %211 = vector.broadcast %209 : f32 to vector<16x16xf32>
    %212 = arith.mulf %211, %210 : vector<16x16xf32>
    %213 = arith.addf %208, %212 : vector<16x16xf32>
    %c43 = arith.constant 43 : index
    %214 = memref.load %arg2[%c43] : memref<98xf32, #tpu.memory_space<smem>>
    %215 = vector.extract_strided_slice %183 {offsets = [6, 0], sizes = [16, 16], strides = [1, 1]} : vector<22x16xf32> to vector<16x16xf32>
    %216 = vector.broadcast %214 : f32 to vector<16x16xf32>
    %217 = arith.mulf %216, %215 : vector<16x16xf32>
    %218 = arith.addf %213, %217 : vector<16x16xf32>
    %c0_101 = arith.constant 0 : index
    %c0_102 = arith.constant 0 : index
    %c2 = arith.constant 2 : index
    %219 = vector.load %arg5[%c0_101, %c0_102, %c2] : memref<2x24x128xf32, #tpu.memory_space<vmem>>, vector<1x22x16xf32>
    %220 = vector.shape_cast %219 : vector<1x22x16xf32> to vector<22x16xf32>
    %c2_103 = arith.constant 2 : index
    %221 = memref.load %arg2[%c2_103] : memref<98xf32, #tpu.memory_space<smem>>
    %222 = vector.extract_strided_slice %220 {offsets = [0, 0], sizes = [16, 16], strides = [1, 1]} : vector<22x16xf32> to vector<16x16xf32>
    %223 = vector.broadcast %221 : f32 to vector<16x16xf32>
    %224 = arith.mulf %223, %222 : vector<16x16xf32>
    %225 = arith.addf %218, %224 : vector<16x16xf32>
    %c9_104 = arith.constant 9 : index
    %226 = memref.load %arg2[%c9_104] : memref<98xf32, #tpu.memory_space<smem>>
    %227 = vector.extract_strided_slice %220 {offsets = [1, 0], sizes = [16, 16], strides = [1, 1]} : vector<22x16xf32> to vector<16x16xf32>
    %228 = vector.broadcast %226 : f32 to vector<16x16xf32>
    %229 = arith.mulf %228, %227 : vector<16x16xf32>
    %230 = arith.addf %225, %229 : vector<16x16xf32>
    %c16_105 = arith.constant 16 : index
    %231 = memref.load %arg2[%c16_105] : memref<98xf32, #tpu.memory_space<smem>>
    %232 = vector.extract_strided_slice %220 {offsets = [2, 0], sizes = [16, 16], strides = [1, 1]} : vector<22x16xf32> to vector<16x16xf32>
    %233 = vector.broadcast %231 : f32 to vector<16x16xf32>
    %234 = arith.mulf %233, %232 : vector<16x16xf32>
    %235 = arith.addf %230, %234 : vector<16x16xf32>
    %c23 = arith.constant 23 : index
    %236 = memref.load %arg2[%c23] : memref<98xf32, #tpu.memory_space<smem>>
    %237 = vector.extract_strided_slice %220 {offsets = [3, 0], sizes = [16, 16], strides = [1, 1]} : vector<22x16xf32> to vector<16x16xf32>
    %238 = vector.broadcast %236 : f32 to vector<16x16xf32>
    %239 = arith.mulf %238, %237 : vector<16x16xf32>
    %240 = arith.addf %235, %239 : vector<16x16xf32>
    %c30 = arith.constant 30 : index
    %241 = memref.load %arg2[%c30] : memref<98xf32, #tpu.memory_space<smem>>
    %242 = vector.extract_strided_slice %220 {offsets = [4, 0], sizes = [16, 16], strides = [1, 1]} : vector<22x16xf32> to vector<16x16xf32>
    %243 = vector.broadcast %241 : f32 to vector<16x16xf32>
    %244 = arith.mulf %243, %242 : vector<16x16xf32>
    %245 = arith.addf %240, %244 : vector<16x16xf32>
    %c37 = arith.constant 37 : index
    %246 = memref.load %arg2[%c37] : memref<98xf32, #tpu.memory_space<smem>>
    %247 = vector.extract_strided_slice %220 {offsets = [5, 0], sizes = [16, 16], strides = [1, 1]} : vector<22x16xf32> to vector<16x16xf32>
    %248 = vector.broadcast %246 : f32 to vector<16x16xf32>
    %249 = arith.mulf %248, %247 : vector<16x16xf32>
    %250 = arith.addf %245, %249 : vector<16x16xf32>
    %c44 = arith.constant 44 : index
    %251 = memref.load %arg2[%c44] : memref<98xf32, #tpu.memory_space<smem>>
    %252 = vector.extract_strided_slice %220 {offsets = [6, 0], sizes = [16, 16], strides = [1, 1]} : vector<22x16xf32> to vector<16x16xf32>
    %253 = vector.broadcast %251 : f32 to vector<16x16xf32>
    %254 = arith.mulf %253, %252 : vector<16x16xf32>
    %255 = arith.addf %250, %254 : vector<16x16xf32>
    %c0_106 = arith.constant 0 : index
    %c0_107 = arith.constant 0 : index
    %c3_108 = arith.constant 3 : index
    %256 = vector.load %arg5[%c0_106, %c0_107, %c3_108] : memref<2x24x128xf32, #tpu.memory_space<vmem>>, vector<1x22x16xf32>
    %257 = vector.shape_cast %256 : vector<1x22x16xf32> to vector<22x16xf32>
    %c3_109 = arith.constant 3 : index
    %258 = memref.load %arg2[%c3_109] : memref<98xf32, #tpu.memory_space<smem>>
    %259 = vector.extract_strided_slice %257 {offsets = [0, 0], sizes = [16, 16], strides = [1, 1]} : vector<22x16xf32> to vector<16x16xf32>
    %260 = vector.broadcast %258 : f32 to vector<16x16xf32>
    %261 = arith.mulf %260, %259 : vector<16x16xf32>
    %262 = arith.addf %255, %261 : vector<16x16xf32>
    %c10_110 = arith.constant 10 : index
    %263 = memref.load %arg2[%c10_110] : memref<98xf32, #tpu.memory_space<smem>>
    %264 = vector.extract_strided_slice %257 {offsets = [1, 0], sizes = [16, 16], strides = [1, 1]} : vector<22x16xf32> to vector<16x16xf32>
    %265 = vector.broadcast %263 : f32 to vector<16x16xf32>
    %266 = arith.mulf %265, %264 : vector<16x16xf32>
    %267 = arith.addf %262, %266 : vector<16x16xf32>
    %c17_111 = arith.constant 17 : index
    %268 = memref.load %arg2[%c17_111] : memref<98xf32, #tpu.memory_space<smem>>
    %269 = vector.extract_strided_slice %257 {offsets = [2, 0], sizes = [16, 16], strides = [1, 1]} : vector<22x16xf32> to vector<16x16xf32>
    %270 = vector.broadcast %268 : f32 to vector<16x16xf32>
    %271 = arith.mulf %270, %269 : vector<16x16xf32>
    %272 = arith.addf %267, %271 : vector<16x16xf32>
    %c24 = arith.constant 24 : index
    %273 = memref.load %arg2[%c24] : memref<98xf32, #tpu.memory_space<smem>>
    %274 = vector.extract_strided_slice %257 {offsets = [3, 0], sizes = [16, 16], strides = [1, 1]} : vector<22x16xf32> to vector<16x16xf32>
    %275 = vector.broadcast %273 : f32 to vector<16x16xf32>
    %276 = arith.mulf %275, %274 : vector<16x16xf32>
    %277 = arith.addf %272, %276 : vector<16x16xf32>
    %c31 = arith.constant 31 : index
    %278 = memref.load %arg2[%c31] : memref<98xf32, #tpu.memory_space<smem>>
    %279 = vector.extract_strided_slice %257 {offsets = [4, 0], sizes = [16, 16], strides = [1, 1]} : vector<22x16xf32> to vector<16x16xf32>
    %280 = vector.broadcast %278 : f32 to vector<16x16xf32>
    %281 = arith.mulf %280, %279 : vector<16x16xf32>
    %282 = arith.addf %277, %281 : vector<16x16xf32>
    %c38 = arith.constant 38 : index
    %283 = memref.load %arg2[%c38] : memref<98xf32, #tpu.memory_space<smem>>
    %284 = vector.extract_strided_slice %257 {offsets = [5, 0], sizes = [16, 16], strides = [1, 1]} : vector<22x16xf32> to vector<16x16xf32>
    %285 = vector.broadcast %283 : f32 to vector<16x16xf32>
    %286 = arith.mulf %285, %284 : vector<16x16xf32>
    %287 = arith.addf %282, %286 : vector<16x16xf32>
    %c45 = arith.constant 45 : index
    %288 = memref.load %arg2[%c45] : memref<98xf32, #tpu.memory_space<smem>>
    %289 = vector.extract_strided_slice %257 {offsets = [6, 0], sizes = [16, 16], strides = [1, 1]} : vector<22x16xf32> to vector<16x16xf32>
    %290 = vector.broadcast %288 : f32 to vector<16x16xf32>
    %291 = arith.mulf %290, %289 : vector<16x16xf32>
    %292 = arith.addf %287, %291 : vector<16x16xf32>
    %c0_112 = arith.constant 0 : index
    %c0_113 = arith.constant 0 : index
    %c4_114 = arith.constant 4 : index
    %293 = vector.load %arg5[%c0_112, %c0_113, %c4_114] : memref<2x24x128xf32, #tpu.memory_space<vmem>>, vector<1x22x16xf32>
    %294 = vector.shape_cast %293 : vector<1x22x16xf32> to vector<22x16xf32>
    %c4_115 = arith.constant 4 : index
    %295 = memref.load %arg2[%c4_115] : memref<98xf32, #tpu.memory_space<smem>>
    %296 = vector.extract_strided_slice %294 {offsets = [0, 0], sizes = [16, 16], strides = [1, 1]} : vector<22x16xf32> to vector<16x16xf32>
    %297 = vector.broadcast %295 : f32 to vector<16x16xf32>
    %298 = arith.mulf %297, %296 : vector<16x16xf32>
    %299 = arith.addf %292, %298 : vector<16x16xf32>
    %c11_116 = arith.constant 11 : index
    %300 = memref.load %arg2[%c11_116] : memref<98xf32, #tpu.memory_space<smem>>
    %301 = vector.extract_strided_slice %294 {offsets = [1, 0], sizes = [16, 16], strides = [1, 1]} : vector<22x16xf32> to vector<16x16xf32>
    %302 = vector.broadcast %300 : f32 to vector<16x16xf32>
    %303 = arith.mulf %302, %301 : vector<16x16xf32>
    %304 = arith.addf %299, %303 : vector<16x16xf32>
    %c18_117 = arith.constant 18 : index
    %305 = memref.load %arg2[%c18_117] : memref<98xf32, #tpu.memory_space<smem>>
    %306 = vector.extract_strided_slice %294 {offsets = [2, 0], sizes = [16, 16], strides = [1, 1]} : vector<22x16xf32> to vector<16x16xf32>
    %307 = vector.broadcast %305 : f32 to vector<16x16xf32>
    %308 = arith.mulf %307, %306 : vector<16x16xf32>
    %309 = arith.addf %304, %308 : vector<16x16xf32>
    %c25 = arith.constant 25 : index
    %310 = memref.load %arg2[%c25] : memref<98xf32, #tpu.memory_space<smem>>
    %311 = vector.extract_strided_slice %294 {offsets = [3, 0], sizes = [16, 16], strides = [1, 1]} : vector<22x16xf32> to vector<16x16xf32>
    %312 = vector.broadcast %310 : f32 to vector<16x16xf32>
    %313 = arith.mulf %312, %311 : vector<16x16xf32>
    %314 = arith.addf %309, %313 : vector<16x16xf32>
    %c32 = arith.constant 32 : index
    %315 = memref.load %arg2[%c32] : memref<98xf32, #tpu.memory_space<smem>>
    %316 = vector.extract_strided_slice %294 {offsets = [4, 0], sizes = [16, 16], strides = [1, 1]} : vector<22x16xf32> to vector<16x16xf32>
    %317 = vector.broadcast %315 : f32 to vector<16x16xf32>
    %318 = arith.mulf %317, %316 : vector<16x16xf32>
    %319 = arith.addf %314, %318 : vector<16x16xf32>
    %c39 = arith.constant 39 : index
    %320 = memref.load %arg2[%c39] : memref<98xf32, #tpu.memory_space<smem>>
    %321 = vector.extract_strided_slice %294 {offsets = [5, 0], sizes = [16, 16], strides = [1, 1]} : vector<22x16xf32> to vector<16x16xf32>
    %322 = vector.broadcast %320 : f32 to vector<16x16xf32>
    %323 = arith.mulf %322, %321 : vector<16x16xf32>
    %324 = arith.addf %319, %323 : vector<16x16xf32>
    %c46 = arith.constant 46 : index
    %325 = memref.load %arg2[%c46] : memref<98xf32, #tpu.memory_space<smem>>
    %326 = vector.extract_strided_slice %294 {offsets = [6, 0], sizes = [16, 16], strides = [1, 1]} : vector<22x16xf32> to vector<16x16xf32>
    %327 = vector.broadcast %325 : f32 to vector<16x16xf32>
    %328 = arith.mulf %327, %326 : vector<16x16xf32>
    %329 = arith.addf %324, %328 : vector<16x16xf32>
    %c0_118 = arith.constant 0 : index
    %c0_119 = arith.constant 0 : index
    %c5_120 = arith.constant 5 : index
    %330 = vector.load %arg5[%c0_118, %c0_119, %c5_120] : memref<2x24x128xf32, #tpu.memory_space<vmem>>, vector<1x22x16xf32>
    %331 = vector.shape_cast %330 : vector<1x22x16xf32> to vector<22x16xf32>
    %c5_121 = arith.constant 5 : index
    %332 = memref.load %arg2[%c5_121] : memref<98xf32, #tpu.memory_space<smem>>
    %333 = vector.extract_strided_slice %331 {offsets = [0, 0], sizes = [16, 16], strides = [1, 1]} : vector<22x16xf32> to vector<16x16xf32>
    %334 = vector.broadcast %332 : f32 to vector<16x16xf32>
    %335 = arith.mulf %334, %333 : vector<16x16xf32>
    %336 = arith.addf %329, %335 : vector<16x16xf32>
    %c12_122 = arith.constant 12 : index
    %337 = memref.load %arg2[%c12_122] : memref<98xf32, #tpu.memory_space<smem>>
    %338 = vector.extract_strided_slice %331 {offsets = [1, 0], sizes = [16, 16], strides = [1, 1]} : vector<22x16xf32> to vector<16x16xf32>
    %339 = vector.broadcast %337 : f32 to vector<16x16xf32>
    %340 = arith.mulf %339, %338 : vector<16x16xf32>
    %341 = arith.addf %336, %340 : vector<16x16xf32>
    %c19 = arith.constant 19 : index
    %342 = memref.load %arg2[%c19] : memref<98xf32, #tpu.memory_space<smem>>
    %343 = vector.extract_strided_slice %331 {offsets = [2, 0], sizes = [16, 16], strides = [1, 1]} : vector<22x16xf32> to vector<16x16xf32>
    %344 = vector.broadcast %342 : f32 to vector<16x16xf32>
    %345 = arith.mulf %344, %343 : vector<16x16xf32>
    %346 = arith.addf %341, %345 : vector<16x16xf32>
    %c26 = arith.constant 26 : index
    %347 = memref.load %arg2[%c26] : memref<98xf32, #tpu.memory_space<smem>>
    %348 = vector.extract_strided_slice %331 {offsets = [3, 0], sizes = [16, 16], strides = [1, 1]} : vector<22x16xf32> to vector<16x16xf32>
    %349 = vector.broadcast %347 : f32 to vector<16x16xf32>
    %350 = arith.mulf %349, %348 : vector<16x16xf32>
    %351 = arith.addf %346, %350 : vector<16x16xf32>
    %c33 = arith.constant 33 : index
    %352 = memref.load %arg2[%c33] : memref<98xf32, #tpu.memory_space<smem>>
    %353 = vector.extract_strided_slice %331 {offsets = [4, 0], sizes = [16, 16], strides = [1, 1]} : vector<22x16xf32> to vector<16x16xf32>
    %354 = vector.broadcast %352 : f32 to vector<16x16xf32>
    %355 = arith.mulf %354, %353 : vector<16x16xf32>
    %356 = arith.addf %351, %355 : vector<16x16xf32>
    %c40 = arith.constant 40 : index
    %357 = memref.load %arg2[%c40] : memref<98xf32, #tpu.memory_space<smem>>
    %358 = vector.extract_strided_slice %331 {offsets = [5, 0], sizes = [16, 16], strides = [1, 1]} : vector<22x16xf32> to vector<16x16xf32>
    %359 = vector.broadcast %357 : f32 to vector<16x16xf32>
    %360 = arith.mulf %359, %358 : vector<16x16xf32>
    %361 = arith.addf %356, %360 : vector<16x16xf32>
    %c47 = arith.constant 47 : index
    %362 = memref.load %arg2[%c47] : memref<98xf32, #tpu.memory_space<smem>>
    %363 = vector.extract_strided_slice %331 {offsets = [6, 0], sizes = [16, 16], strides = [1, 1]} : vector<22x16xf32> to vector<16x16xf32>
    %364 = vector.broadcast %362 : f32 to vector<16x16xf32>
    %365 = arith.mulf %364, %363 : vector<16x16xf32>
    %366 = arith.addf %361, %365 : vector<16x16xf32>
    %c0_123 = arith.constant 0 : index
    %c0_124 = arith.constant 0 : index
    %c6_125 = arith.constant 6 : index
    %367 = vector.load %arg5[%c0_123, %c0_124, %c6_125] : memref<2x24x128xf32, #tpu.memory_space<vmem>>, vector<1x22x16xf32>
    %368 = vector.shape_cast %367 : vector<1x22x16xf32> to vector<22x16xf32>
    %c6_126 = arith.constant 6 : index
    %369 = memref.load %arg2[%c6_126] : memref<98xf32, #tpu.memory_space<smem>>
    %370 = vector.extract_strided_slice %368 {offsets = [0, 0], sizes = [16, 16], strides = [1, 1]} : vector<22x16xf32> to vector<16x16xf32>
    %371 = vector.broadcast %369 : f32 to vector<16x16xf32>
    %372 = arith.mulf %371, %370 : vector<16x16xf32>
    %373 = arith.addf %366, %372 : vector<16x16xf32>
    %c13_127 = arith.constant 13 : index
    %374 = memref.load %arg2[%c13_127] : memref<98xf32, #tpu.memory_space<smem>>
    %375 = vector.extract_strided_slice %368 {offsets = [1, 0], sizes = [16, 16], strides = [1, 1]} : vector<22x16xf32> to vector<16x16xf32>
    %376 = vector.broadcast %374 : f32 to vector<16x16xf32>
    %377 = arith.mulf %376, %375 : vector<16x16xf32>
    %378 = arith.addf %373, %377 : vector<16x16xf32>
    %c20 = arith.constant 20 : index
    %379 = memref.load %arg2[%c20] : memref<98xf32, #tpu.memory_space<smem>>
    %380 = vector.extract_strided_slice %368 {offsets = [2, 0], sizes = [16, 16], strides = [1, 1]} : vector<22x16xf32> to vector<16x16xf32>
    %381 = vector.broadcast %379 : f32 to vector<16x16xf32>
    %382 = arith.mulf %381, %380 : vector<16x16xf32>
    %383 = arith.addf %378, %382 : vector<16x16xf32>
    %c27 = arith.constant 27 : index
    %384 = memref.load %arg2[%c27] : memref<98xf32, #tpu.memory_space<smem>>
    %385 = vector.extract_strided_slice %368 {offsets = [3, 0], sizes = [16, 16], strides = [1, 1]} : vector<22x16xf32> to vector<16x16xf32>
    %386 = vector.broadcast %384 : f32 to vector<16x16xf32>
    %387 = arith.mulf %386, %385 : vector<16x16xf32>
    %388 = arith.addf %383, %387 : vector<16x16xf32>
    %c34 = arith.constant 34 : index
    %389 = memref.load %arg2[%c34] : memref<98xf32, #tpu.memory_space<smem>>
    %390 = vector.extract_strided_slice %368 {offsets = [4, 0], sizes = [16, 16], strides = [1, 1]} : vector<22x16xf32> to vector<16x16xf32>
    %391 = vector.broadcast %389 : f32 to vector<16x16xf32>
    %392 = arith.mulf %391, %390 : vector<16x16xf32>
    %393 = arith.addf %388, %392 : vector<16x16xf32>
    %c41 = arith.constant 41 : index
    %394 = memref.load %arg2[%c41] : memref<98xf32, #tpu.memory_space<smem>>
    %395 = vector.extract_strided_slice %368 {offsets = [5, 0], sizes = [16, 16], strides = [1, 1]} : vector<22x16xf32> to vector<16x16xf32>
    %396 = vector.broadcast %394 : f32 to vector<16x16xf32>
    %397 = arith.mulf %396, %395 : vector<16x16xf32>
    %398 = arith.addf %393, %397 : vector<16x16xf32>
    %c48 = arith.constant 48 : index
    %399 = memref.load %arg2[%c48] : memref<98xf32, #tpu.memory_space<smem>>
    %400 = vector.extract_strided_slice %368 {offsets = [6, 0], sizes = [16, 16], strides = [1, 1]} : vector<22x16xf32> to vector<16x16xf32>
    %401 = vector.broadcast %399 : f32 to vector<16x16xf32>
    %402 = arith.mulf %401, %400 : vector<16x16xf32>
    %403 = arith.addf %398, %402 : vector<16x16xf32>
    %c1_128 = arith.constant 1 : index
    %c0_129 = arith.constant 0 : index
    %c0_130 = arith.constant 0 : index
    %404 = vector.load %arg5[%c1_128, %c0_129, %c0_130] : memref<2x24x128xf32, #tpu.memory_space<vmem>>, vector<1x22x16xf32>
    %405 = vector.shape_cast %404 : vector<1x22x16xf32> to vector<22x16xf32>
    %c49 = arith.constant 49 : index
    %406 = memref.load %arg2[%c49] : memref<98xf32, #tpu.memory_space<smem>>
    %407 = vector.extract_strided_slice %405 {offsets = [0, 0], sizes = [16, 16], strides = [1, 1]} : vector<22x16xf32> to vector<16x16xf32>
    %408 = vector.broadcast %406 : f32 to vector<16x16xf32>
    %409 = arith.mulf %408, %407 : vector<16x16xf32>
    %410 = arith.addf %403, %409 : vector<16x16xf32>
    %c56 = arith.constant 56 : index
    %411 = memref.load %arg2[%c56] : memref<98xf32, #tpu.memory_space<smem>>
    %412 = vector.extract_strided_slice %405 {offsets = [1, 0], sizes = [16, 16], strides = [1, 1]} : vector<22x16xf32> to vector<16x16xf32>
    %413 = vector.broadcast %411 : f32 to vector<16x16xf32>
    %414 = arith.mulf %413, %412 : vector<16x16xf32>
    %415 = arith.addf %410, %414 : vector<16x16xf32>
    %c63 = arith.constant 63 : index
    %416 = memref.load %arg2[%c63] : memref<98xf32, #tpu.memory_space<smem>>
    %417 = vector.extract_strided_slice %405 {offsets = [2, 0], sizes = [16, 16], strides = [1, 1]} : vector<22x16xf32> to vector<16x16xf32>
    %418 = vector.broadcast %416 : f32 to vector<16x16xf32>
    %419 = arith.mulf %418, %417 : vector<16x16xf32>
    %420 = arith.addf %415, %419 : vector<16x16xf32>
    %c70 = arith.constant 70 : index
    %421 = memref.load %arg2[%c70] : memref<98xf32, #tpu.memory_space<smem>>
    %422 = vector.extract_strided_slice %405 {offsets = [3, 0], sizes = [16, 16], strides = [1, 1]} : vector<22x16xf32> to vector<16x16xf32>
    %423 = vector.broadcast %421 : f32 to vector<16x16xf32>
    %424 = arith.mulf %423, %422 : vector<16x16xf32>
    %425 = arith.addf %420, %424 : vector<16x16xf32>
    %c77 = arith.constant 77 : index
    %426 = memref.load %arg2[%c77] : memref<98xf32, #tpu.memory_space<smem>>
    %427 = vector.extract_strided_slice %405 {offsets = [4, 0], sizes = [16, 16], strides = [1, 1]} : vector<22x16xf32> to vector<16x16xf32>
    %428 = vector.broadcast %426 : f32 to vector<16x16xf32>
    %429 = arith.mulf %428, %427 : vector<16x16xf32>
    %430 = arith.addf %425, %429 : vector<16x16xf32>
    %c84 = arith.constant 84 : index
    %431 = memref.load %arg2[%c84] : memref<98xf32, #tpu.memory_space<smem>>
    %432 = vector.extract_strided_slice %405 {offsets = [5, 0], sizes = [16, 16], strides = [1, 1]} : vector<22x16xf32> to vector<16x16xf32>
    %433 = vector.broadcast %431 : f32 to vector<16x16xf32>
    %434 = arith.mulf %433, %432 : vector<16x16xf32>
    %435 = arith.addf %430, %434 : vector<16x16xf32>
    %c91 = arith.constant 91 : index
    %436 = memref.load %arg2[%c91] : memref<98xf32, #tpu.memory_space<smem>>
    %437 = vector.extract_strided_slice %405 {offsets = [6, 0], sizes = [16, 16], strides = [1, 1]} : vector<22x16xf32> to vector<16x16xf32>
    %438 = vector.broadcast %436 : f32 to vector<16x16xf32>
    %439 = arith.mulf %438, %437 : vector<16x16xf32>
    %440 = arith.addf %435, %439 : vector<16x16xf32>
    %c1_131 = arith.constant 1 : index
    %c0_132 = arith.constant 0 : index
    %c1_133 = arith.constant 1 : index
    %441 = vector.load %arg5[%c1_131, %c0_132, %c1_133] : memref<2x24x128xf32, #tpu.memory_space<vmem>>, vector<1x22x16xf32>
    %442 = vector.shape_cast %441 : vector<1x22x16xf32> to vector<22x16xf32>
    %c50 = arith.constant 50 : index
    %443 = memref.load %arg2[%c50] : memref<98xf32, #tpu.memory_space<smem>>
    %444 = vector.extract_strided_slice %442 {offsets = [0, 0], sizes = [16, 16], strides = [1, 1]} : vector<22x16xf32> to vector<16x16xf32>
    %445 = vector.broadcast %443 : f32 to vector<16x16xf32>
    %446 = arith.mulf %445, %444 : vector<16x16xf32>
    %447 = arith.addf %440, %446 : vector<16x16xf32>
    %c57 = arith.constant 57 : index
    %448 = memref.load %arg2[%c57] : memref<98xf32, #tpu.memory_space<smem>>
    %449 = vector.extract_strided_slice %442 {offsets = [1, 0], sizes = [16, 16], strides = [1, 1]} : vector<22x16xf32> to vector<16x16xf32>
    %450 = vector.broadcast %448 : f32 to vector<16x16xf32>
    %451 = arith.mulf %450, %449 : vector<16x16xf32>
    %452 = arith.addf %447, %451 : vector<16x16xf32>
    %c64 = arith.constant 64 : index
    %453 = memref.load %arg2[%c64] : memref<98xf32, #tpu.memory_space<smem>>
    %454 = vector.extract_strided_slice %442 {offsets = [2, 0], sizes = [16, 16], strides = [1, 1]} : vector<22x16xf32> to vector<16x16xf32>
    %455 = vector.broadcast %453 : f32 to vector<16x16xf32>
    %456 = arith.mulf %455, %454 : vector<16x16xf32>
    %457 = arith.addf %452, %456 : vector<16x16xf32>
    %c71 = arith.constant 71 : index
    %458 = memref.load %arg2[%c71] : memref<98xf32, #tpu.memory_space<smem>>
    %459 = vector.extract_strided_slice %442 {offsets = [3, 0], sizes = [16, 16], strides = [1, 1]} : vector<22x16xf32> to vector<16x16xf32>
    %460 = vector.broadcast %458 : f32 to vector<16x16xf32>
    %461 = arith.mulf %460, %459 : vector<16x16xf32>
    %462 = arith.addf %457, %461 : vector<16x16xf32>
    %c78 = arith.constant 78 : index
    %463 = memref.load %arg2[%c78] : memref<98xf32, #tpu.memory_space<smem>>
    %464 = vector.extract_strided_slice %442 {offsets = [4, 0], sizes = [16, 16], strides = [1, 1]} : vector<22x16xf32> to vector<16x16xf32>
    %465 = vector.broadcast %463 : f32 to vector<16x16xf32>
    %466 = arith.mulf %465, %464 : vector<16x16xf32>
    %467 = arith.addf %462, %466 : vector<16x16xf32>
    %c85 = arith.constant 85 : index
    %468 = memref.load %arg2[%c85] : memref<98xf32, #tpu.memory_space<smem>>
    %469 = vector.extract_strided_slice %442 {offsets = [5, 0], sizes = [16, 16], strides = [1, 1]} : vector<22x16xf32> to vector<16x16xf32>
    %470 = vector.broadcast %468 : f32 to vector<16x16xf32>
    %471 = arith.mulf %470, %469 : vector<16x16xf32>
    %472 = arith.addf %467, %471 : vector<16x16xf32>
    %c92 = arith.constant 92 : index
    %473 = memref.load %arg2[%c92] : memref<98xf32, #tpu.memory_space<smem>>
    %474 = vector.extract_strided_slice %442 {offsets = [6, 0], sizes = [16, 16], strides = [1, 1]} : vector<22x16xf32> to vector<16x16xf32>
    %475 = vector.broadcast %473 : f32 to vector<16x16xf32>
    %476 = arith.mulf %475, %474 : vector<16x16xf32>
    %477 = arith.addf %472, %476 : vector<16x16xf32>
    %c1_134 = arith.constant 1 : index
    %c0_135 = arith.constant 0 : index
    %c2_136 = arith.constant 2 : index
    %478 = vector.load %arg5[%c1_134, %c0_135, %c2_136] : memref<2x24x128xf32, #tpu.memory_space<vmem>>, vector<1x22x16xf32>
    %479 = vector.shape_cast %478 : vector<1x22x16xf32> to vector<22x16xf32>
    %c51 = arith.constant 51 : index
    %480 = memref.load %arg2[%c51] : memref<98xf32, #tpu.memory_space<smem>>
    %481 = vector.extract_strided_slice %479 {offsets = [0, 0], sizes = [16, 16], strides = [1, 1]} : vector<22x16xf32> to vector<16x16xf32>
    %482 = vector.broadcast %480 : f32 to vector<16x16xf32>
    %483 = arith.mulf %482, %481 : vector<16x16xf32>
    %484 = arith.addf %477, %483 : vector<16x16xf32>
    %c58 = arith.constant 58 : index
    %485 = memref.load %arg2[%c58] : memref<98xf32, #tpu.memory_space<smem>>
    %486 = vector.extract_strided_slice %479 {offsets = [1, 0], sizes = [16, 16], strides = [1, 1]} : vector<22x16xf32> to vector<16x16xf32>
    %487 = vector.broadcast %485 : f32 to vector<16x16xf32>
    %488 = arith.mulf %487, %486 : vector<16x16xf32>
    %489 = arith.addf %484, %488 : vector<16x16xf32>
    %c65 = arith.constant 65 : index
    %490 = memref.load %arg2[%c65] : memref<98xf32, #tpu.memory_space<smem>>
    %491 = vector.extract_strided_slice %479 {offsets = [2, 0], sizes = [16, 16], strides = [1, 1]} : vector<22x16xf32> to vector<16x16xf32>
    %492 = vector.broadcast %490 : f32 to vector<16x16xf32>
    %493 = arith.mulf %492, %491 : vector<16x16xf32>
    %494 = arith.addf %489, %493 : vector<16x16xf32>
    %c72 = arith.constant 72 : index
    %495 = memref.load %arg2[%c72] : memref<98xf32, #tpu.memory_space<smem>>
    %496 = vector.extract_strided_slice %479 {offsets = [3, 0], sizes = [16, 16], strides = [1, 1]} : vector<22x16xf32> to vector<16x16xf32>
    %497 = vector.broadcast %495 : f32 to vector<16x16xf32>
    %498 = arith.mulf %497, %496 : vector<16x16xf32>
    %499 = arith.addf %494, %498 : vector<16x16xf32>
    %c79 = arith.constant 79 : index
    %500 = memref.load %arg2[%c79] : memref<98xf32, #tpu.memory_space<smem>>
    %501 = vector.extract_strided_slice %479 {offsets = [4, 0], sizes = [16, 16], strides = [1, 1]} : vector<22x16xf32> to vector<16x16xf32>
    %502 = vector.broadcast %500 : f32 to vector<16x16xf32>
    %503 = arith.mulf %502, %501 : vector<16x16xf32>
    %504 = arith.addf %499, %503 : vector<16x16xf32>
    %c86 = arith.constant 86 : index
    %505 = memref.load %arg2[%c86] : memref<98xf32, #tpu.memory_space<smem>>
    %506 = vector.extract_strided_slice %479 {offsets = [5, 0], sizes = [16, 16], strides = [1, 1]} : vector<22x16xf32> to vector<16x16xf32>
    %507 = vector.broadcast %505 : f32 to vector<16x16xf32>
    %508 = arith.mulf %507, %506 : vector<16x16xf32>
    %509 = arith.addf %504, %508 : vector<16x16xf32>
    %c93 = arith.constant 93 : index
    %510 = memref.load %arg2[%c93] : memref<98xf32, #tpu.memory_space<smem>>
    %511 = vector.extract_strided_slice %479 {offsets = [6, 0], sizes = [16, 16], strides = [1, 1]} : vector<22x16xf32> to vector<16x16xf32>
    %512 = vector.broadcast %510 : f32 to vector<16x16xf32>
    %513 = arith.mulf %512, %511 : vector<16x16xf32>
    %514 = arith.addf %509, %513 : vector<16x16xf32>
    %c1_137 = arith.constant 1 : index
    %c0_138 = arith.constant 0 : index
    %c3_139 = arith.constant 3 : index
    %515 = vector.load %arg5[%c1_137, %c0_138, %c3_139] : memref<2x24x128xf32, #tpu.memory_space<vmem>>, vector<1x22x16xf32>
    %516 = vector.shape_cast %515 : vector<1x22x16xf32> to vector<22x16xf32>
    %c52 = arith.constant 52 : index
    %517 = memref.load %arg2[%c52] : memref<98xf32, #tpu.memory_space<smem>>
    %518 = vector.extract_strided_slice %516 {offsets = [0, 0], sizes = [16, 16], strides = [1, 1]} : vector<22x16xf32> to vector<16x16xf32>
    %519 = vector.broadcast %517 : f32 to vector<16x16xf32>
    %520 = arith.mulf %519, %518 : vector<16x16xf32>
    %521 = arith.addf %514, %520 : vector<16x16xf32>
    %c59 = arith.constant 59 : index
    %522 = memref.load %arg2[%c59] : memref<98xf32, #tpu.memory_space<smem>>
    %523 = vector.extract_strided_slice %516 {offsets = [1, 0], sizes = [16, 16], strides = [1, 1]} : vector<22x16xf32> to vector<16x16xf32>
    %524 = vector.broadcast %522 : f32 to vector<16x16xf32>
    %525 = arith.mulf %524, %523 : vector<16x16xf32>
    %526 = arith.addf %521, %525 : vector<16x16xf32>
    %c66 = arith.constant 66 : index
    %527 = memref.load %arg2[%c66] : memref<98xf32, #tpu.memory_space<smem>>
    %528 = vector.extract_strided_slice %516 {offsets = [2, 0], sizes = [16, 16], strides = [1, 1]} : vector<22x16xf32> to vector<16x16xf32>
    %529 = vector.broadcast %527 : f32 to vector<16x16xf32>
    %530 = arith.mulf %529, %528 : vector<16x16xf32>
    %531 = arith.addf %526, %530 : vector<16x16xf32>
    %c73 = arith.constant 73 : index
    %532 = memref.load %arg2[%c73] : memref<98xf32, #tpu.memory_space<smem>>
    %533 = vector.extract_strided_slice %516 {offsets = [3, 0], sizes = [16, 16], strides = [1, 1]} : vector<22x16xf32> to vector<16x16xf32>
    %534 = vector.broadcast %532 : f32 to vector<16x16xf32>
    %535 = arith.mulf %534, %533 : vector<16x16xf32>
    %536 = arith.addf %531, %535 : vector<16x16xf32>
    %c80 = arith.constant 80 : index
    %537 = memref.load %arg2[%c80] : memref<98xf32, #tpu.memory_space<smem>>
    %538 = vector.extract_strided_slice %516 {offsets = [4, 0], sizes = [16, 16], strides = [1, 1]} : vector<22x16xf32> to vector<16x16xf32>
    %539 = vector.broadcast %537 : f32 to vector<16x16xf32>
    %540 = arith.mulf %539, %538 : vector<16x16xf32>
    %541 = arith.addf %536, %540 : vector<16x16xf32>
    %c87 = arith.constant 87 : index
    %542 = memref.load %arg2[%c87] : memref<98xf32, #tpu.memory_space<smem>>
    %543 = vector.extract_strided_slice %516 {offsets = [5, 0], sizes = [16, 16], strides = [1, 1]} : vector<22x16xf32> to vector<16x16xf32>
    %544 = vector.broadcast %542 : f32 to vector<16x16xf32>
    %545 = arith.mulf %544, %543 : vector<16x16xf32>
    %546 = arith.addf %541, %545 : vector<16x16xf32>
    %c94 = arith.constant 94 : index
    %547 = memref.load %arg2[%c94] : memref<98xf32, #tpu.memory_space<smem>>
    %548 = vector.extract_strided_slice %516 {offsets = [6, 0], sizes = [16, 16], strides = [1, 1]} : vector<22x16xf32> to vector<16x16xf32>
    %549 = vector.broadcast %547 : f32 to vector<16x16xf32>
    %550 = arith.mulf %549, %548 : vector<16x16xf32>
    %551 = arith.addf %546, %550 : vector<16x16xf32>
    %c1_140 = arith.constant 1 : index
    %c0_141 = arith.constant 0 : index
    %c4_142 = arith.constant 4 : index
    %552 = vector.load %arg5[%c1_140, %c0_141, %c4_142] : memref<2x24x128xf32, #tpu.memory_space<vmem>>, vector<1x22x16xf32>
    %553 = vector.shape_cast %552 : vector<1x22x16xf32> to vector<22x16xf32>
    %c53 = arith.constant 53 : index
    %554 = memref.load %arg2[%c53] : memref<98xf32, #tpu.memory_space<smem>>
    %555 = vector.extract_strided_slice %553 {offsets = [0, 0], sizes = [16, 16], strides = [1, 1]} : vector<22x16xf32> to vector<16x16xf32>
    %556 = vector.broadcast %554 : f32 to vector<16x16xf32>
    %557 = arith.mulf %556, %555 : vector<16x16xf32>
    %558 = arith.addf %551, %557 : vector<16x16xf32>
    %c60 = arith.constant 60 : index
    %559 = memref.load %arg2[%c60] : memref<98xf32, #tpu.memory_space<smem>>
    %560 = vector.extract_strided_slice %553 {offsets = [1, 0], sizes = [16, 16], strides = [1, 1]} : vector<22x16xf32> to vector<16x16xf32>
    %561 = vector.broadcast %559 : f32 to vector<16x16xf32>
    %562 = arith.mulf %561, %560 : vector<16x16xf32>
    %563 = arith.addf %558, %562 : vector<16x16xf32>
    %c67 = arith.constant 67 : index
    %564 = memref.load %arg2[%c67] : memref<98xf32, #tpu.memory_space<smem>>
    %565 = vector.extract_strided_slice %553 {offsets = [2, 0], sizes = [16, 16], strides = [1, 1]} : vector<22x16xf32> to vector<16x16xf32>
    %566 = vector.broadcast %564 : f32 to vector<16x16xf32>
    %567 = arith.mulf %566, %565 : vector<16x16xf32>
    %568 = arith.addf %563, %567 : vector<16x16xf32>
    %c74 = arith.constant 74 : index
    %569 = memref.load %arg2[%c74] : memref<98xf32, #tpu.memory_space<smem>>
    %570 = vector.extract_strided_slice %553 {offsets = [3, 0], sizes = [16, 16], strides = [1, 1]} : vector<22x16xf32> to vector<16x16xf32>
    %571 = vector.broadcast %569 : f32 to vector<16x16xf32>
    %572 = arith.mulf %571, %570 : vector<16x16xf32>
    %573 = arith.addf %568, %572 : vector<16x16xf32>
    %c81 = arith.constant 81 : index
    %574 = memref.load %arg2[%c81] : memref<98xf32, #tpu.memory_space<smem>>
    %575 = vector.extract_strided_slice %553 {offsets = [4, 0], sizes = [16, 16], strides = [1, 1]} : vector<22x16xf32> to vector<16x16xf32>
    %576 = vector.broadcast %574 : f32 to vector<16x16xf32>
    %577 = arith.mulf %576, %575 : vector<16x16xf32>
    %578 = arith.addf %573, %577 : vector<16x16xf32>
    %c88 = arith.constant 88 : index
    %579 = memref.load %arg2[%c88] : memref<98xf32, #tpu.memory_space<smem>>
    %580 = vector.extract_strided_slice %553 {offsets = [5, 0], sizes = [16, 16], strides = [1, 1]} : vector<22x16xf32> to vector<16x16xf32>
    %581 = vector.broadcast %579 : f32 to vector<16x16xf32>
    %582 = arith.mulf %581, %580 : vector<16x16xf32>
    %583 = arith.addf %578, %582 : vector<16x16xf32>
    %c95 = arith.constant 95 : index
    %584 = memref.load %arg2[%c95] : memref<98xf32, #tpu.memory_space<smem>>
    %585 = vector.extract_strided_slice %553 {offsets = [6, 0], sizes = [16, 16], strides = [1, 1]} : vector<22x16xf32> to vector<16x16xf32>
    %586 = vector.broadcast %584 : f32 to vector<16x16xf32>
    %587 = arith.mulf %586, %585 : vector<16x16xf32>
    %588 = arith.addf %583, %587 : vector<16x16xf32>
    %c1_143 = arith.constant 1 : index
    %c0_144 = arith.constant 0 : index
    %c5_145 = arith.constant 5 : index
    %589 = vector.load %arg5[%c1_143, %c0_144, %c5_145] : memref<2x24x128xf32, #tpu.memory_space<vmem>>, vector<1x22x16xf32>
    %590 = vector.shape_cast %589 : vector<1x22x16xf32> to vector<22x16xf32>
    %c54 = arith.constant 54 : index
    %591 = memref.load %arg2[%c54] : memref<98xf32, #tpu.memory_space<smem>>
    %592 = vector.extract_strided_slice %590 {offsets = [0, 0], sizes = [16, 16], strides = [1, 1]} : vector<22x16xf32> to vector<16x16xf32>
    %593 = vector.broadcast %591 : f32 to vector<16x16xf32>
    %594 = arith.mulf %593, %592 : vector<16x16xf32>
    %595 = arith.addf %588, %594 : vector<16x16xf32>
    %c61 = arith.constant 61 : index
    %596 = memref.load %arg2[%c61] : memref<98xf32, #tpu.memory_space<smem>>
    %597 = vector.extract_strided_slice %590 {offsets = [1, 0], sizes = [16, 16], strides = [1, 1]} : vector<22x16xf32> to vector<16x16xf32>
    %598 = vector.broadcast %596 : f32 to vector<16x16xf32>
    %599 = arith.mulf %598, %597 : vector<16x16xf32>
    %600 = arith.addf %595, %599 : vector<16x16xf32>
    %c68 = arith.constant 68 : index
    %601 = memref.load %arg2[%c68] : memref<98xf32, #tpu.memory_space<smem>>
    %602 = vector.extract_strided_slice %590 {offsets = [2, 0], sizes = [16, 16], strides = [1, 1]} : vector<22x16xf32> to vector<16x16xf32>
    %603 = vector.broadcast %601 : f32 to vector<16x16xf32>
    %604 = arith.mulf %603, %602 : vector<16x16xf32>
    %605 = arith.addf %600, %604 : vector<16x16xf32>
    %c75 = arith.constant 75 : index
    %606 = memref.load %arg2[%c75] : memref<98xf32, #tpu.memory_space<smem>>
    %607 = vector.extract_strided_slice %590 {offsets = [3, 0], sizes = [16, 16], strides = [1, 1]} : vector<22x16xf32> to vector<16x16xf32>
    %608 = vector.broadcast %606 : f32 to vector<16x16xf32>
    %609 = arith.mulf %608, %607 : vector<16x16xf32>
    %610 = arith.addf %605, %609 : vector<16x16xf32>
    %c82 = arith.constant 82 : index
    %611 = memref.load %arg2[%c82] : memref<98xf32, #tpu.memory_space<smem>>
    %612 = vector.extract_strided_slice %590 {offsets = [4, 0], sizes = [16, 16], strides = [1, 1]} : vector<22x16xf32> to vector<16x16xf32>
    %613 = vector.broadcast %611 : f32 to vector<16x16xf32>
    %614 = arith.mulf %613, %612 : vector<16x16xf32>
    %615 = arith.addf %610, %614 : vector<16x16xf32>
    %c89 = arith.constant 89 : index
    %616 = memref.load %arg2[%c89] : memref<98xf32, #tpu.memory_space<smem>>
    %617 = vector.extract_strided_slice %590 {offsets = [5, 0], sizes = [16, 16], strides = [1, 1]} : vector<22x16xf32> to vector<16x16xf32>
    %618 = vector.broadcast %616 : f32 to vector<16x16xf32>
    %619 = arith.mulf %618, %617 : vector<16x16xf32>
    %620 = arith.addf %615, %619 : vector<16x16xf32>
    %c96 = arith.constant 96 : index
    %621 = memref.load %arg2[%c96] : memref<98xf32, #tpu.memory_space<smem>>
    %622 = vector.extract_strided_slice %590 {offsets = [6, 0], sizes = [16, 16], strides = [1, 1]} : vector<22x16xf32> to vector<16x16xf32>
    %623 = vector.broadcast %621 : f32 to vector<16x16xf32>
    %624 = arith.mulf %623, %622 : vector<16x16xf32>
    %625 = arith.addf %620, %624 : vector<16x16xf32>
    %c1_146 = arith.constant 1 : index
    %c0_147 = arith.constant 0 : index
    %c6_148 = arith.constant 6 : index
    %626 = vector.load %arg5[%c1_146, %c0_147, %c6_148] : memref<2x24x128xf32, #tpu.memory_space<vmem>>, vector<1x22x16xf32>
    %627 = vector.shape_cast %626 : vector<1x22x16xf32> to vector<22x16xf32>
    %c55 = arith.constant 55 : index
    %628 = memref.load %arg2[%c55] : memref<98xf32, #tpu.memory_space<smem>>
    %629 = vector.extract_strided_slice %627 {offsets = [0, 0], sizes = [16, 16], strides = [1, 1]} : vector<22x16xf32> to vector<16x16xf32>
    %630 = vector.broadcast %628 : f32 to vector<16x16xf32>
    %631 = arith.mulf %630, %629 : vector<16x16xf32>
    %632 = arith.addf %625, %631 : vector<16x16xf32>
    %c62 = arith.constant 62 : index
    %633 = memref.load %arg2[%c62] : memref<98xf32, #tpu.memory_space<smem>>
    %634 = vector.extract_strided_slice %627 {offsets = [1, 0], sizes = [16, 16], strides = [1, 1]} : vector<22x16xf32> to vector<16x16xf32>
    %635 = vector.broadcast %633 : f32 to vector<16x16xf32>
    %636 = arith.mulf %635, %634 : vector<16x16xf32>
    %637 = arith.addf %632, %636 : vector<16x16xf32>
    %c69 = arith.constant 69 : index
    %638 = memref.load %arg2[%c69] : memref<98xf32, #tpu.memory_space<smem>>
    %639 = vector.extract_strided_slice %627 {offsets = [2, 0], sizes = [16, 16], strides = [1, 1]} : vector<22x16xf32> to vector<16x16xf32>
    %640 = vector.broadcast %638 : f32 to vector<16x16xf32>
    %641 = arith.mulf %640, %639 : vector<16x16xf32>
    %642 = arith.addf %637, %641 : vector<16x16xf32>
    %c76 = arith.constant 76 : index
    %643 = memref.load %arg2[%c76] : memref<98xf32, #tpu.memory_space<smem>>
    %644 = vector.extract_strided_slice %627 {offsets = [3, 0], sizes = [16, 16], strides = [1, 1]} : vector<22x16xf32> to vector<16x16xf32>
    %645 = vector.broadcast %643 : f32 to vector<16x16xf32>
    %646 = arith.mulf %645, %644 : vector<16x16xf32>
    %647 = arith.addf %642, %646 : vector<16x16xf32>
    %c83 = arith.constant 83 : index
    %648 = memref.load %arg2[%c83] : memref<98xf32, #tpu.memory_space<smem>>
    %649 = vector.extract_strided_slice %627 {offsets = [4, 0], sizes = [16, 16], strides = [1, 1]} : vector<22x16xf32> to vector<16x16xf32>
    %650 = vector.broadcast %648 : f32 to vector<16x16xf32>
    %651 = arith.mulf %650, %649 : vector<16x16xf32>
    %652 = arith.addf %647, %651 : vector<16x16xf32>
    %c90 = arith.constant 90 : index
    %653 = memref.load %arg2[%c90] : memref<98xf32, #tpu.memory_space<smem>>
    %654 = vector.extract_strided_slice %627 {offsets = [5, 0], sizes = [16, 16], strides = [1, 1]} : vector<22x16xf32> to vector<16x16xf32>
    %655 = vector.broadcast %653 : f32 to vector<16x16xf32>
    %656 = arith.mulf %655, %654 : vector<16x16xf32>
    %657 = arith.addf %652, %656 : vector<16x16xf32>
    %c97 = arith.constant 97 : index
    %658 = memref.load %arg2[%c97] : memref<98xf32, #tpu.memory_space<smem>>
    %659 = vector.extract_strided_slice %627 {offsets = [6, 0], sizes = [16, 16], strides = [1, 1]} : vector<22x16xf32> to vector<16x16xf32>
    %660 = vector.broadcast %658 : f32 to vector<16x16xf32>
    %661 = arith.mulf %660, %659 : vector<16x16xf32>
    %662 = arith.addf %657, %661 : vector<16x16xf32>
    %c0_149 = arith.constant 0 : index
    %663 = memref.load %arg3[%c0_149] : memref<1xf32, #tpu.memory_space<smem>>
    %664 = vector.broadcast %663 : f32 to vector<16x16xf32>
    %665 = arith.addf %662, %664 : vector<16x16xf32>
    %666 = arith.negf %665 : vector<16x16xf32>
    %667 = math.exp %666 : vector<16x16xf32>
    %cst_150 = arith.constant 1.000000e+00 : f32
    %668 = vector.broadcast %cst_150 : f32 to vector<16x16xf32>
    %669 = arith.addf %668, %667 : vector<16x16xf32>
    %670 = arith.divf %668, %669 : vector<16x16xf32>
    %671 = vector.extract_strided_slice %670 {offsets = [0, 0], sizes = [1, 16], strides = [1, 1]} : vector<16x16xf32> to vector<1x16xf32>
    %672 = vector.extract_strided_slice %670 {offsets = [1, 0], sizes = [1, 16], strides = [1, 1]} : vector<16x16xf32> to vector<1x16xf32>
    %673 = vector.extract_strided_slice %670 {offsets = [2, 0], sizes = [1, 16], strides = [1, 1]} : vector<16x16xf32> to vector<1x16xf32>
    %674 = vector.extract_strided_slice %670 {offsets = [3, 0], sizes = [1, 16], strides = [1, 1]} : vector<16x16xf32> to vector<1x16xf32>
    %675 = vector.extract_strided_slice %670 {offsets = [4, 0], sizes = [1, 16], strides = [1, 1]} : vector<16x16xf32> to vector<1x16xf32>
    %676 = vector.extract_strided_slice %670 {offsets = [5, 0], sizes = [1, 16], strides = [1, 1]} : vector<16x16xf32> to vector<1x16xf32>
    %677 = vector.extract_strided_slice %670 {offsets = [6, 0], sizes = [1, 16], strides = [1, 1]} : vector<16x16xf32> to vector<1x16xf32>
    %678 = vector.extract_strided_slice %670 {offsets = [7, 0], sizes = [1, 16], strides = [1, 1]} : vector<16x16xf32> to vector<1x16xf32>
    %679 = vector.extract_strided_slice %670 {offsets = [8, 0], sizes = [1, 16], strides = [1, 1]} : vector<16x16xf32> to vector<1x16xf32>
    %680 = vector.extract_strided_slice %670 {offsets = [9, 0], sizes = [1, 16], strides = [1, 1]} : vector<16x16xf32> to vector<1x16xf32>
    %681 = vector.extract_strided_slice %670 {offsets = [10, 0], sizes = [1, 16], strides = [1, 1]} : vector<16x16xf32> to vector<1x16xf32>
    %682 = vector.extract_strided_slice %670 {offsets = [11, 0], sizes = [1, 16], strides = [1, 1]} : vector<16x16xf32> to vector<1x16xf32>
    %683 = vector.extract_strided_slice %670 {offsets = [12, 0], sizes = [1, 16], strides = [1, 1]} : vector<16x16xf32> to vector<1x16xf32>
    %684 = vector.extract_strided_slice %670 {offsets = [13, 0], sizes = [1, 16], strides = [1, 1]} : vector<16x16xf32> to vector<1x16xf32>
    %685 = vector.extract_strided_slice %670 {offsets = [14, 0], sizes = [1, 16], strides = [1, 1]} : vector<16x16xf32> to vector<1x16xf32>
    %686 = vector.extract_strided_slice %670 {offsets = [15, 0], sizes = [1, 16], strides = [1, 1]} : vector<16x16xf32> to vector<1x16xf32>
    %687 = tpu.concatenate %671, %672, %673, %674, %675, %676, %677, %678, %679, %680, %681, %682, %683, %684, %685, %686 in 1 : vector<1x16xf32>, vector<1x16xf32>, vector<1x16xf32>, vector<1x16xf32>, vector<1x16xf32>, vector<1x16xf32>, vector<1x16xf32>, vector<1x16xf32>, vector<1x16xf32>, vector<1x16xf32>, vector<1x16xf32>, vector<1x16xf32>, vector<1x16xf32>, vector<1x16xf32>, vector<1x16xf32>, vector<1x16xf32> -> vector<1x256xf32>
    %688 = vector.shape_cast %687 : vector<1x256xf32> to vector<1x256xf32>
    %689 = vector.broadcast %688 : vector<1x256xf32> to vector<4x256xf32>
    %c0_i32_151 = arith.constant 0 : i32
    %c4_i32_152 = arith.constant 4 : i32
    %690 = arith.muli %c0_i32_151, %c4_i32_152 : i32
    %c0_153 = arith.constant 0 : index
    %691 = arith.index_cast %690 : i32 to index
    %c0_154 = arith.constant 0 : index
    %692 = vector.load %arg1[%c0_153, %691, %c0_154] : memref<1x4x256xf32, #tpu.memory_space<vmem>>, vector<1x4x256xf32>
    %693 = vector.shape_cast %692 : vector<1x4x256xf32> to vector<4x256xf32>
    %694 = arith.mulf %693, %689 : vector<4x256xf32>
    %c0_155 = arith.constant 0 : index
    %695 = arith.index_cast %690 : i32 to index
    %c0_156 = arith.constant 0 : index
    %696 = vector.load %arg4[%c0_155, %695, %c0_156] : memref<1x4x256xf32, #tpu.memory_space<vmem>>, vector<1x4x256xf32>
    %697 = vector.shape_cast %696 : vector<1x4x256xf32> to vector<4x256xf32>
    %698 = vector.shape_cast %694 : vector<4x256xf32> to vector<1x4x256xf32>
    tpu.vector_store %arg4[%c0_155, %695, %c0_156], %698 {strides = array<i32>} : memref<1x4x256xf32, #tpu.memory_space<vmem>>, vector<1x4x256xf32>,
    %c1_i32_157 = arith.constant 1 : i32
    return
  }
  func.func @transform_0(%arg0: i32) -> (i32, i32, i32) {
    %c0_i32 = arith.constant 0 : i32
    %c0_i32_0 = arith.constant 0 : i32
    %c0_i32_1 = arith.constant 0 : i32
    return %arg0, %c0_i32, %c0_i32_0 : i32, i32, i32
  }
  func.func @transform_1(%arg0: i32) -> i32 {
    %c0_i32 = arith.constant 0 : i32
    %c0_i32_0 = arith.constant 0 : i32
    return %c0_i32 : i32
  }
  func.func @transform_2(%arg0: i32) -> i32 {
    %c0_i32 = arith.constant 0 : i32
    %c0_i32_0 = arith.constant 0 : i32
    return %c0_i32 : i32
  }
  func.func @transform_3(%arg0: i32) -> (i32, i32, i32) {
    %c0_i32 = arith.constant 0 : i32
    %c0_i32_0 = arith.constant 0 : i32
    %c0_i32_1 = arith.constant 0 : i32
    return %arg0, %c0_i32, %c0_i32_0 : i32, i32, i32
  }
}

</mosaic_0001>

<bundles_post_ra>
// kernel: spatial_gate.1
= control target key start
LH: loop header
LB: loop body
LE: loop exit
PB: predicated region body
PF: predicated region fallthrough
CT: control target
= control target key end

     0   :  { %s4625_s0 = inlined_call_operand.vmem [shape: f32[2,4,256], index: 0, kind: input, shape index: {}]   ;;  %s4626_s1 = inlined_call_operand.vmem [shape: f32[98], index: 1, kind: input, shape index: {}]   ;;  %s4627_s2 = inlined_call_operand.<no memory space> [shape: f32[1], index: 2, kind: input, shape index: {}]   ;;  %s4628_s3 = inlined_call_operand.vmem [shape: f32[2,4,256], index: 3, kind: output, shape index: {}]  }
   0x1   :  { %8 = sst [smem:[#allocation3]] %s4627_s2 }
   0x2   :  { %9 = vsyncpa [#allocation5], 0  ;;  %s2690_s14 = smov 0  }
   0x3 LB: > { %s2696_s15 = sadd.s32 4294967295, %s2642_s14   ;;  %p2449_p0 = scmp.ge.s32.totalorder %s2642_s14, 1  ;;  %s2642_s14 = sphi %s2690_s14, %s15_s14  }
   0x4   : > { %p114_p1 = scmp.lt.s32.totalorder %s2642_s14, 3  ;;  %s127_s2 = sshll.u32 %s4626_s1, 4  ;;  %s128_s2 = int_to_ptr.vmem [resolvable:$true] %s127_s2 }
   0x5   : > { %p2569_p3 = scmp.eq.s32.totalorder %s2696_s15, 0  ;;  %s2617_s19 = scalar_lea.vmem %s128_s2, 16 }
   0x6   : > { %p2703_p2 = pnand %p2449_p0, %p114_p1  ;;  %p2618_p6 = scmp.ne.s32.totalorder %s128_s2, %s2617_s19 }
   0x7   : > { %p2625_p10 = scmp.lt.s32.totalorder %s128_s2, %s128_s2  ;;  %p2626_p11 = scmp.lt.s32.totalorder %s2617_s19, %s2617_s19 }
   0x8   : > { %p2565_p4 = pneg %p2703_p2 }
   0x9   : > { %p2627_p12 = por %p2626_p11, %p2625_p10 }
   0xa   : > { %p2566_p5 = pnand %p2569_p3, %p2565_p4 }
   0xc   : > { %p2619_p7 = pneg %p2566_p5 }
   0xe   : > { %p2620_p8 = pnand %p2619_p7, %p2618_p6 }
  0x10   : > { %p2621_p9 = pneg %p2620_p8 }
  0x12   : > { %p2628_p13 = pnand %p2627_p12, %p2621_p9 }
  0x14   : > { %2631 = shalt.err (!%p2628_p13)
}
  0x15   : > { %s2644_s20 = smov [#allocation4]   ;;  %151 = sbr.rel (%p2703_p2) target bundleno = 829 (0x33d), region = 32 }
  0x16   : > { %2568 = dma.vmem_to_smem (!%p2566_p5), %s128_s2, 16, %s2644_s20, [#allocation5]  }
  0x1a   : > { %2637 = dma.done.wait (%p2569_p3), [#allocation5], 16  }
  0x1b   : > { %2639 = vsyncadd (%p2569_p3), [#allocation5], 4294967280 }
  0x1c   : > { %157 = sfence }
  0x1d   : > { %p176_p0 = scmp.lt.s32.totalorder %s2696_s15, 1  ;;  %v2645_v0 = vmov 0.0   ;;  %vm190_vm0 = vcmask 1043456   ;;  %s2646_s25 = smov 99   ;;  %vm233_vm1 = vcmask 147480   ;;  %vm380_vm2 = vcmask 1046528  }
  0x1e   : > { %223 = vst [vmem:[#allocation2] sm:$0xff] %v2645_v0  ;;  %224 = vst [vmem:[#allocation2 + $0x8] sm:$0xff] %v2645_v0  ;;  %s2647_s26 = smov 3   ;;  %s2648_s27 = smov 83   ;;  %vm398_vm3 = vcmask 1045504   ;;  %vm416_vm4 = vcmask 1044480  }
  0x1f   : > { %225 = vst [vmem:[#allocation2 + $0x10] sm:$0xff] %v2645_v0  ;;  %226 = vst [vmem:[#allocation2 + $0x18] sm:$0xff] %v2645_v0  ;;  %s4673_s15 = smov (!%p176_p0, %s2696_s15), 1  ;;  %s2649_s28 = smov 115   ;;  %vm451_vm5 = vcmask 1042432   ;;  %vm469_vm6 = vcmask 1041408  }
  0x20   : > { %227 = vst [vmem:[#allocation2 + $0x20] sm:$0xff] %v2645_v0  ;;  %228 = vst [vmem:[#allocation2 + $0x28] sm:$0xff] %v2645_v0  ;;  %s2559_s21 = sshll.u32 %s4673_s15, 3  ;;  %s2650_s29 = smov 51   ;;  %vm2344_vm7 = vcmask 130048   ;;  %vm2346_vm8 = vcmask 261120  }
  0x21   : > { %s2728_s24 = scalar_lea.vmem %s4625_s0, %s2559_s21  ;;  %s2651_s30 = smov 67   ;;  %vm2348_vm9 = vcmask 392192   ;;  %vm2350_vm10 = vcmask 523264   ;;  %vm2352_vm11 = vcmask 654336   ;;  %vm2354_vm12 = vcmask 785408  }
  0x22   : > { %v186_v1 = vld [vmem:[%s2728_s24] sm:$0xff]  ;;  %s2652_s4 = smov 19   ;;  %s2653_s5 = smov 35   ;;  %vm2356_vm13 = vcmask 916480  }
  0x23   : > { %v191_v2 = vsel %vm190_vm0, %v186_v1, -inf  ;;  %v188_v3 = vcombine.high %v186_v1, %v186_v1  ;;  %v205_v14 = vsel %vm190_vm0, %v186_v1, 0.0  ;;  %s2771_s6 = sld [smem:[#allocation4 + $0x1]]  ;;  %s2654_s10 = smov 127  }
  0x24   : > { %v192_v4 = vrot.slane %v191_v2, 4  ;;  %v206_v16 = vrot.slane %v205_v14, 4  ;;  %s2775_s7 = sld [smem:[#allocation4 + $0x2]]  ;;  %s2655_s12 = smov 126  }
  0x25   : > { %v198_v5 = vsel %vm190_vm0, %v188_v3, -inf  ;;  %v212_v22 = vsel %vm190_vm0, %v188_v3, 0.0  ;;  %s2780_s8 = sld [smem:[#allocation4 + $0x3]]  ;;  %s2656_s16 = smov 125  }
  0x26   : > { %v193_v6 = vmax.f32 %v191_v2, %v192_v4  ;;  %v199_v8 = vrot.slane %v198_v5, 4  ;;  %v207_v18 = vadd.f32 %v206_v16, %v205_v14  ;;  %v213_v24 = vrot.slane %v212_v22, 4  ;;  %s2788_s9 = sld [smem:[#allocation4 + $0x4]]  ;;  %s2657_s2 = smov 124  }
  0x27   : > { %s2465_s11 = sld [smem:[#allocation4 + $0x8]] }
  0x28   : > { %v194_v7 = vrot.slane %v193_v6, 2  ;;  %v200_v11 = vmax.f32 %v198_v5, %v199_v8  ;;  %v208_v20 = vrot.slane %v207_v18, 2  ;;  %v214_v26 = vadd.f32 %v213_v24, %v212_v22  ;;  %s2466_s13 = sld [smem:[#allocation4 + $0xf]] }
  0x29   : > { %v480_v41 = vstv %s2771_s6  ;;  %s2467_s17 = sld [smem:[#allocation4 + $0x16]] }
  0x2a   : > { %v195_v9 = vmax.f32 %v193_v6, %v194_v7  ;;  %v201_v13 = vrot.slane %v200_v11, 2  ;;  %v209_v21 = vadd.f32 %v208_v20, %v207_v18  ;;  %v215_v28 = vrot.slane %v214_v26, 2  ;;  %s2468_s18 = sld [smem:[#allocation4 + $0x1d]] }
  0x2b   : > { %v620_v46 = vstv %s2775_s7  ;;  %v760_v50 = vstv %s2780_s8  ;;  %s2822_s19 = sld [smem:[#allocation4 + $0x24]] }
  0x2c   : > { %v196_v10 = vrot.slane %v195_v9, 1  ;;  %v202_v15 = vmax.f32 %v200_v11, %v201_v13  ;;  %v210_v23 = vrot.slane %v209_v21, 1  ;;  %v216_v29 = vadd.f32 %v215_v28, %v214_v26  ;;  %s2837_s20 = sld [smem:[#allocation4 + $0x2b]] }
  0x2d   : > { %v900_v54 = vstv %s2788_s9  ;;  %v494_v57 = vstv %s2465_s11  ;;  %s2854_s22 = sld [smem:[#allocation4 + $0x9]] }
  0x2e   : > { %v197_v12 = vmax.f32 %v195_v9, %v196_v10  ;;  %v203_v17 = vrot.slane %v202_v15, 1  ;;  %v211_v25 = vadd.f32 %v210_v23, %v209_v21  ;;  %v217_v30 = vrot.slane %v216_v29, 1  ;;  %s2873_s23 = sld [smem:[#allocation4 + $0x10]] }
  0x2f   : > { %v515_v61 = vstv %s2466_s13  ;;  %v536_v6 = vstv %s2467_s17  ;;  %s2483_s6 = sld [smem:[#allocation4 + $0x26]] }
  0x30   : > { %239 = vrot.lane.b32.xlu1 %v197_v12, %s2646_s25  ;;  %230 = vrot.lane.b32.xlu0 %v197_v12, %s2647_s26  ;;  %v204_v19 = vmax.f32 %v202_v15, %v203_v17  ;;  %v221_v27 = vmul.f32 0.25, %v211_v25  ;;  %v218_v31 = vadd.f32 %v217_v30, %v216_v29  ;;  %v557_v16 = vstv %s2468_s18  ;;  %s2484_s7 = sld [smem:[#allocation4 + $0x2d]] }
  0x31   : > { %v578_v26 = vstv %s2822_s19  ;;  %s2486_s8 = sld [smem:[#allocation4 + $0xb]] }
  0x32   : > { %v222_v32 = vmul.f32 0.25, %v218_v31  ;;  %s2487_s9 = sld [smem:[#allocation4 + $0x12]] }
  0x33   : > { %s2488_s11 = sld [smem:[#allocation4 + $0x19]] }
  0x34   : > { %243 = vrot.lane.b32.xlu1 %v197_v12, %s2648_s27  ;;  %235 = vrot.lane.b32.xlu0 %v197_v12, %s2649_s28  ;;  %s2489_s13 = sld [smem:[#allocation4 + $0x20]] }
  0x35   : > { %s2490_s17 = sld [smem:[#allocation4 + $0x27]] }
  0x36   : > { %s2491_s18 = sld [smem:[#allocation4 + $0x2e]] }
  0x37   : > { %s2493_s19 = sld [smem:[#allocation4 + $0xc]] }
  0x38   : > { %251 = vrot.lane.b32.xlu1 %v197_v12, %s2650_s29  ;;  %247 = vrot.lane.b32.xlu0 %v197_v12, %s2651_s30 }
  0x3c   : > { %259 = vrot.lane.b32.xlu1 %v197_v12, %s2652_s4  ;;  %255 = vrot.lane.b32.xlu0 %v197_v12, %s2653_s5 }
  0x40   : > { %268 = vrot.lane.b32.xlu1 %v204_v19, %s2649_s28  ;;  %264 = vrot.lane.b32.xlu0 %v204_v19, %s2647_s26 }
  0x44   : > { %276 = vrot.lane.b32.xlu1 %v204_v19, %s2648_s27  ;;  %272 = vrot.lane.b32.xlu0 %v204_v19, %s2646_s25 }
  0x48   : > { %284 = vrot.lane.b32.xlu1 %v204_v19, %s2650_s29  ;;  %280 = vrot.lane.b32.xlu0 %v204_v19, %s2651_s30 }
  0x4c   : > { %292 = vrot.lane.b32.xlu1 %v204_v19, %s2652_s4  ;;  %288 = vrot.lane.b32.xlu0 %v204_v19, %s2653_s5 }
  0x50   : > { %297 = vrot.lane.b32.xlu0 %v221_v27, %s2647_s26  ;;  %302 = vrot.lane.b32.xlu1 %v221_v27, %s2649_s28 }
  0x54   : > { %306 = vrot.lane.b32.xlu0 %v221_v27, %s2646_s25  ;;  %310 = vrot.lane.b32.xlu1 %v221_v27, %s2648_s27 }
  0x58   : > { %314 = vrot.lane.b32.xlu0 %v221_v27, %s2651_s30  ;;  %318 = vrot.lane.b32.xlu1 %v221_v27, %s2650_s29 }
  0x5c   : > { %322 = vrot.lane.b32.xlu0 %v221_v27, %s2653_s5  ;;  %326 = vrot.lane.b32.xlu1 %v221_v27, %s2652_s4 }
  0x60   : > { %331 = vrot.lane.b32.xlu0 %v222_v32, %s2647_s26  ;;  %335 = vrot.lane.b32.xlu1 %v222_v32, %s2649_s28  ;;  %s2909_s26 = sld [smem:[#allocation4 + $0x1e]] }
  0x61   : > { %s2477_s28 = sld [smem:[#allocation4 + $0x2c]] }
  0x64   : > { %339 = vrot.lane.b32.xlu0 %v222_v32, %s2646_s25  ;;  %343 = vrot.lane.b32.xlu1 %v222_v32, %s2648_s27  ;;  %s2890_s25 = sld [smem:[#allocation4 + $0x17]] }
  0x65   : > { %s2476_s27 = sld [smem:[#allocation4 + $0x25]] }
  0x68   : > { %347 = vrot.lane.b32.xlu0 %v222_v32, %s2651_s30  ;;  %351 = vrot.lane.b32.xlu1 %v222_v32, %s2650_s29  ;;  %s2479_s29 = sld [smem:[#allocation4 + $0xa]] }
  0x69   : > { %s2480_s30 = sld [smem:[#allocation4 + $0x11]] }
  0x6c   : > { %359 = vrot.lane.b32.xlu1 %v222_v32, %s2652_s4  ;;  %355 = vrot.lane.b32.xlu0 %v222_v32, %s2653_s5  ;;  %s2481_s4 = sld [smem:[#allocation4 + $0x18]] }
  0x6d   : > { %s2482_s5 = sld [smem:[#allocation4 + $0x1f]] }
  0xa2   : > { %v240_v33 = vpop.permute.xlu1 %239  ;;  %v231_v34 = vpop.permute.xlu0 %230 }
  0xa3   : > { %242 = vst.msk [vmem:[#allocation2 + $0x5] sm:$0x1] %vm233_vm1, %v240_v33  ;;  %234 = vst.msk [vmem:[#allocation2 + $0x3] sm:$0x1] %vm233_vm1, %v231_v34 }
  0xa6   : > { %v244_v35 = vpop.permute.xlu1 %243  ;;  %v236_v36 = vpop.permute.xlu0 %235 }
  0xa7   : > { %246 = vst.msk [vmem:[#allocation2 + $0x6] sm:$0x1] %vm233_vm1, %v244_v35  ;;  %238 = vst.msk [vmem:[#allocation2 + $0x4] sm:$0x1] %vm233_vm1, %v236_v36 }
  0xaa   : > { %v252_v37 = vpop.permute.xlu1 %251  ;;  %v248_v38 = vpop.permute.xlu0 %247 }
  0xab   : > { %254 = vst.msk [vmem:[#allocation2 + $0x8] sm:$0x1] %vm233_vm1, %v252_v37  ;;  %250 = vst.msk [vmem:[#allocation2 + $0x7] sm:$0x1] %vm233_vm1, %v248_v38  ;;  %v599_v37 = vstv %s2837_s20  ;;  %s3083_s20 = sld [smem:[#allocation4 + $0x5]] }
  0xae   : > { %v260_v39 = vpop.permute.xlu1 %259  ;;  %v256_v40 = vpop.permute.xlu0 %255 }
  0xaf   : > { %262 = vst.msk [vmem:[#allocation2 + $0xa] sm:$0x1] %vm233_vm1, %v260_v39  ;;  %258 = vst.msk [vmem:[#allocation2 + $0x9] sm:$0x1] %vm233_vm1, %v256_v40 }
  0xb2   : > { %v2782_v42 = vld [vmem:[#allocation2] sm:$0xff]  ;;  %v269_v43 = vpop.permute.xlu1 %268  ;;  %v265_v44 = vpop.permute.xlu0 %264 }
  0xb3   : > { %271 = vst.msk [vmem:[#allocation2 + $0xc] sm:$0x1] %vm233_vm1, %v269_v43  ;;  %267 = vst.msk [vmem:[#allocation2 + $0xb] sm:$0x1] %vm233_vm1, %v265_v44  ;;  %v481_v45 = vmul.f32 %v480_v41, %v2782_v42  ;;  %v621_v49 = vmul.f32 %v620_v46, %v2782_v42  ;;  %v761_v53 = vmul.f32 %v760_v50, %v2782_v42 }
  0xb4   : > { %v901_v58 = vmul.f32 %v900_v54, %v2782_v42  ;;  %v495_v59 = vmul.f32 %v494_v57, %v2782_v42  ;;  %v516_v5 = vmul.f32 %v515_v61, %v2782_v42  ;;  %v537_v15 = vmul.f32 %v536_v6, %v2782_v42 }
  0xb5   : > { %485 = vrot.lane.b32.xlu0 %v481_v45, %s2654_s10  ;;  %v558_v25 = vmul.f32 %v557_v16, %v2782_v42  ;;  %v579_v36 = vmul.f32 %v578_v26, %v2782_v42 }
  0xb6   : > { %v277_v47 = vpop.permute.xlu1 %276  ;;  %v273_v48 = vpop.permute.xlu0 %272  ;;  %v501_v3 = vrot.slane %v495_v59, 1  ;;  %v522_v14 = vrot.slane %v516_v5, 2  ;;  %v543_v24 = vrot.slane %v537_v15, 3 }
  0xb7   : > { %279 = vst.msk [vmem:[#allocation2 + $0xe] sm:$0x1] %vm233_vm1, %v277_v47  ;;  %275 = vst.msk [vmem:[#allocation2 + $0xd] sm:$0x1] %vm233_vm1, %v273_v48  ;;  %v564_v35 = vrot.slane %v558_v25, 4  ;;  %v585_v47 = vrot.slane %v579_v36, 5  ;;  %v600_v48 = vmul.f32 %v599_v37, %v2782_v42 }
  0xb9   : > { %625 = vrot.lane.b32.xlu0 %v621_v49, %s2655_s12  ;;  %v634_v49 = vstv %s2854_s22  ;;  %s2494_s22 = sld [smem:[#allocation4 + $0x13]] }
  0xba   : > { %v285_v51 = vpop.permute.xlu1 %284  ;;  %v281_v52 = vpop.permute.xlu0 %280  ;;  %v635_v59 = vmul.f32 %v634_v49, %v2782_v42 }
  0xbb   : > { %287 = vst.msk [vmem:[#allocation2 + $0x10] sm:$0x1] %vm233_vm1, %v285_v51  ;;  %283 = vst.msk [vmem:[#allocation2 + $0xf] sm:$0x1] %vm233_vm1, %v281_v52 }
  0xbd   : > { %765 = vrot.lane.b32.xlu0 %v761_v53, %s2656_s16 }
  0xbe   : > { %v293_v55 = vpop.permute.xlu1 %292  ;;  %v289_v56 = vpop.permute.xlu0 %288 }
  0xbf   : > { %295 = vst.msk [vmem:[#allocation2 + $0x12] sm:$0x1] %vm233_vm1, %v293_v55  ;;  %291 = vst.msk [vmem:[#allocation2 + $0x11] sm:$0x1] %vm233_vm1, %v289_v56 }
  0xc1   : > { %905 = vrot.lane.b32.xlu0 %v901_v58, %s2657_s2  ;;  %v606_v58 = vrot.slane %v600_v48, 6  ;;  %v774_v48 = vstv %s2479_s29  ;;  %s2500_s29 = sld [smem:[#allocation4 + $0xd]] }
  0xc2   : > { %v2808_v60 = vld [vmem:[#allocation2 + $0x8] sm:$0xff]  ;;  %v298_v62 = vpop.permute.xlu0 %297  ;;  %v303_v63 = vpop.permute.xlu1 %302 }
  0xc3   : > { %v482_v0 = vmul.f32 %v480_v41, %v2808_v60  ;;  %v2812_v1 = vmul.f32 %v494_v57, %v2808_v60  ;;  %v2815_v2 = vmul.f32 %v515_v61, %v2808_v60  ;;  %301 = vst.msk [vmem:[#allocation2 + $0x1b] sm:$0x1] %vm233_vm1, %v298_v62  ;;  %305 = vst.msk [vmem:[#allocation2 + $0x1c] sm:$0x1] %vm233_vm1, %v303_v63 }
  0xc4   : > { %v622_v10 = vmul.f32 %v620_v46, %v2808_v60  ;;  %v2828_v12 = vmul.f32 %v536_v6, %v2808_v60  ;;  %v762_v20 = vmul.f32 %v760_v50, %v2808_v60  ;;  %v2845_v22 = vmul.f32 %v557_v16, %v2808_v60 }
  0xc5   : > { %487 = vrot.lane.b32.xlu1 %v482_v0, %s2654_s10  ;;  %v502_v4 = vrot.slane %v2812_v1, 1  ;;  %v523_v11 = vrot.slane %v2815_v2, 2  ;;  %v902_v30 = vmul.f32 %v900_v54, %v2808_v60  ;;  %v2864_v32 = vmul.f32 %v578_v26, %v2808_v60 }
  0xc6   : > { %v307_v7 = vpop.permute.xlu0 %306  ;;  %v311_v8 = vpop.permute.xlu1 %310  ;;  %v2833_v13 = vld [vmem:[#allocation2 + $0x10] sm:$0x3f]  ;;  %v544_v21 = vrot.slane %v2828_v12, 3  ;;  %v565_v31 = vrot.slane %v2845_v22, 4  ;;  %v2880_v43 = vmul.f32 %v599_v37, %v2808_v60  ;;  %v2897_v54 = vmul.f32 %v634_v49, %v2808_v60 }
  0xc7   : > { %v503_v9 = vsel %vm380_vm2, %v501_v3, %v502_v4  ;;  %309 = vst.msk [vmem:[#allocation2 + $0x1d] sm:$0x1] %vm233_vm1, %v307_v7  ;;  %313 = vst.msk [vmem:[#allocation2 + $0x1e] sm:$0x1] %vm233_vm1, %v311_v8  ;;  %v524_v19 = vsel %vm398_vm3, %v522_v14, %v523_v11  ;;  %v497_v23 = vmul.f32 %v494_v57, %v2833_v13  ;;  %v586_v41 = vrot.slane %v2864_v32, 5 }
  0xc8   : > { %506 = vrot.lane.b32.xlu0 %v503_v9, %s2654_s10  ;;  %v545_v29 = vsel %vm416_vm4, %v543_v24, %v544_v21  ;;  %v518_v34 = vmul.f32 %v515_v61, %v2833_v13  ;;  %v566_v40 = vsel %vm190_vm0, %v564_v35, %v565_v31  ;;  %v539_v46 = vmul.f32 %v536_v6, %v2833_v13 }
  0xc9   : > { %627 = vrot.lane.b32.xlu1 %v622_v10, %s2655_s12  ;;  %v504_v33 = vrot.slane %v497_v23, 1  ;;  %v587_v52 = vsel %vm451_vm5, %v585_v47, %v586_v41  ;;  %v607_v53 = vrot.slane %v2880_v43, 6  ;;  %v560_v57 = vmul.f32 %v557_v16, %v2833_v13 }
  0xca   : > { %v315_v17 = vpop.permute.xlu0 %314  ;;  %v319_v18 = vpop.permute.xlu1 %318  ;;  %v525_v45 = vrot.slane %v518_v34, 2  ;;  %v546_v56 = vrot.slane %v539_v46, 3  ;;  %v655_v61 = vstv %s2873_s23  ;;  %v642_v1 = vrot.slane %v2897_v54, 1  ;;  %s2495_s23 = sld [smem:[#allocation4 + $0x1a]] }
  0xcb   : > { %317 = vst.msk [vmem:[#allocation2 + $0x1f] sm:$0x1] %vm233_vm1, %v315_v17  ;;  %321 = vst.msk [vmem:[#allocation2 + $0x20] sm:$0x1] %vm233_vm1, %v319_v18  ;;  %v505_v44 = vsel %vm380_vm2, %v502_v4, %v504_v33  ;;  %v608_v0 = vsel %vm469_vm6, %v606_v58, %v607_v53  ;;  %v2916_v2 = vmul.f32 %v655_v61, %v2808_v60  ;;  %v567_v4 = vrot.slane %v560_v57, 4 }
  0xcc   : > { %527 = vrot.lane.b32.xlu0 %v524_v19, %s2654_s10  ;;  %v526_v55 = vsel %vm398_vm3, %v523_v11, %v525_v45  ;;  %v547_v3 = vsel %vm416_vm4, %v544_v21, %v546_v56  ;;  %v581_v5 = vmul.f32 %v578_v26, %v2833_v13  ;;  %v641_v6 = vrot.slane %v635_v59, 1 }
  0xcd   : > { %767 = vrot.lane.b32.xlu1 %v762_v20, %s2656_s16  ;;  %v656_v7 = vmul.f32 %v655_v61, %v2782_v42  ;;  %v676_v8 = vstv %s2890_s25  ;;  %v663_v14 = vrot.slane %v2916_v2, 2  ;;  %v568_v15 = vsel %vm190_vm0, %v565_v31, %v567_v4  ;;  %s2496_s25 = sld [smem:[#allocation4 + $0x21]] }
  0xce   : > { %v323_v27 = vpop.permute.xlu0 %322  ;;  %v327_v28 = vpop.permute.xlu1 %326  ;;  %v643_v11 = vsel %vm380_vm2, %v641_v6, %v642_v1  ;;  %v2931_v12 = vmul.f32 %v676_v8, %v2808_v60  ;;  %v588_v16 = vrot.slane %v581_v5, 5  ;;  %v602_v17 = vmul.f32 %v599_v37, %v2833_v13 }
  0xcf   : > { %325 = vst.msk [vmem:[#allocation2 + $0x21] sm:$0x1] %vm233_vm1, %v323_v27  ;;  %329 = vst.msk [vmem:[#allocation2 + $0x22] sm:$0x1] %vm233_vm1, %v327_v28  ;;  %v662_v18 = vrot.slane %v656_v7, 2  ;;  %v677_v19 = vmul.f32 %v676_v8, %v2782_v42  ;;  %v697_v20 = vstv %s2909_s26  ;;  %v637_v26 = vmul.f32 %v634_v49, %v2833_v13  ;;  %s2658_s26 = smov 123  }
  0xd0   : > { %548 = vrot.lane.b32.xlu0 %v545_v29, %s2654_s10  ;;  %v684_v23 = vrot.slane %v2931_v12, 3  ;;  %v2946_v24 = vmul.f32 %v697_v20, %v2808_v60  ;;  %v589_v22 = vsel %vm451_vm5, %v586_v41, %v588_v16  ;;  %v609_v25 = vrot.slane %v602_v17, 6 }
  0xd1   : > { %907 = vrot.lane.b32.xlu1 %v902_v30, %s2657_s2  ;;  %v664_v21 = vsel %vm398_vm3, %v662_v18, %v663_v14  ;;  %v683_v27 = vrot.slane %v677_v19, 3  ;;  %v698_v28 = vmul.f32 %v697_v20, %v2782_v42  ;;  %v718_v29 = vstv %s2476_s27  ;;  %s2497_s27 = sld [smem:[#allocation4 + $0x28]] }
  0xd2   : > { %v332_v38 = vpop.permute.xlu0 %331  ;;  %v336_v39 = vpop.permute.xlu1 %335  ;;  %v705_v31 = vrot.slane %v2946_v24, 4  ;;  %v2958_v33 = vmul.f32 %v718_v29, %v2808_v60  ;;  %v610_v32 = vsel %vm469_vm6, %v607_v53, %v609_v25  ;;  %v644_v34 = vrot.slane %v637_v26, 1 }
  0xd3   : > { %334 = vst.msk [vmem:[#allocation2 + $0x23] sm:$0x1] %vm233_vm1, %v332_v38  ;;  %338 = vst.msk [vmem:[#allocation2 + $0x24] sm:$0x1] %vm233_vm1, %v336_v39  ;;  %v685_v30 = vsel %vm416_vm4, %v683_v27, %v684_v23  ;;  %v658_v35 = vmul.f32 %v655_v61, %v2833_v13  ;;  %v704_v36 = vrot.slane %v698_v28, 4  ;;  %v719_v37 = vmul.f32 %v718_v29, %v2782_v42 }
  0xd4   : > { %569 = vrot.lane.b32.xlu0 %v566_v40, %s2654_s10  ;;  %v739_v38 = vstv %s2477_s28  ;;  %v726_v40 = vrot.slane %v2958_v33, 5  ;;  %v645_v43 = vsel %vm380_vm2, %v642_v1, %v644_v34  ;;  %v679_v45 = vmul.f32 %v676_v8, %v2833_v13  ;;  %s2498_s28 = sld [smem:[#allocation4 + $0x2f]] }
  0xd5   : > { %508 = vrot.lane.b32.xlu1 %v505_v44, %s2654_s10  ;;  %v706_v39 = vsel %vm190_vm0, %v704_v36, %v705_v31  ;;  %v2970_v41 = vmul.f32 %v739_v38, %v2808_v60  ;;  %v665_v44 = vrot.slane %v658_v35, 2  ;;  %v725_v46 = vrot.slane %v719_v37, 5 }
  0xd6   : > { %v340_v50 = vpop.permute.xlu0 %339  ;;  %v344_v51 = vpop.permute.xlu1 %343  ;;  %v740_v47 = vmul.f32 %v739_v38, %v2782_v42  ;;  %v686_v53 = vrot.slane %v679_v45, 3  ;;  %v700_v54 = vmul.f32 %v697_v20, %v2833_v13  ;;  %v775_v56 = vmul.f32 %v774_v48, %v2782_v42 }
  0xd7   : > { %342 = vst.msk [vmem:[#allocation2 + $0x25] sm:$0x1] %vm233_vm1, %v340_v50  ;;  %346 = vst.msk [vmem:[#allocation2 + $0x26] sm:$0x1] %vm233_vm1, %v344_v51  ;;  %v727_v49 = vsel %vm451_vm5, %v725_v46, %v726_v40  ;;  %v747_v50 = vrot.slane %v2970_v41, 6  ;;  %v2980_v51 = vmul.f32 %v774_v48, %v2808_v60  ;;  %v795_v57 = vstv %s2480_s30  ;;  %s3160_s30 = sld [smem:[#allocation4 + $0x6]] }
  0xd8   : > { %590 = vrot.lane.b32.xlu0 %v587_v52, %s2654_s10  ;;  %v666_v52 = vsel %vm398_vm3, %v663_v14, %v665_v44  ;;  %v2990_v61 = vmul.f32 %v795_v57, %v2808_v60  ;;  %v781_v1 = vrot.slane %v775_v56, 1  ;;  %v796_v2 = vmul.f32 %v795_v57, %v2782_v42 }
  0xd9   : > { %529 = vrot.lane.b32.xlu1 %v526_v55, %s2654_s10  ;;  %v746_v55 = vrot.slane %v740_v47, 6  ;;  %v782_v59 = vrot.slane %v2980_v51, 1  ;;  %v837_v14 = vstv %s2482_s5  ;;  %v777_v19 = vmul.f32 %v774_v48, %v2833_v13  ;;  %s2502_s5 = sld [smem:[#allocation4 + $0x1b]] }
  0xda   : > { %v348_v62 = vpop.permute.xlu0 %347  ;;  %v352_v63 = vpop.permute.xlu1 %351  ;;  %v803_v5 = vrot.slane %v2990_v61, 2  ;;  %v3010_v16 = vmul.f32 %v837_v14, %v2808_v60  ;;  %v798_v28 = vmul.f32 %v795_v57, %v2833_v13  ;;  %v840_v47 = vmul.f32 %v837_v14, %v2833_v13 }
  0xdb   : > { %350 = vst.msk [vmem:[#allocation2 + $0x27] sm:$0x1] %vm233_vm1, %v348_v62  ;;  %354 = vst.msk [vmem:[#allocation2 + $0x28] sm:$0x1] %vm233_vm1, %v352_v63  ;;  %v748_v58 = vsel %vm469_vm6, %v746_v55, %v747_v50  ;;  %v687_v62 = vsel %vm416_vm4, %v684_v23, %v686_v53  ;;  %v707_v63 = vrot.slane %v700_v54, 4  ;;  %v783_v4 = vsel %vm380_vm2, %v781_v1, %v782_v59 }
  0xdc   : > { %611 = vrot.lane.b32.xlu0 %v608_v0, %s2654_s10  ;;  %v721_v0 = vmul.f32 %v718_v29, %v2833_v13  ;;  %v858_v23 = vstv %s2483_s6  ;;  %v784_v27 = vrot.slane %v777_v19, 1  ;;  %v805_v36 = vrot.slane %v798_v28, 2  ;;  %s3198_s6 = sld [smem:[#allocation4 + $0x22]] }
  0xdd   : > { %550 = vrot.lane.b32.xlu1 %v547_v3, %s2654_s10  ;;  %v816_v3 = vstv %s2481_s4  ;;  %v708_v7 = vsel %vm190_vm0, %v705_v31, %v707_v63  ;;  %v3020_v25 = vmul.f32 %v858_v23, %v2808_v60  ;;  %v879_v31 = vstv %s2484_s7  ;;  %s2501_s4 = sld [smem:[#allocation4 + $0x14]] }
  0xde   : > { %v360_v9 = vpop.permute.xlu1 %359  ;;  %v356_v10 = vpop.permute.xlu0 %355  ;;  %v3000_v6 = vmul.f32 %v816_v3, %v2808_v60  ;;  %v728_v8 = vrot.slane %v721_v0, 5  ;;  %v3030_v34 = vmul.f32 %v879_v31, %v2808_v60  ;;  %v785_v35 = vsel %vm380_vm2, %v782_v59, %v784_v27  ;;  %s3206_s7 = sld [smem:[#allocation4]] }
  0xdf   : > { %362 = vst.msk [vmem:[#allocation2 + $0x2a] sm:$0x1] %vm233_vm1, %v360_v9  ;;  %358 = vst.msk [vmem:[#allocation2 + $0x29] sm:$0x1] %vm233_vm1, %v356_v10  ;;  %v742_v9 = vmul.f32 %v739_v38, %v2833_v13  ;;  %v802_v10 = vrot.slane %v796_v2, 2  ;;  %v819_v37 = vmul.f32 %v816_v3, %v2833_v13  ;;  %v806_v45 = vsel %vm398_vm3, %v803_v5, %v805_v36 }
  0xe0   : > { %646 = vrot.lane.b32.xlu0 %v643_v11, %s2655_s12  ;;  %v817_v11 = vmul.f32 %v816_v3, %v2782_v42  ;;  %v729_v17 = vsel %vm451_vm5, %v726_v40, %v728_v8  ;;  %v914_v40 = vstv %s2486_s8  ;;  %v847_v55 = vrot.slane %v840_v47, 4  ;;  %s2659_s8 = smov 122  }
  0xe1   : > { %571 = vrot.lane.b32.xlu1 %v568_v15, %s2654_s10  ;;  %v804_v12 = vsel %vm398_vm3, %v802_v10, %v803_v5  ;;  %v824_v15 = vrot.slane %v3000_v6, 3  ;;  %v749_v18 = vrot.slane %v742_v9, 6  ;;  %v3040_v44 = vmul.f32 %v914_v40, %v2808_v60 }
  0xe2   : > { %v823_v20 = vrot.slane %v817_v11, 3  ;;  %v826_v46 = vrot.slane %v819_v37, 3  ;;  %v861_v56 = vmul.f32 %v858_v23, %v2833_v13  ;;  %v956_v59 = vstv %s2488_s11  ;;  %s3219_s11 = sld [smem:[#allocation4 + $0x29]] }
  0xe3   : > { %v750_v26 = vsel %vm469_vm6, %v747_v50, %v749_v18  ;;  %v935_v50 = vstv %s2487_s9  ;;  %v958_v63 = vmul.f32 %v956_v59, %v2808_v60  ;;  %v882_v2 = vmul.f32 %v879_v31, %v2833_v13  ;;  %s3211_s9 = sld [smem:[#allocation4 + $0x7]] }
  0xe4   : > { %667 = vrot.lane.b32.xlu0 %v664_v21, %s2655_s12  ;;  %v838_v21 = vmul.f32 %v837_v14, %v2782_v42  ;;  %v825_v24 = vsel %vm416_vm4, %v823_v20, %v824_v15  ;;  %v937_v53 = vmul.f32 %v935_v50, %v2808_v60  ;;  %v827_v54 = vsel %vm416_vm4, %v824_v15, %v826_v46 }
  0xe5   : > { %592 = vrot.lane.b32.xlu1 %v589_v22, %s2654_s10  ;;  %v845_v22 = vrot.slane %v3010_v16, 4  ;;  %v868_v1 = vrot.slane %v861_v56, 5  ;;  %v977_v5 = vstv %s2489_s13  ;;  %v889_v10 = vrot.slane %v882_v2, 6  ;;  %s3221_s13 = sld [smem:[#allocation4 + $0xe]] }
  0xe6   : > { %v844_v29 = vrot.slane %v838_v21, 4  ;;  %v979_v8 = vmul.f32 %v977_v5, %v2808_v60  ;;  %v917_v11 = vmul.f32 %v914_v40, %v2833_v13  ;;  %v998_v15 = vstv %s2490_s17  ;;  %s3233_s17 = sld [smem:[#allocation4 + $0x15]] }
  0xe7   : > { %v848_v0 = vsel %vm190_vm0, %v845_v22, %v847_v55  ;;  %v3071_v18 = vmul.f32 %v998_v15, %v2808_v60  ;;  %v938_v21 = vmul.f32 %v935_v50, %v2833_v13  ;;  %v980_v37 = vmul.f32 %v977_v5, %v2833_v13 }
  0xe8   : > { %688 = vrot.lane.b32.xlu0 %v685_v30, %s2655_s12  ;;  %v859_v30 = vmul.f32 %v858_v23, %v2782_v42  ;;  %v846_v33 = vsel %vm190_vm0, %v844_v29, %v845_v22  ;;  %v924_v20 = vrot.slane %v917_v11, 1  ;;  %v1019_v22 = vstv %s2491_s18  ;;  %s3237_s18 = sld [smem:[#allocation4 + $0x1c]] }
  0xe9   : > { %613 = vrot.lane.b32.xlu1 %v610_v32, %s2654_s10  ;;  %v866_v32 = vrot.slane %v3020_v25, 5  ;;  %v3081_v27 = vmul.f32 %v1019_v22, %v2808_v60  ;;  %v945_v29 = vrot.slane %v938_v21, 2  ;;  %v1001_v46 = vmul.f32 %v998_v15, %v2833_v13 }
  0xea   : > { %v865_v38 = vrot.slane %v859_v30, 5  ;;  %v959_v30 = vmul.f32 %v956_v59, %v2833_v13  ;;  %v1022_v55 = vmul.f32 %v1019_v22, %v2833_v13 }
  0xeb   : > { %v869_v9 = vsel %vm451_vm5, %v866_v32, %v868_v1 }
  0xec   : > { %709 = vrot.lane.b32.xlu0 %v706_v39, %s2655_s12  ;;  %v880_v39 = vmul.f32 %v879_v31, %v2782_v42  ;;  %v867_v41 = vsel %vm451_vm5, %v865_v38, %v866_v32  ;;  %v966_v36 = vrot.slane %v959_v30, 3  ;;  %v1029_v1 = vrot.slane %v1022_v55, 6 }
  0xed   : > { %648 = vrot.lane.b32.xlu1 %v645_v43, %s2655_s12  ;;  %v887_v43 = vrot.slane %v3030_v34, 6  ;;  %v1027_v34 = vrot.slane %v3081_v27, 6 }
  0xee   : > { %v886_v48 = vrot.slane %v880_v39, 6  ;;  %v1054_v39 = vstv %s2493_s19  ;;  %s3247_s19 = sld [smem:[#allocation4 + $0x30]] }
  0xef   : > { %v890_v19 = vsel %vm469_vm6, %v887_v43, %v889_v10  ;;  %v1055_v47 = vmul.f32 %v1054_v39, %v2782_v42  ;;  %v1057_v10 = vmul.f32 %v1054_v39, %v2833_v13 }
  0xf0   : > { %730 = vrot.lane.b32.xlu0 %v727_v49, %s2655_s12  ;;  %v915_v49 = vmul.f32 %v914_v40, %v2782_v42  ;;  %v888_v51 = vsel %vm469_vm6, %v886_v48, %v887_v43  ;;  %v3099_v43 = vmul.f32 %v1054_v39, %v2808_v60 }
  0xf1   : > { %669 = vrot.lane.b32.xlu1 %v666_v52, %s2655_s12  ;;  %v922_v52 = vrot.slane %v3040_v44, 1  ;;  %v1061_v56 = vrot.slane %v1055_v47, 1  ;;  %v1180_v47 = vstv %s3160_s30  ;;  %s3457_s30 = sld [smem:[#allocation4 + $0x55]] }
  0xf2   : > { %v921_v57 = vrot.slane %v915_v49, 1  ;;  %v1075_v49 = vstv %s2494_s22  ;;  %v1181_v55 = vmul.f32 %v1180_v47, %v2782_v42  ;;  %s3276_s22 = sld [smem:[#allocation4 + $0x2a]] }
  0xf3   : > { %v925_v28 = vsel %vm380_vm2, %v922_v52, %v924_v20  ;;  %v1078_v20 = vmul.f32 %v1075_v49, %v2833_v13 }
  0xf4   : > { %751 = vrot.lane.b32.xlu0 %v748_v58, %s2655_s12  ;;  %v936_v58 = vmul.f32 %v935_v50, %v2782_v42  ;;  %v923_v61 = vsel %vm380_vm2, %v921_v57, %v922_v52  ;;  %v3111_v52 = vmul.f32 %v1075_v49, %v2808_v60  ;;  %v1076_v57 = vmul.f32 %v1075_v49, %v2782_v42 }
  0xf5   : > { %690 = vrot.lane.b32.xlu1 %v687_v62, %s2655_s12  ;;  %v943_v62 = vrot.slane %v937_v53, 2  ;;  %v1085_v30 = vrot.slane %v1078_v20, 2 }
  0xf6   : > { %v942_v3 = vrot.slane %v936_v58, 2  ;;  %v1096_v58 = vstv %s2495_s23  ;;  %v1082_v2 = vrot.slane %v1076_v57, 2  ;;  %s3298_s23 = sld [smem:[#allocation4 + $0x39]] }
  0xf8   : > { %786 = vrot.lane.b32.xlu0 %v783_v4, %s2656_s16  ;;  %v957_v4 = vmul.f32 %v956_v59, %v2782_v42  ;;  %v944_v6 = vsel %vm398_vm3, %v942_v3, %v943_v62  ;;  %v1097_v3 = vmul.f32 %v1096_v58, %v2782_v42 }
  0xf9   : > { %711 = vrot.lane.b32.xlu1 %v708_v7, %s2655_s12  ;;  %v964_v7 = vrot.slane %v958_v63, 3  ;;  %v3123_v63 = vmul.f32 %v1096_v58, %v2808_v60 }
  0xfa   : > { %v963_v14 = vrot.slane %v957_v4, 3  ;;  %v1117_v4 = vstv %s2496_s25  ;;  %v1103_v11 = vrot.slane %v1097_v3, 3  ;;  %s3322_s25 = sld [smem:[#allocation4 + $0x32]] }
  0xfb   : > { %v967_v44 = vsel %vm416_vm4, %v964_v7, %v966_v36 }
  0xfc   : > { %807 = vrot.lane.b32.xlu0 %v804_v12, %s2656_s16  ;;  %v978_v12 = vmul.f32 %v977_v5, %v2782_v42  ;;  %v965_v16 = vsel %vm416_vm4, %v963_v14, %v964_v7  ;;  %v3132_v7 = vmul.f32 %v1117_v4, %v2808_v60  ;;  %v1118_v14 = vmul.f32 %v1117_v4, %v2782_v42 }
  0xfd   : > { %732 = vrot.lane.b32.xlu1 %v729_v17, %s2655_s12  ;;  %v985_v17 = vrot.slane %v979_v8, 4 }
  0xfe   : > { %v984_v23 = vrot.slane %v978_v12, 4  ;;  %v1138_v12 = vstv %s2497_s27  ;;  %v1124_v21 = vrot.slane %v1118_v14, 4  ;;  %s3335_s27 = sld [smem:[#allocation4 + $0x40]] }
 0x100   : > { %828 = vrot.lane.b32.xlu0 %v825_v24, %s2656_s16  ;;  %v999_v24 = vmul.f32 %v998_v15, %v2782_v42  ;;  %v986_v25 = vsel %vm190_vm0, %v984_v23, %v985_v17  ;;  %v1139_v23 = vmul.f32 %v1138_v12, %v2782_v42 }
 0x101   : > { %753 = vrot.lane.b32.xlu1 %v750_v26, %s2655_s12  ;;  %v1006_v26 = vrot.slane %v3071_v18, 5  ;;  %v3145_v18 = vmul.f32 %v1138_v12, %v2808_v60 }
 0x102   : > { %v1005_v31 = vrot.slane %v999_v24, 5 }
 0x103   : > { %v1146_v27 = vrot.slane %v3145_v18, 5 }
 0x104   : > { %849 = vrot.lane.b32.xlu0 %v846_v33, %s2656_s16  ;;  %v1020_v33 = vmul.f32 %v1019_v22, %v2782_v42  ;;  %v1007_v32 = vsel %vm451_vm5, %v1005_v31, %v1006_v26  ;;  %v1159_v22 = vstv %s2498_s28  ;;  %v1099_v31 = vmul.f32 %v1096_v58, %v2833_v13  ;;  %s3378_s28 = sld [smem:[#allocation4 + $0x47]] }
 0x105   : > { %788 = vrot.lane.b32.xlu1 %v785_v35, %s2656_s16  ;;  %v946_v35 = vsel %vm398_vm3, %v943_v62, %v945_v29  ;;  %v1083_v62 = vrot.slane %v3111_v52, 2  ;;  %v1141_v52 = vmul.f32 %v1138_v12, %v2833_v13 }
 0x106   : > { %v1026_v38 = vrot.slane %v1020_v33, 6  ;;  %v1145_v33 = vrot.slane %v1139_v23, 5  ;;  %v1106_v39 = vrot.slane %v1099_v31, 3 }
 0x107   : > { %v1084_v5 = vsel %vm398_vm3, %v1082_v2, %v1083_v62 }
 0x108   : > { %870 = vrot.lane.b32.xlu0 %v867_v41, %s2656_s16  ;;  %v1028_v40 = vsel %vm469_vm6, %v1026_v38, %v1027_v34  ;;  %v1040_v41 = vstv %s3083_s20  ;;  %v1147_v36 = vsel %vm451_vm5, %v1145_v33, %v1146_v27  ;;  %v1086_v38 = vsel %vm398_vm3, %v1083_v62, %v1085_v30  ;;  %s3259_s20 = sld [smem:[#allocation4 + $0x23]] }
 0x109   : > { %809 = vrot.lane.b32.xlu1 %v806_v45, %s2656_s16  ;;  %v987_v45 = vrot.slane %v980_v37, 4  ;;  %v1041_v48 = vmul.f32 %v1040_v41, %v2782_v42  ;;  %v3281_v30 = vstv %s3219_s11  ;;  %s3659_s11 = sld [smem:[#allocation4 + $0x4f]] }
 0x10b   : > { %v988_v53 = vsel %vm190_vm0, %v985_v17, %v987_v45  ;;  %v1125_v17 = vrot.slane %v3132_v7, 4 }
 0x10c   : > { %891 = vrot.lane.b32.xlu0 %v888_v51, %s2656_s16  ;;  %v1062_v51 = vrot.slane %v3099_v43, 1 }
 0x10d   : > { %830 = vrot.lane.b32.xlu1 %v827_v54, %s2656_s16  ;;  %v1008_v54 = vrot.slane %v1001_v46, 5 }
 0x110   : > { %926 = vrot.lane.b32.xlu0 %v923_v61, %s2657_s2  ;;  %v1063_v61 = vsel %vm380_vm2, %v1061_v56, %v1062_v51  ;;  %v1215_v56 = vstv %s2501_s4  ;;  %s3505_s4 = sld [smem:[#allocation4 + $0x5c]] }
 0x111   : > { %851 = vrot.lane.b32.xlu1 %v848_v0, %s2656_s16  ;;  %v1009_v0 = vsel %vm451_vm5, %v1006_v26, %v1008_v54  ;;  %v1126_v26 = vsel %vm190_vm0, %v1124_v21, %v1125_v17  ;;  %v1216_v2 = vmul.f32 %v1215_v56, %v2782_v42 }
 0x113   : > { %v1222_v14 = vrot.slane %v1216_v2, 2 }
 0x114   : > { %947 = vrot.lane.b32.xlu0 %v944_v6, %s2657_s2  ;;  %v1104_v6 = vrot.slane %v3123_v63, 3  ;;  %v1148_v63 = vrot.slane %v1141_v52, 5 }
 0x115   : > { %872 = vrot.lane.b32.xlu1 %v869_v9, %s2656_s16  ;;  %v1030_v9 = vsel %vm469_vm6, %v1027_v34, %v1029_v1 }
 0x116   : > { %v1105_v15 = vsel %vm416_vm4, %v1103_v11, %v1104_v6  ;;  %v1107_v49 = vsel %vm416_vm4, %v1104_v6, %v1106_v39  ;;  %v4630_v39 = vstv %s3206_s7 }
 0x118   : > { %968 = vrot.lane.b32.xlu0 %v965_v16, %s2657_s2  ;;  %v1042_v16 = vmul.f32 %v1040_v41, %v2808_v60 }
 0x119   : > { %893 = vrot.lane.b32.xlu1 %v890_v19, %s2656_s16  ;;  %v1064_v19 = vrot.slane %v1057_v10, 1  ;;  %v1149_v10 = vsel %vm451_vm5, %v1146_v27, %v1148_v63 }
 0x11b   : > { %v1065_v29 = vsel %vm380_vm2, %v1062_v51, %v1064_v19 }
 0x11c   : > { %989 = vrot.lane.b32.xlu0 %v986_v25, %s2657_s2 }
 0x11d   : > { %928 = vrot.lane.b32.xlu1 %v925_v28, %s2657_s2  ;;  %v3158_v28 = vmul.f32 %v1159_v22, %v2808_v60 }
 0x11f   : > { %v1167_v37 = vrot.slane %v3158_v28, 6 }
 0x120   : > { %1010 = vrot.lane.b32.xlu0 %v1007_v32, %s2657_s2  ;;  %v1160_v32 = vmul.f32 %v1159_v22, %v2782_v42 }
 0x121   : > { %949 = vrot.lane.b32.xlu1 %v946_v35, %s2657_s2 }
 0x122   : > { %v1166_v41 = vrot.slane %v1160_v32, 6 }
 0x124   : > { %1031 = vrot.lane.b32.xlu0 %v1028_v40, %s2657_s2  ;;  %v1120_v40 = vmul.f32 %v1117_v4, %v2833_v13  ;;  %v1168_v46 = vsel %vm469_vm6, %v1166_v41, %v1167_v37  ;;  %v3217_v4 = vstv %s2502_s5  ;;  %s3568_s5 = sld [smem:[#allocation4 + $0x3a]] }
 0x125   : > { %970 = vrot.lane.b32.xlu1 %v967_v44, %s2657_s2  ;;  %v1194_v44 = vstv %s2500_s29  ;;  %v1237_v12 = vmul.f32 %v3217_v4, %v2782_v42  ;;  %s3429_s29 = sld [smem:[#allocation4 + $0x4e]] }
 0x126   : > { %v1127_v51 = vrot.slane %v1120_v40, 4  ;;  %v1197_v23 = vmul.f32 %v1194_v44, %v2833_v13  ;;  %v3301_v40 = vld [vmem:[#allocation2] sm:$0xff] }
 0x127   : > { %v3107_v50 = vpop.permute.xlu0 %485 }
 0x128   : > { %1045 = vrot.lane.b32.xlu0 %v1041_v48, %s2658_s26  ;;  %v3186_v48 = vmul.f32 %v1194_v44, %v2808_v60  ;;  %v1128_v62 = vsel %vm190_vm0, %v1125_v17, %v1127_v51  ;;  %v3315_v51 = vstv %s3237_s18  ;;  %s3789_s18 = sld [smem:[#allocation4 + $0x34]] }
 0x129   : > { %991 = vrot.lane.b32.xlu1 %v988_v53, %s2657_s2  ;;  %v1195_v53 = vmul.f32 %v1194_v44, %v2782_v42 }
 0x12a   : > { %v1202_v58 = vrot.slane %v3186_v48, 1  ;;  %v368_v48 = vmul.f32 %v3301_v40, %v4630_v39 }
 0x12b   : > { %v3118_v59 = vpop.permute.xlu0 %625  ;;  %v1201_v1 = vrot.slane %v1195_v53, 1  ;;  %v3320_v53 = vstv %s3247_s19  ;;  %s2529_s19 = sld [smem:[#allocation4 + $0x42]] }
 0x12c   : > { %1066 = vrot.lane.b32.xlu0 %v1063_v61, %s2658_s26  ;;  %v3204_v61 = vmul.f32 %v1215_v56, %v2808_v60 }
 0x12d   : > { %1012 = vrot.lane.b32.xlu1 %v1009_v0, %s2657_s2  ;;  %v1162_v0 = vmul.f32 %v1159_v22, %v2833_v13  ;;  %v1203_v6 = vsel %vm380_vm2, %v1201_v1, %v1202_v58  ;;  %v3267_v22 = vstv %s3211_s9  ;;  %v3338_v1 = vstv %s3259_s20  ;;  %s3634_s9 = sld [smem:[#allocation4 + $0x48]] }
 0x12e   : > { %v1223_v7 = vrot.slane %v3204_v61, 2  ;;  %v374_v41 = vmul.f32 %v3301_v40, %v3267_v22  ;;  %s3816_s20 = sld [smem:[#allocation4 + $0x49]] }
 0x12f   : > { %v3134_v8 = vpop.permute.xlu0 %765  ;;  %v1169_v11 = vrot.slane %v1162_v0, 6  ;;  %v3333_v0 = vmul.f32 %v3320_v53, %v2808_v60 }
 0x130   : > { %4639 = vst [vmem:[#allocation7_spill] sm:$0xff] %v3134_v8  ;;  %1087 = vrot.lane.b32.xlu0 %v1084_v5, %s2658_s26  ;;  %v1224_v18 = vsel %vm398_vm3, %v1222_v14, %v1223_v7 }
 0x131   : > { %1033 = vrot.lane.b32.xlu1 %v1030_v9, %s2657_s2  ;;  %v3231_v9 = vmul.f32 %v3217_v4, %v2808_v60  ;;  %v1170_v21 = vsel %vm469_vm6, %v1167_v37, %v1169_v11  ;;  %v1204_v37 = vrot.slane %v1197_v23, 1  ;;  %v381_v11 = vrot.slane %v374_v41, 1 }
 0x133   : > { %v3151_v24 = vpop.permute.xlu0 %905  ;;  %v1244_v19 = vrot.slane %v3231_v9, 3  ;;  %v1205_v2 = vsel %vm380_vm2, %v1202_v58, %v1204_v37  ;;  %v3380_v37 = vld [vmem:[#allocation2 + $0x18] sm:$0xff] }
 0x134   : > { %1108 = vrot.lane.b32.xlu0 %v1105_v15, %s2658_s26  ;;  %4640 = vst [vmem:[#allocation8_spill] sm:$0xff] %v3151_v24 }
 0x135   : > { %1047 = vrot.lane.b32.xlu1 %v1042_v16, %s2658_s26  ;;  %v3245_v16 = vstv %s3198_s6  ;;  %s3588_s6 = sld [smem:[#allocation4 + $0x33]] }
 0x136   : > { %v3257_v20 = vmul.f32 %v3245_v16, %v2808_v60  ;;  %v1258_v27 = vmul.f32 %v3245_v16, %v2782_v42  ;;  %v1182_v42 = vmul.f32 %v1180_v47, %v2808_v60  ;;  %v3309_v47 = vstv %s3221_s13  ;;  %s3685_s13 = sld [smem:[#allocation4 + $0x56]] }
 0x137   : > { %v3153_v25 = vpop.permute.xlu1 %487  ;;  %v3348_v14 = vmul.f32 %v3309_v47, %v2808_v60  ;;  %v392_v58 = vmul.f32 %v3301_v40, %v3309_v47 }
 0x138   : > { %1129 = vrot.lane.b32.xlu0 %v1126_v26, %s2658_s26  ;;  %v1243_v26 = vrot.slane %v1237_v12, 3  ;;  %v4632_v32 = vrot.slane %v3257_v20, 4  ;;  %v1264_v44 = vrot.slane %v1258_v27, 4 }
 0x139   : > { %1068 = vrot.lane.b32.xlu1 %v1065_v29, %s2658_s26  ;;  %v3274_v29 = vmul.f32 %v3267_v22, %v2808_v60 }
 0x13a   : > { %v3167_v34 = vpop.permute.xlu0 %506  ;;  %v1245_v33 = vsel %vm416_vm4, %v1243_v26, %v1244_v19  ;;  %v3370_v26 = vmul.f32 %v3301_v40, %v3315_v51 }
 0x13b   : > { %v3169_v35 = vpop.permute.xlu1 %627 }
 0x13c   : > { %4641 = vst [vmem:[#allocation9_spill] sm:$0xff] %v3169_v35  ;;  %1150 = vrot.lane.b32.xlu0 %v1147_v36, %s2658_s26  ;;  %v3294_v36 = vmul.f32 %v3281_v30, %v2808_v60  ;;  %v434_v9 = vrot.slane %v3370_v26, 4 }
 0x13d   : > { %1089 = vrot.lane.b32.xlu1 %v1086_v38, %s2658_s26  ;;  %v1218_v38 = vmul.f32 %v1215_v56, %v2833_v13 }
 0x13e   : > { %v3177_v43 = vpop.permute.xlu0 %527  ;;  %v4629_v63 = vrot.slane %v3294_v36, 5  ;;  %v4651_v24 = vrot.slane %v3294_v36, 5 }
 0x13f   : > { %v3179_v45 = vpop.permute.xlu1 %767 }
 0x140   : > { %4642 = vst [vmem:[#allocation10_spill] sm:$0xff] %v3179_v45  ;;  %1171 = vrot.lane.b32.xlu0 %v1168_v46, %s2658_s26  ;;  %v1279_v46 = vmul.f32 %v3301_v40, %v3281_v30 }
 0x141   : > { %1110 = vrot.lane.b32.xlu1 %v1107_v49, %s2658_s26  ;;  %v3312_v49 = vstv %s3233_s17  ;;  %s3716_s17 = sld [smem:[#allocation4 + $0x5d]] }
 0x142   : > { %v3193_v54 = vpop.permute.xlu0 %548  ;;  %v1285_v12 = vrot.slane %v1279_v46, 5  ;;  %v1260_v46 = vmul.f32 %v3245_v16, %v2833_v13  ;;  %v376_v16 = vmul.f32 %v3267_v22, %v2833_v13 }
 0x143   : > { %v3200_v57 = vpop.permute.xlu1 %907 }
 0x144   : > { %4643 = vst [vmem:[#allocation11_spill] sm:$0xff] %v3200_v57  ;;  %1185 = vrot.lane.b32.xlu0 %v1181_v55, %s2659_s8  ;;  %v4631_v55 = vrot.slane %v3274_v29, 1 }
 0x145   : > { %1131 = vrot.lane.b32.xlu1 %v1128_v62, %s2658_s26  ;;  %v1266_v62 = vsel %vm190_vm0, %v1264_v44, %v4632_v32 }
 0x146   : > { %v3215_v3 = vpop.permute.xlu0 %569  ;;  %v383_v23 = vsel %vm380_vm2, %v381_v11, %v4631_v55  ;;  %v2612_v11 = vld [vmem:[#allocation2 + $0x8] sm:$0xff] }
 0x147   : > { %v3223_v5 = vpop.permute.xlu1 %508 }
 0x148   : > { %1206 = vrot.lane.b32.xlu0 %v1203_v6, %s2659_s8  ;;  %v1225_v6 = vrot.slane %v1218_v38, 2  ;;  %v3382_v38 = vld [vmem:[#allocation2 + $0x20] sm:$0xff] }
 0x149   : > { %1152 = vrot.lane.b32.xlu1 %v1149_v10, %s2658_s26  ;;  %v1239_v10 = vmul.f32 %v3217_v4, %v2833_v13  ;;  %v410_v4 = vmul.f32 %v3301_v40, %v3312_v49 }
 0x14a   : > { %v3242_v15 = vpop.permute.xlu0 %590  ;;  %v1226_v41 = vsel %vm398_vm3, %v1223_v7, %v1225_v6  ;;  %v388_v7 = vadd.f32 %v383_v23, %v368_v48  ;;  %v399_v6 = vrot.slane %v392_v58, 2  ;;  %v3419_v48 = vstv %s3335_s27  ;;  %v3425_v23 = vld [vmem:[#allocation2 + $0x10] sm:$0x3f]  ;;  %s3963_s27 = sld [smem:[#allocation4 + $0x43]] }
 0x14b   : > { %v3249_v17 = vpop.permute.xlu1 %529  ;;  %v1246_v44 = vrot.slane %v1239_v10, 3  ;;  %v417_v13 = vrot.slane %v410_v4, 3  ;;  %v1267_v58 = vrot.slane %v1260_v46, 4  ;;  %v1467_v46 = vmul.f32 %v3419_v48, %v3380_v37 }
 0x14c   : > { %1227 = vrot.lane.b32.xlu0 %v1224_v18, %s2659_s8  ;;  %v1300_v18 = vmul.f32 %v3301_v40, %v3320_v53  ;;  %v412_v36 = vmul.f32 %v3425_v23, %v3312_v49 }
 0x14d   : > { %1173 = vrot.lane.b32.xlu1 %v1170_v21, %s2658_s26  ;;  %v3361_v21 = vstv %s3276_s22  ;;  %v1247_v22 = vsel %vm416_vm4, %v1244_v19, %v1246_v44  ;;  %s3846_s22 = sld [smem:[#allocation4 + $0x50]] }
 0x14e   : > { %v3278_v28 = vpop.permute.xlu0 %611  ;;  %v1306_v61 = vrot.slane %v1300_v18, 6 }
 0x14f   : > { %v3283_v31 = vpop.permute.xlu1 %550 }
 0x150   : > { %1248 = vrot.lane.b32.xlu0 %v1245_v33, %s2659_s8  ;;  %v1287_v33 = vsel %vm451_vm5, %v1285_v12, %v4629_v63  ;;  %v3395_v12 = vmul.f32 %v2612_v11, %v3312_v49  ;;  %v4635_v63 = vstv %s3322_s25 }
 0x151   : > { %1187 = vrot.lane.b32.xlu1 %v1182_v42, %s2659_s8  ;;  %v4634_v42 = vrot.slane %v3333_v0, 6 }
 0x152   : > { %v3317_v52 = vpop.permute.xlu0 %646 }
 0x153   : > { %v3325_v56 = vpop.permute.xlu1 %571  ;;  %v1308_v55 = vsel %vm469_vm6, %v1306_v61, %v4634_v42 }
 0x154   : > { %1269 = vrot.lane.b32.xlu0 %v1266_v62, %s2659_s8  ;;  %v3391_v62 = vstv %s3298_s23  ;;  %s3875_s23 = sld [smem:[#allocation4 + $0x57]] }
 0x155   : > { %1208 = vrot.lane.b32.xlu1 %v1205_v2, %s2659_s8  ;;  %v4633_v2 = vrot.slane %v3348_v14, 2  ;;  %v1446_v32 = vmul.f32 %v3391_v62, %v3380_v37  ;;  %v3416_v18 = vmul.f32 %v3391_v62, %v3382_v38 }
 0x156   : > { %v3363_v60 = vpop.permute.xlu0 %667 }
 0x157   : > { %v3372_v27 = vpop.permute.xlu1 %592  ;;  %v401_v61 = vsel %vm398_vm3, %v399_v6, %v4633_v2  ;;  %v3449_v6 = vmul.f32 %v3419_v48, %v3382_v38  ;;  %v384_v2 = vrot.slane %v376_v16, 1  ;;  %v1452_v4 = vrot.slane %v1446_v32, 1 }
 0x158   : > { %1290 = vrot.lane.b32.xlu0 %v1287_v33, %s2659_s8  ;;  %v3399_v33 = vmul.f32 %v3301_v40, %v3338_v1  ;;  %v406_v19 = vadd.f32 %v401_v61, %v388_v7  ;;  %v3460_v7 = vmul.f32 %v2612_v11, %v3338_v1  ;;  %v4645_v61 = vrot.slane %v3257_v20, 4 }
 0x159   : > { %1229 = vrot.lane.b32.xlu1 %v1226_v41, %s2659_s8  ;;  %v1281_v41 = vmul.f32 %v3425_v23, %v3281_v30  ;;  %v1432_v30 = vmul.f32 %v4635_v63, %v3380_v37  ;;  %v1302_v16 = vmul.f32 %v3425_v23, %v3320_v53  ;;  %v4646_v32 = vrot.slane %v3395_v12, 3 }
 0x15a   : > { %v3404_v10 = vpop.permute.xlu0 %688  ;;  %v1268_v63 = vsel %vm190_vm0, %v4645_v61, %v1267_v58  ;;  %v452_v45 = vrot.slane %v3399_v33, 5  ;;  %v4647_v33 = vrot.slane %v3274_v29, 1 }
 0x15b   : > { %v3407_v39 = vpop.permute.xlu1 %613  ;;  %v1288_v57 = vrot.slane %v1281_v41, 5  ;;  %v419_v26 = vsel %vm416_vm4, %v417_v13, %v4646_v32  ;;  %v1473_v41 = vrot.slane %v1467_v46, 2  ;;  %v3482_v13 = vmul.f32 %v2612_v11, %v3361_v21 }
 0x15c   : > { %1311 = vrot.lane.b32.xlu0 %v1308_v55, %s2659_s8  ;;  %v3436_v55 = vmul.f32 %v2612_v11, %v3315_v51  ;;  %v424_v20 = vadd.f32 %v419_v26, %v406_v19  ;;  %v385_v32 = vsel %vm380_vm2, %v4647_v33, %v384_v2  ;;  %v4650_v26 = vstv %s3206_s7  ;;  %v3507_v33 = vld [vmem:[#allocation2 + $0x28] sm:$0x3f]  ;;  %s3601_s7 = sld [smem:[#allocation4 + $0x41]] }
 0x15d   : > { %1250 = vrot.lane.b32.xlu1 %v1247_v22, %s2659_s8  ;;  %v3455_v22 = vstv %s3378_s28  ;;  %v369_v53 = vmul.f32 %v2612_v11, %v4650_v26  ;;  %v1289_v29 = vsel %vm451_vm5, %v4651_v24, %v1288_v57  ;;  %v1309_v8 = vrot.slane %v1302_v16, 6  ;;  %s3969_s28 = sld [smem:[#allocation4 + $0x35]] }
 0x15e   : > { %v3440_v44 = vpop.permute.xlu0 %709  ;;  %v1488_v61 = vmul.f32 %v3455_v22, %v3380_v37  ;;  %v3494_v46 = vmul.f32 %v3455_v22, %v3382_v38  ;;  %v3503_v2 = vstv %s3429_s29  ;;  %v4637_v11 = vrot.slane %v3460_v7, 5  ;;  %s3980_s29 = sld [smem:[#allocation4 + $0x4a]] }
 0x15f   : > { %v3451_v42 = vpop.permute.xlu1 %648  ;;  %v389_v57 = vadd.f32 %v385_v32, %v369_v53  ;;  %v3528_v49 = vmul.f32 %v3503_v2, %v3382_v38  ;;  %v463_v53 = vmul.f32 %v3301_v40, %v3361_v21  ;;  %v430_v32 = vmul.f32 %v3425_v23, %v3315_v51 }
 0x160   : > { %4644 = vst [vmem:[#allocation12_spill] sm:$0xff] %v3451_v42  ;;  %1436 = vrot.lane.b32.xlu0 %v1432_v30, %s2654_s10  ;;  %v394_v30 = vmul.f32 %v3425_v23, %v3309_v47  ;;  %v1494_v42 = vrot.slane %v1488_v61, 3 }
 0x161   : > { %1271 = vrot.lane.b32.xlu1 %v1268_v63, %s2659_s8  ;;  %v4649_v63 = vrot.slane %v3416_v18, 1 }
 0x162   : > { %v3476_v58 = vpop.permute.xlu0 %730  ;;  %v402_v26 = vrot.slane %v394_v30, 2  ;;  %v1509_v30 = vmul.f32 %v3503_v2, %v3380_v37 }
 0x163   : > { %v3487_v47 = vpop.permute.xlu1 %669  ;;  %v1454_v19 = vsel %vm380_vm2, %v1452_v4, %v4649_v63  ;;  %v4652_v4 = vrot.slane %v3436_v55, 4 }
 0x164   : > { %4648 = vst [vmem:[#allocation13_spill] sm:$0xff] %v3487_v47  ;;  %1457 = vrot.lane.b32.xlu0 %v1454_v19, %s2654_s10  ;;  %v4653_v19 = vrot.slane %v3449_v6, 2 }
 0x165   : > { %v436_v63 = vsel %vm190_vm0, %v434_v9, %v4652_v4  ;;  %1292 = vrot.lane.b32.xlu1 %v1289_v29, %s2659_s8  ;;  %v4636_v9 = vrot.slane %v3494_v46, 3  ;;  %v1448_v29 = vmul.f32 %v3391_v62, %v3507_v33  ;;  %v454_v4 = vsel %vm451_vm5, %v452_v45, %v4637_v11 }
 0x166   : > { %v441_v24 = vadd.f32 %v436_v63, %v424_v20  ;;  %v3516_v16 = vpop.permute.xlu0 %751  ;;  %v1475_v47 = vsel %vm398_vm3, %v1473_v41, %v4653_v19  ;;  %v3531_v20 = vstv %s3457_s30  ;;  %v4654_v41 = vrot.slane %v3333_v0, 6  ;;  %s4002_s30 = sld [smem:[#allocation4 + $0x51]] }
 0x167   : > { %v3521_v35 = vpop.permute.xlu1 %690  ;;  %v4655_v63 = vrot.slane %v3348_v14, 2  ;;  %v420_v19 = vrot.slane %v412_v36, 3  ;;  %v1530_v62 = vmul.f32 %v3531_v20, %v3380_v37  ;;  %v3557_v45 = vmul.f32 %v3531_v20, %v3382_v38 }
 0x168   : > { %1478 = vrot.lane.b32.xlu0 %v1475_v47, %s2654_s10  ;;  %v1310_v61 = vsel %vm469_vm6, %v4654_v41, %v1309_v8  ;;  %v459_v0 = vadd.f32 %v454_v4, %v441_v24  ;;  %v1496_v51 = vsel %vm416_vm4, %v1494_v42, %v4636_v9  ;;  %v1515_v24 = vrot.slane %v1509_v30, 4 }
 0x169   : > { %v403_v40 = vsel %vm398_vm3, %v4655_v63, %v402_v26  ;;  %1313 = vrot.lane.b32.xlu1 %v1310_v61, %s2659_s8  ;;  %v4656_v26 = vstv %s3322_s25  ;;  %v470_v41 = vrot.slane %v463_v53, 6  ;;  %v1455_v61 = vrot.slane %v1448_v29, 1  ;;  %s3910_s25 = sld [smem:[#allocation4 + $0x5e]] }
 0x16a   : > { %v407_v8 = vadd.f32 %v403_v40, %v389_v57  ;;  %v3551_v47 = vpop.permute.xlu0 %786  ;;  %v1433_v36 = vmul.f32 %v4656_v26, %v3382_v38  ;;  %v1516_v57 = vrot.slane %v3528_v49, 4  ;;  %v1469_v4 = vmul.f32 %v3419_v48, %v3507_v33 }
 0x16b   : > { %v3559_v14 = vpop.permute.xlu1 %711  ;;  %v3574_v63 = vstv %s3505_s4  ;;  %v4657_v40 = vrot.slane %v3395_v12, 3  ;;  %v437_v9 = vrot.slane %v430_v32, 4  ;;  %v447_v30 = vmul.f32 %v3425_v23, %v3338_v1  ;;  %s4017_s4 = sld [smem:[#allocation4 + $0x58]] }
 0x16c   : > { %1499 = vrot.lane.b32.xlu0 %v1496_v51, %s2654_s10  ;;  %v4658_v53 = vrot.slane %v3482_v13, 6  ;;  %v1536_v48 = vrot.slane %v1530_v62, 5  ;;  %v1537_v11 = vrot.slane %v3557_v45, 5  ;;  %v1517_v1 = vsel %vm190_vm0, %v1515_v24, %v1516_v57 }
 0x16d   : > { %v421_v42 = vsel %vm416_vm4, %v4657_v40, %v420_v19  ;;  %1438 = vrot.lane.b32.xlu1 %v1433_v36, %s2654_s10  ;;  %v1551_v32 = vmul.f32 %v3574_v63, %v3380_v37  ;;  %v4659_v62 = vrot.slane %v3416_v18, 1  ;;  %v1476_v36 = vrot.slane %v1469_v4, 2 }
 0x16e   : > { %v472_v51 = vsel %vm469_vm6, %v470_v41, %v4658_v53  ;;  %v425_v29 = vadd.f32 %v421_v42, %v407_v8  ;;  %v3585_v26 = vpop.permute.xlu0 %807  ;;  %v3599_v8 = vmul.f32 %v3574_v63, %v3382_v38  ;;  %v1490_v24 = vmul.f32 %v3455_v22, %v3507_v33 }
 0x16f   : > { %v477_v12 = vadd.f32 %v472_v51, %v459_v0  ;;  %v3590_v19 = vpop.permute.xlu1 %732  ;;  %v1456_v0 = vsel %vm380_vm2, %v4659_v62, %v1455_v61  ;;  %v4660_v40 = vrot.slane %v3436_v55, 4  ;;  %v455_v53 = vrot.slane %v447_v30, 5 }
 0x170   : > { %1520 = vrot.lane.b32.xlu0 %v1517_v1, %s2654_s10  ;;  %v465_v51 = vmul.f32 %v3425_v23, %v3361_v21  ;;  %v1538_v61 = vsel %vm451_vm5, %v1536_v48, %v1537_v11  ;;  %v1557_v55 = vrot.slane %v1551_v32, 6  ;;  %v3626_v4 = vstv %s3568_s5  ;;  %s4050_s5 = sld [smem:[#allocation4 + $0x5f]] }
 0x171   : > { %v491_v41 = vadd.f32 %v3107_v50, %v477_v12  ;;  %v438_v42 = vsel %vm190_vm0, %v4660_v40, %v437_v9  ;;  %1459 = vrot.lane.b32.xlu1 %v1456_v0, %s2654_s10  ;;  %v1558_v9 = vrot.slane %v3599_v8, 6  ;;  %v4661_v21 = vrot.slane %v3449_v6, 2 }
 0x172   : > { %v442_v18 = vadd.f32 %v438_v42, %v425_v29  ;;  %v3616_v1 = vpop.permute.xlu0 %828  ;;  %v1497_v30 = vrot.slane %v1490_v24, 3  ;;  %v1511_v29 = vmul.f32 %v3503_v2, %v3507_v33  ;;  %v473_v12 = vrot.slane %v465_v51, 6 }
 0x173   : > { %v512_v22 = vadd.f32 %v3167_v34, %v491_v41  ;;  %v3622_v50 = vpop.permute.xlu1 %753  ;;  %v1477_v23 = vsel %vm398_vm3, %v4661_v21, %v1476_v36  ;;  %v4662_v34 = vrot.slane %v3460_v7, 5  ;;  %v1586_v0 = vmul.f32 %v3626_v4, %v3380_v37 }
 0x174   : > { %1541 = vrot.lane.b32.xlu0 %v1538_v61, %s2654_s10  ;;  %v3647_v2 = vmul.f32 %v3626_v4, %v3382_v38  ;;  %v1571_v24 = vstv %s3588_s6  ;;  %v3657_v41 = vstv %s3601_s7  ;;  %v4663_v40 = vrot.slane %v3494_v46, 3  ;;  %s4069_s6 = sld [smem:[#allocation4 + $0x38]] }
 0x175   : > { %v456_v48 = vsel %vm451_vm5, %v4662_v34, %v455_v53  ;;  %v533_v32 = vadd.f32 %v3177_v43, %v512_v22  ;;  %1480 = vrot.lane.b32.xlu1 %v1477_v23, %s2654_s10  ;;  %v1559_v43 = vsel %vm469_vm6, %v1557_v55, %v1558_v9  ;;  %v1518_v53 = vrot.slane %v1511_v29, 4  ;;  %s4076_s7 = sld [smem:[#allocation4 + $0x3f]] }
 0x176   : > { %v460_v6 = vadd.f32 %v456_v48, %v442_v18  ;;  %v3641_v62 = vpop.permute.xlu0 %849  ;;  %v1498_v42 = vsel %vm416_vm4, %v4663_v40, %v1497_v30  ;;  %v4664_v51 = vrot.slane %v3482_v13, 6  ;;  %v1572_v55 = vmul.f32 %v1571_v24, %v3380_v37 }
 0x177   : > { %v554_v36 = vadd.f32 %v3193_v54, %v533_v32  ;;  %v3650_v7 = vpop.permute.xlu1 %788  ;;  %v1532_v54 = vmul.f32 %v3531_v20, %v3507_v33  ;;  %v1592_v46 = vrot.slane %v1586_v0, 1  ;;  %v1593_v21 = vrot.slane %v3647_v2, 1 }
 0x178   : > { %1562 = vrot.lane.b32.xlu0 %v1559_v43, %s2654_s10  ;;  %v474_v18 = vsel %vm469_vm6, %v4664_v51, %v473_v12  ;;  %v1607_v23 = vmul.f32 %v3657_v41, %v3380_v37  ;;  %v1519_v29 = vsel %vm190_vm0, %v1516_v57, %v1518_v53  ;;  %v1553_v48 = vmul.f32 %v3574_v63, %v3507_v33 }
 0x179   : > { %v575_v61 = vadd.f32 %v3215_v3, %v554_v36  ;;  %1501 = vrot.lane.b32.xlu1 %v1498_v42, %s2654_s10  ;;  %v478_v20 = vadd.f32 %v474_v18, %v460_v6  ;;  %v3683_v3 = vmul.f32 %v3657_v41, %v3382_v38  ;;  %v1539_v34 = vrot.slane %v1532_v54, 5 }
 0x17a   : > { %v3672_v22 = vpop.permute.xlu0 %870  ;;  %v1594_v49 = vsel %vm380_vm2, %v1592_v46, %v1593_v21  ;;  %v1613_v0 = vrot.slane %v1607_v23, 2  ;;  %v3714_v43 = vstv %s3659_s11  ;;  %v1560_v42 = vrot.slane %v1553_v48, 6  ;;  %s4112_s11 = sld [smem:[#allocation4 + $0x31]] }
 0x17b   : > { %v596_v13 = vadd.f32 %v3242_v15, %v575_v61  ;;  %v3679_v30 = vpop.permute.xlu1 %809  ;;  %v3694_v15 = vstv %s3634_s9  ;;  %v492_v32 = vadd.f32 %v3153_v25, %v478_v20  ;;  %v1614_v36 = vrot.slane %v3683_v3, 2  ;;  %s4092_s9 = sld [smem:[#allocation4 + $0x46]] }
 0x17c   : > { %1576 = vrot.lane.b32.xlu0 %v1572_v55, %s2655_s12  ;;  %v1628_v63 = vmul.f32 %v3694_v15, %v3380_v37  ;;  %v1540_v40 = vsel %vm451_vm5, %v1537_v11, %v1539_v34  ;;  %v1649_v18 = vmul.f32 %v3714_v43, %v3380_v37  ;;  %v3741_v55 = vstv %s3685_s13  ;;  %s4127_s13 = sld [smem:[#allocation4 + $0x4d]] }
 0x17d   : > { %v617_v12 = vadd.f32 %v3278_v28, %v596_v13  ;;  %1522 = vrot.lane.b32.xlu1 %v1519_v29, %s2654_s10  ;;  %v3711_v28 = vmul.f32 %v3694_v15, %v3382_v38  ;;  %v513_v25 = vadd.f32 %v3223_v5, %v492_v32  ;;  %v3732_v5 = vmul.f32 %v3714_v43, %v3382_v38 }
 0x17e   : > { %v3699_v6 = vpop.permute.xlu0 %891  ;;  %v1615_v11 = vsel %vm398_vm3, %v1613_v0, %v1614_v36  ;;  %v1561_v46 = vsel %vm469_vm6, %v1558_v9, %v1560_v42  ;;  %v1588_v23 = vmul.f32 %v3626_v4, %v3507_v33  ;;  %v1573_v13 = vmul.f32 %v1571_v24, %v3382_v38 }
 0x17f   : > { %v3704_v57 = vpop.permute.xlu1 %830  ;;  %v631_v53 = vadd.f32 %v3118_v59, %v617_v12  ;;  %v534_v54 = vadd.f32 %v3249_v17, %v513_v25  ;;  %v1634_v59 = vrot.slane %v1628_v63, 3  ;;  %v1635_v45 = vrot.slane %v3711_v28, 3 }
 0x180   : > { %1597 = vrot.lane.b32.xlu0 %v1594_v49, %s2655_s12  ;;  %v1656_v48 = vrot.slane %v3732_v5, 4  ;;  %v1670_v8 = vmul.f32 %v3741_v55, %v3380_v37  ;;  %v3767_v4 = vmul.f32 %v3741_v55, %v3382_v38  ;;  %v1595_v32 = vrot.slane %v1588_v23, 1 }
 0x181   : > { %1543 = vrot.lane.b32.xlu1 %v1540_v40, %s2654_s10  ;;  %v555_v17 = vadd.f32 %v3283_v31, %v534_v54  ;;  %v652_v20 = vadd.f32 %v3317_v52, %v631_v53  ;;  %v1655_v31 = vrot.slane %v1649_v18, 4  ;;  %v1636_v52 = vsel %vm416_vm4, %v1634_v59, %v1635_v45 }
 0x182   : > { %v3726_v51 = vpop.permute.xlu0 %926  ;;  %v1677_v42 = vrot.slane %v3767_v4, 5  ;;  %v1596_v53 = vsel %vm380_vm2, %v1593_v21, %v1595_v32  ;;  %v1711_v3 = vstv %s3789_s18  ;;  %s4206_s18 = sld [smem:[#allocation4 + $0x44]] }
 0x183   : > { %v3734_v61 = vpop.permute.xlu1 %851  ;;  %v576_v29 = vadd.f32 %v3325_v56, %v555_v17  ;;  %v673_v9 = vadd.f32 %v3363_v60, %v652_v20  ;;  %v3770_v56 = vstv %s3716_s17  ;;  %v1609_v60 = vmul.f32 %v3657_v41, %v3507_v33  ;;  %s4160_s17 = sld [smem:[#allocation4 + $0x54]] }
 0x184   : > { %1618 = vrot.lane.b32.xlu0 %v1615_v11, %s2655_s12  ;;  %v1691_v25 = vmul.f32 %v3770_v56, %v3380_v37  ;;  %v4665_v11 = vld [vmem:[#allocation9_spill] sm:$0xff] }
 0x185   : > { %1564 = vrot.lane.b32.xlu1 %v1561_v46, %s2654_s10  ;;  %v597_v24 = vadd.f32 %v3372_v27, %v576_v29  ;;  %s3776_s10 = sld [smem:[#allocation4 + $0x3b]]  ;;  %v694_v49 = vadd.f32 %v3404_v10, %v673_v9  ;;  %v3787_v27 = vmul.f32 %v3770_v56, %v3382_v38  ;;  %v1657_v10 = vsel %vm190_vm0, %v1655_v31, %v1656_v48 }
 0x186   : > { %v3754_v34 = vpop.permute.xlu0 %947  ;;  %v1616_v54 = vrot.slane %v1609_v60, 2  ;;  %v1697_v46 = vrot.slane %v1691_v25, 6  ;;  %v3844_v60 = vstv %s2529_s19  ;;  %s4213_s19 = sld [smem:[#allocation4 + $0x36]] }
 0x187   : > { %v3760_v12 = vpop.permute.xlu1 %872  ;;  %v618_v0 = vadd.f32 %v3407_v39, %v597_v24  ;;  %v715_v41 = vadd.f32 %v3440_v44, %v694_v49  ;;  %v1676_v39 = vrot.slane %v1670_v8, 5  ;;  %v1630_v44 = vmul.f32 %v3694_v15, %v3507_v33  ;;  %v4668_v49 = vld [vmem:[#allocation13_spill] sm:$0xff] }
 0x188   : > { %1639 = vrot.lane.b32.xlu0 %v1636_v52, %s2655_s12  ;;  %v1698_v23 = vrot.slane %v3787_v27, 6  ;;  %v4667_v52 = vld [vmem:[#allocation7_spill] sm:$0xff]  ;;  %v3866_v28 = vmul.f32 %v3844_v60, %v3382_v38 }
 0x189   : > { %1578 = vrot.lane.b32.xlu1 %v1573_v13, %s2655_s12  ;;  %v736_v18 = vadd.f32 %v3476_v58, %v715_v41  ;;  %v632_v59 = vadd.f32 %v4665_v11, %v618_v0  ;;  %v1678_v15 = vsel %vm451_vm5, %v1676_v39, %v1677_v42  ;;  %v1617_v58 = vsel %vm398_vm3, %v1614_v36, %v1616_v54 }
 0x18a   : > { %v3781_v63 = vpop.permute.xlu0 %968  ;;  %v1637_v20 = vrot.slane %v1630_v44, 3  ;;  %v1651_v13 = vmul.f32 %v3714_v43, %v3507_v33  ;;  %v1699_v9 = vsel %vm469_vm6, %v1697_v46, %v1698_v23  ;;  %v1712_v54 = vmul.f32 %v1711_v3, %v3380_v37 }
 0x18b   : > { %v3792_v40 = vpop.permute.xlu1 %893  ;;  %v757_v2 = vadd.f32 %v3516_v16, %v736_v18  ;;  %v3825_v29 = vstv %s3776_s10  ;;  %v4666_v16 = vld [vmem:[#allocation12_spill] sm:$0xff]  ;;  %v1747_v44 = vmul.f32 %v3844_v60, %v3380_v37  ;;  %s4202_s10 = sld [smem:[#allocation4 + $0x5b]] }
 0x18c   : > { %1660 = vrot.lane.b32.xlu0 %v1657_v10, %s2655_s12  ;;  %v653_v31 = vadd.f32 %v4666_v16, %v632_v59  ;;  %v1726_v43 = vmul.f32 %v3825_v29, %v3380_v37  ;;  %v3842_v32 = vmul.f32 %v3825_v29, %v3382_v38  ;;  %v1638_v25 = vsel %vm416_vm4, %v1635_v45, %v1637_v20 }
 0x18d   : > { %1599 = vrot.lane.b32.xlu1 %v1596_v53, %s2655_s12  ;;  %v771_v36 = vadd.f32 %v4667_v52, %v757_v2  ;;  %v1658_v41 = vrot.slane %v1651_v13, 4  ;;  %v1672_v10 = vmul.f32 %v3741_v55, %v3507_v33  ;;  %v1754_v13 = vrot.slane %v3866_v28, 2 }
 0x18e   : > { %v3807_v17 = vpop.permute.xlu0 %989  ;;  %v674_v0 = vadd.f32 %v4668_v49, %v653_v31  ;;  %v1732_v55 = vrot.slane %v1726_v43, 1  ;;  %v1733_v11 = vrot.slane %v3842_v32, 1 }
 0x18f   : > { %v3811_v21 = vpop.permute.xlu1 %928  ;;  %v792_v45 = vadd.f32 %v3551_v47, %v771_v36  ;;  %v1659_v46 = vsel %vm190_vm0, %v1656_v48, %v1658_v41  ;;  %v1679_v2 = vrot.slane %v1672_v10, 5  ;;  %v1693_v47 = vmul.f32 %v3770_v56, %v3507_v33  ;;  %v4669_v41 = vld [vmem:[#allocation10_spill] sm:$0xff] }
 0x190   : > { %1681 = vrot.lane.b32.xlu0 %v1678_v15, %s2655_s12  ;;  %v695_v39 = vadd.f32 %v3521_v35, %v674_v0  ;;  %v3873_v35 = vstv %s3816_s20  ;;  %s4258_s20 = sld [smem:[#allocation4 + $0x4b]] }
 0x191   : > { %1620 = vrot.lane.b32.xlu1 %v1617_v58, %s2655_s12  ;;  %v813_v15 = vadd.f32 %v3585_v26, %v792_v45  ;;  %v1768_v5 = vmul.f32 %v3873_v35, %v3380_v37  ;;  %v1734_v26 = vsel %vm380_vm2, %v1732_v55, %v1733_v11  ;;  %v3900_v56 = vmul.f32 %v3873_v35, %v3382_v38 }
 0x192   : > { %v3829_v8 = vpop.permute.xlu0 %1010  ;;  %v716_v59 = vadd.f32 %v3559_v14, %v695_v39  ;;  %v1753_v14 = vrot.slane %v1747_v44, 2 }
 0x193   : > { %v3836_v24 = vpop.permute.xlu1 %949  ;;  %v834_v48 = vadd.f32 %v3616_v1, %v813_v15  ;;  %v1680_v1 = vsel %vm451_vm5, %v1677_v42, %v1679_v2  ;;  %v1775_v0 = vrot.slane %v3900_v56, 3  ;;  %v1830_v15 = vstv %s3910_s25  ;;  %s4362_s25 = sld [smem:[#allocation4 + $0x60]] }
 0x194   : > { %1702 = vrot.lane.b32.xlu0 %v1699_v9, %s2655_s12  ;;  %v737_v58 = vadd.f32 %v3590_v19, %v716_v59  ;;  %v3903_v19 = vstv %s3846_s22  ;;  %v1700_v9 = vrot.slane %v1693_v47, 6  ;;  %v1755_v43 = vsel %vm398_vm3, %v1753_v14, %v1754_v13  ;;  %s4301_s22 = sld [smem:[#allocation4 + $0x52]] }
 0x195   : > { %1641 = vrot.lane.b32.xlu1 %v1638_v25, %s2655_s12  ;;  %v855_v52 = vadd.f32 %v3641_v62, %v834_v48  ;;  %v1789_v49 = vmul.f32 %v3903_v19, %v3380_v37  ;;  %v3927_v62 = vmul.f32 %v3903_v19, %v3382_v38  ;;  %v1809_v25 = vstv %s3875_s23  ;;  %s4325_s23 = sld [smem:[#allocation4 + $0x59]] }
 0x196   : > { %v3857_v53 = vpop.permute.xlu0 %1031  ;;  %v758_v31 = vadd.f32 %v3622_v50, %v737_v58  ;;  %v1774_v50 = vrot.slane %v1768_v5, 3  ;;  %v1701_v39 = vsel %vm469_vm6, %v1698_v23, %v1700_v9  ;;  %v1810_v45 = vmul.f32 %v1809_v25, %v3380_v37  ;;  %v4670_v58 = vld [vmem:[#allocation8_spill] sm:$0xff] }
 0x197   : > { %v3869_v18 = vpop.permute.xlu1 %970  ;;  %v876_v4 = vadd.f32 %v3672_v22, %v855_v52  ;;  %v1728_v22 = vmul.f32 %v3825_v29, %v3507_v33  ;;  %v3943_v55 = vmul.f32 %v1809_v25, %v3382_v38  ;;  %v1713_v23 = vmul.f32 %v1711_v3, %v3382_v38 }
 0x198   : > { %1716 = vrot.lane.b32.xlu0 %v1712_v54, %s2656_s16  ;;  %v772_v10 = vadd.f32 %v4669_v41, %v758_v31  ;;  %v1776_v27 = vsel %vm416_vm4, %v1774_v50, %v1775_v0  ;;  %v1795_v29 = vrot.slane %v1789_v49, 4  ;;  %v1749_v47 = vmul.f32 %v3844_v60, %v3507_v33 }
 0x199   : > { %1662 = vrot.lane.b32.xlu1 %v1659_v46, %s2655_s12  ;;  %v897_v54 = vadd.f32 %v3699_v6, %v876_v4  ;;  %v1796_v6 = vrot.slane %v3927_v62, 4  ;;  %v1735_v2 = vrot.slane %v1728_v22, 1  ;;  %v1816_v48 = vrot.slane %v1810_v45, 5 }
 0x19a   : > { %v3887_v20 = vpop.permute.xlu0 %1045  ;;  %v793_v46 = vadd.f32 %v3650_v7, %v772_v10  ;;  %v1817_v7 = vrot.slane %v3943_v55, 5  ;;  %v1831_v31 = vmul.f32 %v1830_v15, %v3380_v37  ;;  %v1756_v52 = vrot.slane %v1749_v47, 2 }
 0x19b   : > { %v3893_v16 = vpop.permute.xlu1 %991  ;;  %v911_v14 = vadd.f32 %v4670_v58, %v897_v54  ;;  %v1797_v60 = vsel %vm190_vm0, %v1795_v29, %v1796_v6  ;;  %v1736_v9 = vsel %vm380_vm2, %v1733_v11, %v1735_v2  ;;  %v1812_v54 = vmul.f32 %v1809_v25, %v3507_v33 }
 0x19c   : > { %1737 = vrot.lane.b32.xlu0 %v1734_v26, %s2656_s16  ;;  %v814_v3 = vadd.f32 %v3679_v30, %v793_v46  ;;  %v1837_v41 = vrot.slane %v1831_v31, 6  ;;  %v1757_v10 = vsel %vm398_vm3, %v1754_v13, %v1756_v52  ;;  %v4015_v45 = vstv %s3963_s27  ;;  %s4445_s27 = sld [smem:[#allocation4 + $0x45]] }
 0x19d   : > { %1683 = vrot.lane.b32.xlu1 %v1680_v1, %s2655_s12  ;;  %v3978_v1 = vmul.f32 %v1830_v15, %v3382_v38  ;;  %v932_v50 = vadd.f32 %v3726_v51, %v911_v14  ;;  %v1851_v13 = vstv %s3969_s28  ;;  %v4034_v29 = vstv %s3980_s29  ;;  %s4469_s28 = sld [smem:[#allocation4 + $0x4c]] }
 0x19e   : > { %v3914_v36 = vpop.permute.xlu0 %1066  ;;  %v835_v30 = vadd.f32 %v3704_v57, %v814_v3  ;;  %v1818_v57 = vsel %vm451_vm5, %v1816_v48, %v1817_v7  ;;  %v4044_v2 = vmul.f32 %v4015_v45, %v3382_v38  ;;  %v1852_v58 = vmul.f32 %v1851_v13, %v3380_v37  ;;  %s4503_s29 = sld [smem:[#allocation4 + $0x53]] }
 0x19f   : > { %v3922_v42 = vpop.permute.xlu1 %1012  ;;  %v953_v32 = vadd.f32 %v3754_v34, %v932_v50  ;;  %v1791_v34 = vmul.f32 %v3903_v19, %v3507_v33  ;;  %v1819_v14 = vrot.slane %v1812_v54, 5  ;;  %v1833_v56 = vmul.f32 %v1830_v15, %v3507_v33 }
 0x1a0   : > { %1758 = vrot.lane.b32.xlu0 %v1755_v43, %s2656_s16  ;;  %v1770_v43 = vmul.f32 %v3873_v35, %v3507_v33  ;;  %v856_v49 = vadd.f32 %v3734_v61, %v835_v30  ;;  %v1838_v35 = vrot.slane %v3978_v1, 6  ;;  %v1908_v31 = vmul.f32 %v4034_v29, %v3380_v37 }
 0x1a1   : > { %1704 = vrot.lane.b32.xlu1 %v1701_v39, %s2655_s12  ;;  %s3954_s12 = sld [smem:[#allocation4 + $0x3c]]  ;;  %v974_v22 = vadd.f32 %v3781_v63, %v953_v32  ;;  %v1798_v46 = vrot.slane %v1791_v34, 4  ;;  %v4066_v52 = vstv %s4002_s30  ;;  %v1820_v32 = vsel %vm451_vm5, %v1817_v7, %v1819_v14 }
 0x1a2   : > { %v3939_v44 = vpop.permute.xlu0 %1087  ;;  %v877_v61 = vadd.f32 %v3760_v12, %v856_v49  ;;  %v1777_v39 = vrot.slane %v1770_v43, 3  ;;  %v1839_v63 = vsel %vm469_vm6, %v1837_v41, %v1838_v35  ;;  %v1840_v41 = vrot.slane %v1833_v56, 6  ;;  %s4518_s30 = sld [smem:[#allocation4 + $0x5a]] }
 0x1a3   : > { %v3945_v59 = vpop.permute.xlu1 %1033  ;;  %v1799_v50 = vsel %vm190_vm0, %v1796_v6, %v1798_v46  ;;  %v1914_v6 = vrot.slane %v1908_v31, 3  ;;  %v4142_v14 = vstv %s4069_s6  ;;  %v4150_v56 = vstv %s4076_s7  ;;  %s2662_s6 = smov 48   ;;  %s2663_s7 = smov 64  }
 0x1a4   : > { %1779 = vrot.lane.b32.xlu0 %v1776_v27, %s2656_s16  ;;  %v898_v12 = vadd.f32 %v3792_v40, %v877_v61  ;;  %v1778_v40 = vsel %vm416_vm4, %v1775_v0, %v1777_v39  ;;  %v4671_v0 = vld [vmem:[#allocation11_spill] sm:$0xff]  ;;  %v1929_v39 = vmul.f32 %v4066_v52, %v3380_v37 }
 0x1a5   : > { %1718 = vrot.lane.b32.xlu1 %v1713_v23, %s2656_s16  ;;  %v995_v23 = vadd.f32 %v3807_v17, %v974_v22  ;;  %v1887_v17 = vmul.f32 %v4015_v45, %v3380_v37 }
 0x1a6   : > { %v3966_v5 = vpop.permute.xlu0 %1108  ;;  %v912_v3 = vadd.f32 %v4671_v0, %v898_v12  ;;  %v1853_v12 = vmul.f32 %v1851_v13, %v3382_v38  ;;  %v4125_v13 = vstv %s4050_s5  ;;  %v1935_v46 = vrot.slane %v1929_v39, 4  ;;  %s2661_s5 = smov 32  }
 0x1a7   : > { %v3971_v26 = vpop.permute.xlu1 %1047  ;;  %v1865_v51 = vstv %s3954_s12  ;;  %v1016_v47 = vadd.f32 %v3829_v8, %v995_v23  ;;  %v4059_v8 = vmul.f32 %v4034_v29, %v3382_v38  ;;  %v1893_v49 = vrot.slane %v1887_v17, 2  ;;  %s4431_s12 = sld [smem:[#allocation4 + $0x37]] }
 0x1a8   : > { %1800 = vrot.lane.b32.xlu0 %v1797_v60, %s2656_s16  ;;  %v1866_v27 = vmul.f32 %v1865_v51, %v3380_v37  ;;  %v4031_v25 = vmul.f32 %v1865_v51, %v3382_v38  ;;  %v1868_v43 = vmul.f32 %v1865_v51, %v3507_v33  ;;  %v4084_v51 = vstv %s4017_s4  ;;  %s4547_s4 = sld [smem:[#allocation4 + $0x61]] }
 0x1a9   : > { %1739 = vrot.lane.b32.xlu1 %v1736_v9, %s2656_s16  ;;  %v1037_v30 = vadd.f32 %v3857_v53, %v1016_v47  ;;  %v933_v62 = vadd.f32 %v3811_v21, %v912_v3  ;;  %v4100_v21 = vmul.f32 %v4066_v52, %v3382_v38  ;;  %v4122_v23 = vmul.f32 %v4015_v45, %v3507_v33 }
 0x1aa   : > { %v3992_v4 = vpop.permute.xlu0 %1129  ;;  %v1872_v60 = vrot.slane %v1866_v27, 1  ;;  %v1873_v15 = vrot.slane %v4031_v25, 1  ;;  %v1875_v34 = vrot.slane %v1868_v43, 1  ;;  %v4200_v39 = vstv %s4127_s13  ;;  %s2666_s13 = smov 112  }
 0x1ab   : > { %v3998_v11 = vpop.permute.xlu1 %1068  ;;  %v1051_v53 = vadd.f32 %v3887_v20, %v1037_v30  ;;  %v954_v22 = vadd.f32 %v3836_v24, %v933_v62  ;;  %v4118_v24 = vmul.f32 %v4084_v51, %v3382_v38  ;;  %v1936_v47 = vrot.slane %v4100_v21, 4 }
 0x1ac   : > { %1821 = vrot.lane.b32.xlu0 %v1818_v57, %s2656_s16  ;;  %v1894_v57 = vrot.slane %v4044_v2, 2  ;;  %v1874_v7 = vsel %vm380_vm2, %v1872_v60, %v1873_v15  ;;  %v1896_v3 = vrot.slane %v4122_v23, 2  ;;  %v1910_v30 = vmul.f32 %v4034_v29, %v3507_v33 }
 0x1ad   : > { %1760 = vrot.lane.b32.xlu1 %v1757_v10, %s2656_s16  ;;  %v1915_v10 = vrot.slane %v4059_v8, 3  ;;  %v1072_v20 = vadd.f32 %v3914_v36, %v1051_v53  ;;  %v4110_v36 = vmul.f32 %v4084_v51, %v3380_v37  ;;  %v1957_v0 = vrot.slane %v4118_v24, 5 }
 0x1ae   : > { %v4020_v28 = vpop.permute.xlu0 %1150  ;;  %v1895_v54 = vsel %vm398_vm3, %v1893_v49, %v1894_v57  ;;  %v4175_v49 = vmul.f32 %v4142_v14, %v3382_v38  ;;  %v4181_v29 = vmul.f32 %v4150_v56, %v3382_v38 }
 0x1af   : > { %v4025_v19 = vpop.permute.xlu1 %1089  ;;  %v1093_v27 = vadd.f32 %v3939_v44, %v1072_v20  ;;  %v1841_v44 = vsel %vm469_vm6, %v1838_v35, %v1840_v41  ;;  %v1956_v1 = vrot.slane %v4110_v36, 5  ;;  %v1971_v35 = vmul.f32 %v4125_v13, %v3380_v37 }
 0x1b0   : > { %1842 = vrot.lane.b32.xlu0 %v1839_v63, %s2656_s16  ;;  %v975_v63 = vadd.f32 %v3869_v18, %v954_v22  ;;  %v1323_v41 = vstv %s4112_s11  ;;  %v1917_v22 = vrot.slane %v1910_v30, 3  ;;  %v1337_v36 = vrot.slane %v4175_v49, 1  ;;  %s2665_s11 = smov 96  }
 0x1b1   : > { %1781 = vrot.lane.b32.xlu1 %v1778_v40, %s2656_s16  ;;  %v1916_v40 = vsel %vm416_vm4, %v1914_v6, %v1915_v10  ;;  %v1114_v45 = vadd.f32 %v3966_v5, %v1093_v27  ;;  %v1354_v23 = vrot.slane %v4181_v29, 2 }
 0x1b2   : > { %v4053_v48 = vpop.permute.xlu0 %1171  ;;  %v996_v18 = vadd.f32 %v3893_v16, %v975_v63  ;;  %v4158_v16 = vmul.f32 %v4125_v13, %v3382_v38  ;;  %v1958_v63 = vsel %vm451_vm5, %v1956_v1, %v1957_v0 }
 0x1b3   : > { %v4062_v9 = vpop.permute.xlu1 %1110  ;;  %v1135_v5 = vadd.f32 %v3992_v4, %v1114_v45  ;;  %v1330_v4 = vmul.f32 %v4142_v14, %v3380_v37  ;;  %v4231_v45 = vstv %s4160_s17 }
 0x1b4   : > { %1856 = vrot.lane.b32.xlu0 %v1852_v58, %s2657_s2  ;;  %v1876_v58 = vsel %vm380_vm2, %v1873_v15, %v1875_v34  ;;  %v1017_v60 = vadd.f32 %v3922_v42, %v996_v18  ;;  %v4168_v15 = vstv %s4092_s9  ;;  %v1347_v42 = vmul.f32 %v4150_v56, %v3380_v37  ;;  %s2664_s9 = smov 80  }
 0x1b5   : > { %1802 = vrot.lane.b32.xlu1 %v1799_v50, %s2656_s16  ;;  %v1156_v43 = vadd.f32 %v4020_v28, %v1135_v5  ;;  %v1937_v28 = vsel %vm190_vm0, %v1935_v46, %v1936_v47  ;;  %v1364_v6 = vmul.f32 %v4168_v15, %v3380_v37  ;;  %v1978_v34 = vrot.slane %v4158_v16, 6 }
 0x1b6   : > { %v4087_v61 = vpop.permute.xlu0 %1185  ;;  %v1038_v53 = vadd.f32 %v3945_v59, %v1017_v60  ;;  %v4197_v59 = vmul.f32 %v4168_v15, %v3382_v38  ;;  %v1353_v27 = vrot.slane %v1347_v42, 2 }
 0x1b7   : > { %v4095_v55 = vpop.permute.xlu1 %1131  ;;  %v1177_v62 = vadd.f32 %v4053_v48, %v1156_v43  ;;  %v1336_v48 = vrot.slane %v1330_v4, 1  ;;  %v1370_v46 = vrot.slane %v1364_v6, 3 }
 0x1b8   : > { %1877 = vrot.lane.b32.xlu0 %v1874_v7, %s2657_s2  ;;  %v1052_v20 = vadd.f32 %v3971_v26, %v1038_v53  ;;  %v4278_v53 = vld [vmem:[#allocation2 + $0x20] sm:$0xff] }
 0x1b9   : > { %1823 = vrot.lane.b32.xlu1 %v1820_v32, %s2656_s16  ;;  %v1977_v32 = vrot.slane %v1971_v35, 6  ;;  %v4251_v2 = vsel %vm380_vm2, %v1336_v48, %v1337_v36 }
 0x1ba   : > { %v1207_v25 = vpop.permute.xlu0 %1206  ;;  %v1073_v26 = vadd.f32 %v3998_v11, %v1052_v20  ;;  %v1371_v11 = vrot.slane %v4197_v59, 3  ;;  %v1991_v20 = vstv %s4213_s19 }
 0x1bb   : > { %v4137_v17 = vpop.permute.xlu1 %1152  ;;  %v1993_v16 = vmul.f32 %v4278_v53, %v1991_v20 }
 0x1bc   : > { %1898 = vrot.lane.b32.xlu0 %v1895_v54, %s2657_s2  ;;  %v1191_v54 = vadd.f32 %v4087_v61, %v1177_v62  ;;  %v4222_v61 = vmul.f32 %v4200_v39, %v3380_v37  ;;  %v1094_v18 = vadd.f32 %v4025_v19, %v1073_v26  ;;  %v1897_v37 = vsel %vm398_vm3, %v1894_v57, %v1896_v3 }
 0x1bd   : > { %1844 = vrot.lane.b32.xlu1 %v1841_v44, %s2656_s16  ;;  %s4189_s16 = sld [smem:[#allocation4 + $0x3d]]  ;;  %v4226_v44 = vmul.f32 %v4200_v39, %v3382_v38  ;;  %v1979_v38 = vsel %vm469_vm6, %v1977_v32, %v1978_v34  ;;  %v1918_v19 = vsel %vm416_vm4, %v1915_v10, %v1917_v22  ;;  %v4256_v57 = vsel %vm398_vm3, %v1353_v27, %v1354_v23 }
 0x1be   : > { %v1228_v31 = vpop.permute.xlu0 %1227  ;;  %v1115_v3 = vadd.f32 %v4062_v9, %v1094_v18  ;;  %v1931_v10 = vmul.f32 %v4066_v52, %v3507_v33  ;;  %v4273_v30 = vsel %vm416_vm4, %v1370_v46, %v1371_v11  ;;  %v1387_v9 = vrot.slane %v4222_v61, 4 }
 0x1bf   : > { %v4171_v50 = vpop.permute.xlu1 %1173  ;;  %v1388_v4 = vrot.slane %v4226_v44, 4  ;;  %v4282_v52 = vmul.f32 %v4278_v53, %v4231_v45  ;;  %v4288_v32 = vstv %s4206_s18  ;;  %v1952_v27 = vmul.f32 %v4084_v51, %v3507_v33 }
 0x1c0   : > { %1919 = vrot.lane.b32.xlu0 %v1916_v40, %s2657_s2  ;;  %v1212_v40 = vadd.f32 %v1207_v25, %v1191_v54  ;;  %v4240_v25 = vld [vmem:[#allocation2 + $0x18] sm:$0xff]  ;;  %v1136_v43 = vadd.f32 %v4095_v55, %v1115_v3  ;;  %v1938_v54 = vrot.slane %v1931_v10, 4  ;;  %v4323_v3 = vstv %s4258_s20 }
 0x1c1   : > { %1858 = vrot.lane.b32.xlu1 %v1853_v12, %s2657_s2  ;;  %v1398_v8 = vmul.f32 %v4240_v25, %v4231_v45  ;;  %v1405_v51 = vrot.slane %v4282_v52, 5  ;;  %v1992_v18 = vmul.f32 %v4240_v25, %v1991_v20  ;;  %v1959_v10 = vrot.slane %v1952_v27, 5 }
 0x1c2   : > { %v1249_v7 = vpop.permute.xlu0 %1248  ;;  %v1233_v35 = vadd.f32 %v1228_v31, %v1212_v40  ;;  %v1157_v22 = vadd.f32 %v4137_v17, %v1136_v43  ;;  %v2027_v17 = vmul.f32 %v4240_v25, %v4288_v32  ;;  %v2048_v21 = vmul.f32 %v4240_v25, %v4323_v3 }
 0x1c3   : > { %v4209_v12 = vpop.permute.xlu1 %1187  ;;  %v4267_v60 = vstv %s4189_s16  ;;  %v1404_v48 = vrot.slane %v1398_v8, 5  ;;  %v1939_v8 = vsel %vm190_vm0, %v1936_v47, %v1938_v54  ;;  %v4343_v47 = vmul.f32 %v4278_v53, %v4323_v3 }
 0x1c4   : > { %1940 = vrot.lane.b32.xlu0 %v1937_v28, %s2657_s2  ;;  %v1254_v31 = vadd.f32 %v1249_v7, %v1233_v35  ;;  %v4285_v28 = vstv %s4202_s10  ;;  %v2006_v7 = vmul.f32 %v4240_v25, %v4267_v60  ;;  %v4295_v55 = vmul.f32 %v4278_v53, %v4267_v60  ;;  %s185_s10 = scalar_lea.vmem %s4628_s3, %s2559_s21 }
 0x1c5   : > { %1879 = vrot.lane.b32.xlu1 %v1876_v58, %s2657_s2  ;;  %v1324_v58 = vmul.f32 %v4240_v25, %v1323_v41  ;;  %v4308_v61 = vmul.f32 %v4278_v53, %v4285_v28  ;;  %v1178_v40 = vadd.f32 %v4171_v50, %v1157_v22 }
 0x1c6   : > { %v1270_v1 = vpop.permute.xlu0 %1269  ;;  %v2012_v35 = vrot.slane %v2006_v7, 1  ;;  %v2033_v7 = vrot.slane %v2027_v17, 2 }
 0x1c7   : > { %v1209_v5 = vpop.permute.xlu1 %1208  ;;  %v1275_v62 = vadd.f32 %v1270_v1, %v1254_v31  ;;  %v4319_v1 = vmul.f32 %v4278_v53, %v4288_v32  ;;  %v1192_v50 = vadd.f32 %v4209_v12, %v1178_v40  ;;  %v1973_v31 = vmul.f32 %v4125_v13, %v3507_v33 }
 0x1c8   : > { %1961 = vrot.lane.b32.xlu0 %v1958_v63, %s2657_s2  ;;  %v1415_v63 = vmul.f32 %v4240_v25, %v4285_v28  ;;  %v1389_v33 = vsel %vm190_vm0, %v1387_v9, %v1388_v4  ;;  %v1406_v13 = vsel %vm451_vm5, %v1404_v48, %v1405_v51  ;;  %v4360_v9 = vstv %s4301_s22 }
 0x1c9   : > { %1900 = vrot.lane.b32.xlu1 %v1897_v37, %s2657_s2  ;;  %v1213_v22 = vadd.f32 %v1209_v5, %v1192_v50  ;;  %v1980_v17 = vrot.slane %v1973_v31, 6 }
 0x1ca   : > { %v1291_v42 = vpop.permute.xlu0 %1290  ;;  %v1421_v43 = vrot.slane %v1415_v63, 6  ;;  %v1960_v63 = vsel %vm451_vm5, %v1957_v0, %v1959_v10 }
 0x1cb   : > { %v1230_v6 = vpop.permute.xlu1 %1229  ;;  %v1296_v26 = vadd.f32 %v1291_v42, %v1275_v62  ;;  %v1422_v42 = vrot.slane %v4308_v61, 6  ;;  %v1981_v10 = vsel %vm469_vm6, %v1978_v34, %v1980_v17  ;;  %v4420_v17 = vstv %s4362_s25 }
 0x1cc   : > { %1982 = vrot.lane.b32.xlu0 %v1979_v38, %s2657_s2  ;;  %v1234_v27 = vadd.f32 %v1230_v6, %v1213_v22  ;;  %v4369_v6 = vld [vmem:[#allocation2 + $0x28] sm:$0x3f] }
 0x1cd   : > { %1921 = vrot.lane.b32.xlu1 %v1918_v19, %s2657_s2  ;;  %v2013_v19 = vrot.slane %v4295_v55, 1  ;;  %v1332_v24 = vmul.f32 %v4369_v6, %v4142_v14  ;;  %v1349_v0 = vmul.f32 %v4369_v6, %v4150_v56  ;;  %v4384_v14 = vmul.f32 %v4278_v53, %v4360_v9 }
 0x1ce   : > { %v1312_v46 = vpop.permute.xlu0 %1311  ;;  %v4387_v56 = vstv %s4325_s23  ;;  %v2008_v31 = vmul.f32 %v4369_v6, %v4267_v60  ;;  %v1366_v22 = vmul.f32 %v4369_v6, %v4168_v15 }
 0x1cf   : > { %v1317_v37 = vadd.f32 %v1312_v46, %v1296_v26  ;;  %v1251_v38 = vpop.permute.xlu1 %1250  ;;  %v2034_v26 = vrot.slane %v4319_v1, 2  ;;  %v2014_v54 = vsel %vm380_vm2, %v2012_v35, %v2013_v19  ;;  %v4408_v34 = vmul.f32 %v4278_v53, %v4387_v56 }
 0x1d0   : > { %1996 = vrot.lane.b32.xlu0 %v1992_v18, %s2658_s26  ;;  %v1255_v40 = vadd.f32 %v1251_v38, %v1234_v27  ;;  %v2015_v20 = vrot.slane %v2008_v31, 1 }
 0x1d1   : > { %v1326_v62 = vadd.f32 %v1324_v58, %v1317_v37  ;;  %1942 = vrot.lane.b32.xlu1 %v1939_v8, %s2657_s2  ;;  %v2035_v18 = vsel %vm398_vm3, %v2033_v7, %v2034_v26  ;;  %v2054_v37 = vrot.slane %v2048_v21, 3  ;;  %v2069_v8 = vmul.f32 %v4240_v25, %v4360_v9 }
 0x1d2   : > { %v4336_v12 = vpop.permute.xlu0 %1436  ;;  %v1356_v7 = vrot.slane %v1349_v0, 2  ;;  %v1383_v0 = vmul.f32 %v4369_v6, %v4200_v39 }
 0x1d3   : > { %v1343_v58 = vadd.f32 %v4251_v2, %v1326_v62  ;;  %v1272_v5 = vpop.permute.xlu1 %1271  ;;  %v1423_v2 = vsel %vm469_vm6, %v1421_v43, %v1422_v42  ;;  %v1339_v62 = vrot.slane %v1332_v24, 1  ;;  %v2075_v15 = vrot.slane %v2069_v8, 4 }
 0x1d4   : > { %2017 = vrot.lane.b32.xlu0 %v2014_v54, %s2658_s26  ;;  %v1276_v38 = vadd.f32 %v1272_v5, %v1255_v40  ;;  %v2076_v54 = vrot.slane %v4384_v14, 4  ;;  %v1373_v24 = vrot.slane %v1366_v22, 3  ;;  %v1390_v31 = vrot.slane %v1383_v0, 4 }
 0x1d5   : > { %v1360_v48 = vadd.f32 %v4256_v57, %v1343_v58  ;;  %1963 = vrot.lane.b32.xlu1 %v1960_v63, %s2657_s2  ;;  %v2055_v57 = vrot.slane %v4343_v47, 3  ;;  %v2029_v63 = vmul.f32 %v4369_v6, %v4288_v32  ;;  %v2097_v32 = vrot.slane %v4408_v34, 5 }
 0x1d6   : > { %v1458_v46 = vpop.permute.xlu0 %1457  ;;  %v2077_v39 = vsel %vm190_vm0, %v2075_v15, %v2076_v54  ;;  %v1374_v55 = vsel %vm416_vm4, %v1371_v11, %v1373_v24 }
 0x1d7   : > { %v1377_v35 = vadd.f32 %v4273_v30, %v1360_v48  ;;  %v1293_v50 = vpop.permute.xlu1 %1292  ;;  %v1325_v30 = vmul.f32 %v4278_v53, %v1323_v41  ;;  %v2090_v41 = vmul.f32 %v4240_v25, %v4387_v56  ;;  %v2056_v5 = vsel %vm416_vm4, %v2054_v37, %v2055_v57 }
 0x1d8   : > { %2038 = vrot.lane.b32.xlu0 %v2035_v18, %s2658_s26  ;;  %v1297_v21 = vadd.f32 %v1293_v50, %v1276_v38  ;;  %v1340_v48 = vsel %vm380_vm2, %v1337_v36, %v1339_v62  ;;  %v1400_v18 = vmul.f32 %v4369_v6, %v4231_v45  ;;  %v2111_v36 = vmul.f32 %v4240_v25, %v4420_v17 }
 0x1d9   : > { %v1394_v43 = vadd.f32 %v1389_v33, %v1377_v35  ;;  %1984 = vrot.lane.b32.xlu1 %v1981_v10, %s2657_s2  ;;  %s4414_s2 = sld [smem:[#allocation4 + $0x3e]]  ;;  %v2096_v35 = vrot.slane %v2090_v41, 5  ;;  %v4443_v45 = vmul.f32 %v4278_v53, %v4420_v17  ;;  %v2036_v8 = vrot.slane %v2029_v63, 2 }
 0x1da   : > { %v1479_v58 = vpop.permute.xlu0 %1478  ;;  %v2050_v38 = vmul.f32 %v4369_v6, %v4323_v3 }
 0x1db   : > { %v1411_v60 = vadd.f32 %v1406_v13, %v1394_v43  ;;  %v1314_v33 = vpop.permute.xlu1 %1313  ;;  %v1417_v43 = vmul.f32 %v4369_v6, %v4285_v28  ;;  %v2098_v3 = vsel %vm451_vm5, %v2096_v35, %v2097_v32  ;;  %v2037_v59 = vsel %vm398_vm3, %v2034_v26, %v2036_v8 }
 0x1dc   : > { %v1318_v27 = vadd.f32 %v1314_v33, %v1297_v21  ;;  %2059 = vrot.lane.b32.xlu0 %v2056_v5, %s2658_s26  ;;  %v2057_v11 = vrot.slane %v2050_v38, 3  ;;  %v2131_v26 = vstv %s4431_s12  ;;  %v4522_v35 = vstv %s4469_s28 }
 0x1dd   : > { %v1428_v13 = vadd.f32 %v1423_v2, %v1411_v60  ;;  %1998 = vrot.lane.b32.xlu1 %v1993_v16, %s2658_s26  ;;  %v1391_v16 = vsel %vm190_vm0, %v1388_v4, %v1390_v31  ;;  %v1424_v41 = vrot.slane %v1417_v43, 6  ;;  %v2132_v47 = vmul.f32 %v4240_v25, %v2131_v26 }
 0x1de   : > { %v1327_v40 = vadd.f32 %v1325_v30, %v1318_v27  ;;  %v1500_v37 = vpop.permute.xlu0 %1499  ;;  %v1357_v30 = vsel %vm398_vm3, %v1354_v23, %v1356_v7  ;;  %v2117_v23 = vrot.slane %v2111_v36, 6  ;;  %v2118_v7 = vrot.slane %v4443_v45, 6 }
 0x1df   : > { %v1442_v49 = vadd.f32 %v4336_v12, %v1428_v13  ;;  %v4434_v2 = vpop.permute.xlu1 %1438  ;;  %v2016_v12 = vsel %vm380_vm2, %v2013_v19, %v2015_v20  ;;  %v1407_v19 = vrot.slane %v1400_v18, 5  ;;  %v4467_v28 = vstv %s4414_s2 }
 0x1e0   : > { %v1344_v50 = vadd.f32 %v1340_v48, %v1327_v40  ;;  %2080 = vrot.lane.b32.xlu0 %v2077_v39, %s2658_s26  ;;  %v2146_v15 = vmul.f32 %v4240_v25, %v4467_v28  ;;  %v2119_v44 = vsel %vm469_vm6, %v2117_v23, %v2118_v7  ;;  %v4492_v4 = vmul.f32 %v4278_v53, %v4467_v28 }
 0x1e1   : > { %v1463_v10 = vadd.f32 %v1458_v46, %v1442_v49  ;;  %2019 = vrot.lane.b32.xlu1 %v2016_v12, %s2658_s26  ;;  %v1408_v1 = vsel %vm451_vm5, %v1405_v51, %v1407_v19  ;;  %v4495_v20 = vstv %s4445_s27  ;;  %v2058_v51 = vsel %vm416_vm4, %v2055_v57, %v2057_v11 }
 0x1e2   : > { %v1361_v62 = vadd.f32 %v1357_v30, %v1344_v50  ;;  %v1521_v22 = vpop.permute.xlu0 %1520  ;;  %v2092_v13 = vmul.f32 %v4369_v6, %v4387_v56  ;;  %v1425_v48 = vsel %vm469_vm6, %v1422_v42, %v1424_v41  ;;  %v2167_v57 = vmul.f32 %v4240_v25, %v4495_v20 }
 0x1e3   : > { %v1484_v29 = vadd.f32 %v1479_v58, %v1463_v10  ;;  %v1460_v46 = vpop.permute.xlu1 %1459  ;;  %v2071_v58 = vmul.f32 %v4369_v6, %v4360_v9  ;;  %v4516_v56 = vmul.f32 %v4278_v53, %v4495_v20  ;;  %v2152_v42 = vrot.slane %v2146_v15, 1 }
 0x1e4   : > { %v1378_v21 = vadd.f32 %v1374_v55, %v1361_v62  ;;  %2101 = vrot.lane.b32.xlu0 %v2098_v3, %s2658_s26  ;;  %v2099_v36 = vrot.slane %v2092_v13, 5  ;;  %v2113_v50 = vmul.f32 %v4369_v6, %v4420_v17  ;;  %v2173_v38 = vrot.slane %v2167_v57, 2 }
 0x1e5   : > { %v1505_v60 = vadd.f32 %v1500_v37, %v1484_v29  ;;  %2040 = vrot.lane.b32.xlu1 %v2037_v59, %s2658_s26  ;;  %v2078_v63 = vrot.slane %v2071_v58, 4  ;;  %v2153_v37 = vrot.slane %v4492_v4, 1  ;;  %v2174_v10 = vrot.slane %v4516_v56, 2 }
 0x1e6   : > { %v1395_v33 = vadd.f32 %v1391_v16, %v1378_v21  ;;  %v1542_v5 = vpop.permute.xlu0 %1541  ;;  %v4540_v17 = vmul.f32 %v4278_v53, %v4522_v35  ;;  %v2100_v43 = vsel %vm451_vm5, %v2097_v32, %v2099_v36  ;;  %v2120_v62 = vrot.slane %v2113_v50, 6 }
 0x1e7   : > { %v1526_v27 = vadd.f32 %v1521_v22, %v1505_v60  ;;  %v1481_v9 = vpop.permute.xlu1 %1480  ;;  %v2079_v39 = vsel %vm190_vm0, %v2076_v54, %v2078_v63  ;;  %v2154_v54 = vsel %vm380_vm2, %v2152_v42, %v2153_v37  ;;  %v2208_v55 = vstv %s4503_s29 }
 0x1e8   : > { %v1412_v52 = vadd.f32 %v1408_v1, %v1395_v33  ;;  %2122 = vrot.lane.b32.xlu0 %v2119_v44, %s2658_s26  ;;  %v2175_v3 = vsel %vm398_vm3, %v2173_v38, %v2174_v10  ;;  %v2195_v34 = vrot.slane %v4540_v17, 3  ;;  %v2209_v32 = vmul.f32 %v4240_v25, %v2208_v55 }
 0x1e9   : > { %v1547_v24 = vadd.f32 %v1542_v5, %v1526_v27  ;;  %2061 = vrot.lane.b32.xlu1 %v2058_v51, %s2658_s26  ;;  %v2210_v59 = vmul.f32 %v4278_v53, %v2208_v55  ;;  %v2121_v58 = vsel %vm469_vm6, %v2118_v7, %v2120_v62  ;;  %v2148_v16 = vmul.f32 %v4369_v6, %v4467_v28 }
 0x1ea   : > { %v1429_v0 = vadd.f32 %v1425_v48, %v1412_v52  ;;  %v1563_v40 = vpop.permute.xlu0 %1562  ;;  %v2133_v33 = vmul.f32 %v4278_v53, %v2131_v26  ;;  %v2215_v27 = vrot.slane %v2209_v32, 4  ;;  %v2169_v52 = vmul.f32 %v4369_v6, %v4495_v20 }
 0x1eb   : > { %v1568_v61 = vadd.f32 %v1563_v40, %v1547_v24  ;;  %v1502_v18 = vpop.permute.xlu1 %1501  ;;  %v2155_v44 = vrot.slane %v2148_v16, 1  ;;  %v2250_v51 = vstv %s4547_s4  ;;  %v2211_v36 = vmul.f32 %v4369_v6, %v2208_v55 }
 0x1ec   : > { %v1443_v49 = vadd.f32 %v4434_v2, %v1429_v0  ;;  %2136 = vrot.lane.b32.xlu0 %v2132_v47, %s2659_s8  ;;  %v2188_v2 = vmul.f32 %v4240_v25, %v4522_v35  ;;  %v2251_v0 = vmul.f32 %v4240_v25, %v2250_v51  ;;  %v2252_v40 = vmul.f32 %v4278_v53, %v2250_v51 }
 0x1ed   : > { %2082 = vrot.lane.b32.xlu1 %v2079_v39, %s2658_s26  ;;  %v2156_v20 = vsel %vm380_vm2, %v2153_v37, %v2155_v44  ;;  %v2176_v57 = vrot.slane %v2169_v52, 2  ;;  %v2253_v17 = vmul.f32 %v4369_v6, %v2250_v51 }
 0x1ee   : > { %v1464_v12 = vadd.f32 %v1460_v46, %v1443_v49  ;;  %v1577_v8 = vpop.permute.xlu0 %1576  ;;  %v2194_v29 = vrot.slane %v2188_v2, 3  ;;  %v2229_v46 = vstv %s4518_s30  ;;  %v2258_v39 = vrot.slane %v2252_v40, 6 }
 0x1ef   : > { %v1582_v30 = vadd.f32 %v1577_v8, %v1568_v61  ;;  %v1523_v14 = vpop.permute.xlu1 %1522  ;;  %v2230_v1 = vmul.f32 %v4240_v25, %v2229_v46  ;;  %v2231_v5 = vmul.f32 %v4278_v53, %v2229_v46  ;;  %v2190_v61 = vmul.f32 %v4369_v6, %v4522_v35 }
 0x1f0   : > { %v1485_v31 = vadd.f32 %v1481_v9, %v1464_v12  ;;  %2157 = vrot.lane.b32.xlu0 %v2154_v54, %s2659_s8  ;;  %v2196_v7 = vsel %vm416_vm4, %v2194_v29, %v2195_v34  ;;  %v2216_v9 = vrot.slane %v2210_v59, 4  ;;  %v2257_v25 = vrot.slane %v2251_v0, 6 }
 0x1f1   : > { %2103 = vrot.lane.b32.xlu1 %v2100_v43, %s2658_s26  ;;  %v2236_v63 = vrot.slane %v2230_v1, 5  ;;  %v2237_v24 = vrot.slane %v2231_v5, 5  ;;  %v2177_v4 = vsel %vm398_vm3, %v2174_v10, %v2176_v57  ;;  %v2197_v37 = vrot.slane %v2190_v61, 3 }
 0x1f2   : > { %v1506_v19 = vadd.f32 %v1502_v18, %v1485_v31  ;;  %v1598_v22 = vpop.permute.xlu0 %1597  ;;  %v2217_v48 = vsel %vm190_vm0, %v2215_v27, %v2216_v9  ;;  %v2259_v12 = vsel %vm469_vm6, %v2257_v25, %v2258_v39  ;;  %v2218_v2 = vrot.slane %v2211_v36, 4 }
 0x1f3   : > { %v1603_v23 = vadd.f32 %v1598_v22, %v1582_v30  ;;  %v1544_v21 = vpop.permute.xlu1 %1543  ;;  %v2238_v49 = vsel %vm451_vm5, %v2236_v63, %v2237_v24  ;;  %v2198_v38 = vsel %vm416_vm4, %v2195_v34, %v2197_v37  ;;  %v2232_v30 = vmul.f32 %v4369_v6, %v2229_v46 }
 0x1f4   : > { %v1527_v11 = vadd.f32 %v1523_v14, %v1506_v19  ;;  %2178 = vrot.lane.b32.xlu0 %v2175_v3, %s2659_s8  ;;  %v2219_v14 = vsel %vm190_vm0, %v2216_v9, %v2218_v2  ;;  %v2260_v55 = vrot.slane %v2253_v17, 6 }
 0x1f5   : > { %2124 = vrot.lane.b32.xlu1 %v2121_v58, %s2658_s26  ;;  %v2239_v54 = vrot.slane %v2232_v30, 5  ;;  %s2270_s26 = sld [smem:[#allocation3]] }
 0x1f6   : > { %v1548_v41 = vadd.f32 %v1544_v21, %v1527_v11  ;;  %v1619_v60 = vpop.permute.xlu0 %1618  ;;  %v2261_v3 = vsel %vm469_vm6, %v2258_v39, %v2260_v55 }
 0x1f7   : > { %v4569_v15 = vadd.f32 %v1619_v60, %v1603_v23  ;;  %v1565_v45 = vpop.permute.xlu1 %1564  ;;  %v2240_v62 = vsel %vm451_vm5, %v2237_v24, %v2239_v54 }
 0x1f8   : > { %v1569_v28 = vadd.f32 %v1565_v45, %v1548_v41  ;;  %2199 = vrot.lane.b32.xlu0 %v2196_v7, %s2659_s8 }
 0x1f9   : > { %2138 = vrot.lane.b32.xlu1 %v2133_v33, %s2659_s8 }
 0x1fa   : > { %v4577_v26 = vpop.permute.xlu0 %1639 }
 0x1fb   : > { %v1579_v13 = vpop.permute.xlu1 %1578 }
 0x1fc   : > { %v1583_v47 = vadd.f32 %v1579_v13, %v1569_v28  ;;  %2220 = vrot.lane.b32.xlu0 %v2217_v48, %s2659_s8  ;;  %v1645_v28 = vadd.f32 %v4577_v26, %v4569_v15 }
 0x1fd   : > { %2159 = vrot.lane.b32.xlu1 %v2156_v20, %s2659_s8 }
 0x1fe   : > { %v1661_v18 = vpop.permute.xlu0 %1660 }
 0x1ff   : > { %v1600_v42 = vpop.permute.xlu1 %1599  ;;  %v1666_v52 = vadd.f32 %v1661_v18, %v1645_v28 }
 0x200   : > { %v1604_v53 = vadd.f32 %v1600_v42, %v1583_v47  ;;  %2241 = vrot.lane.b32.xlu0 %v2238_v49, %s2659_s8 }
 0x201   : > { %2180 = vrot.lane.b32.xlu1 %v2177_v4, %s2659_s8 }
 0x202   : > { %v1682_v35 = vpop.permute.xlu0 %1681 }
 0x203   : > { %v1621_v50 = vpop.permute.xlu1 %1620  ;;  %v1687_v63 = vadd.f32 %v1682_v35, %v1666_v52 }
 0x204   : > { %v1625_v8 = vadd.f32 %v1621_v50, %v1604_v53  ;;  %2262 = vrot.lane.b32.xlu0 %v2259_v12, %s2659_s8 }
 0x205   : > { %2201 = vrot.lane.b32.xlu1 %v2198_v38, %s2659_s8 }
 0x206   : > { %v1703_v56 = vpop.permute.xlu0 %1702 }
 0x207   : > { %v1642_v10 = vpop.permute.xlu1 %1641  ;;  %v1708_v48 = vadd.f32 %v1703_v56, %v1687_v63 }
 0x208   : > { %v1646_v61 = vadd.f32 %v1642_v10, %v1625_v8 }
 0x209   : > { %2222 = vrot.lane.b32.xlu1 %v2219_v14, %s2659_s8 }
 0x20a   : > { %v1717_v31 = vpop.permute.xlu0 %1716 }
 0x20b   : > { %v1663_v43 = vpop.permute.xlu1 %1662  ;;  %v1722_v0 = vadd.f32 %v1717_v31, %v1708_v48 }
 0x20c   : > { %v1667_v39 = vadd.f32 %v1663_v43, %v1646_v61 }
 0x20d   : > { %2243 = vrot.lane.b32.xlu1 %v2240_v62, %s2659_s8 }
 0x20e   : > { %v1738_v19 = vpop.permute.xlu0 %1737 }
 0x20f   : > { %v1684_v22 = vpop.permute.xlu1 %1683  ;;  %v1743_v47 = vadd.f32 %v1738_v19, %v1722_v0 }
 0x210   : > { %v1688_v4 = vadd.f32 %v1684_v22, %v1667_v39 }
 0x211   : > { %2264 = vrot.lane.b32.xlu1 %v2261_v3, %s2659_s8  ;;  %s2660_s8 = smov 16  }
 0x212   : > { %v1759_v29 = vpop.permute.xlu0 %1758 }
 0x213   : > { %v1705_v46 = vpop.permute.xlu1 %1704  ;;  %v1764_v57 = vadd.f32 %v1759_v29, %v1743_v47 }
 0x214   : > { %v1709_v37 = vadd.f32 %v1705_v46, %v1688_v4 }
 0x216   : > { %v1780_v23 = vpop.permute.xlu0 %1779 }
 0x217   : > { %v1719_v21 = vpop.permute.xlu1 %1718  ;;  %v1785_v49 = vadd.f32 %v1780_v23, %v1764_v57 }
 0x218   : > { %v1723_v35 = vadd.f32 %v1719_v21, %v1709_v37 }
 0x21a   : > { %v1801_v6 = vpop.permute.xlu0 %1800 }
 0x21b   : > { %v1740_v34 = vpop.permute.xlu1 %1739  ;;  %v1806_v53 = vadd.f32 %v1801_v6, %v1785_v49 }
 0x21c   : > { %v1744_v2 = vadd.f32 %v1740_v34, %v1723_v35 }
 0x21e   : > { %v1822_v32 = vpop.permute.xlu0 %1821 }
 0x21f   : > { %v1761_v59 = vpop.permute.xlu1 %1760  ;;  %v1827_v26 = vadd.f32 %v1822_v32, %v1806_v53 }
 0x220   : > { %v1765_v56 = vadd.f32 %v1761_v59, %v1744_v2 }
 0x222   : > { %v1843_v11 = vpop.permute.xlu0 %1842 }
 0x223   : > { %v1782_v58 = vpop.permute.xlu1 %1781  ;;  %v1848_v36 = vadd.f32 %v1843_v11, %v1827_v26 }
 0x224   : > { %v1786_v54 = vadd.f32 %v1782_v58, %v1765_v56 }
 0x226   : > { %v1857_v16 = vpop.permute.xlu0 %1856 }
 0x227   : > { %v1803_v41 = vpop.permute.xlu1 %1802  ;;  %v1862_v12 = vadd.f32 %v1857_v16, %v1848_v36 }
 0x228   : > { %v1807_v31 = vadd.f32 %v1803_v41, %v1786_v54 }
 0x22a   : > { %v1878_v60 = vpop.permute.xlu0 %1877 }
 0x22b   : > { %v1824_v33 = vpop.permute.xlu1 %1823  ;;  %v1883_v30 = vadd.f32 %v1878_v60, %v1862_v12 }
 0x22c   : > { %v1828_v19 = vadd.f32 %v1824_v33, %v1807_v31 }
 0x22e   : > { %v1899_v1 = vpop.permute.xlu0 %1898 }
 0x22f   : > { %v1845_v5 = vpop.permute.xlu1 %1844  ;;  %v1904_v8 = vadd.f32 %v1899_v1, %v1883_v30 }
 0x230   : > { %v1849_v3 = vadd.f32 %v1845_v5, %v1828_v19 }
 0x232   : > { %v1920_v45 = vpop.permute.xlu0 %1919 }
 0x233   : > { %v1859_v7 = vpop.permute.xlu1 %1858  ;;  %v1925_v17 = vadd.f32 %v1920_v45, %v1904_v8 }
 0x234   : > { %v1863_v21 = vadd.f32 %v1859_v7, %v1849_v3 }
 0x236   : > { %v1941_v27 = vpop.permute.xlu0 %1940 }
 0x237   : > { %v1880_v9 = vpop.permute.xlu1 %1879  ;;  %v1946_v62 = vadd.f32 %v1941_v27, %v1925_v17 }
 0x238   : > { %v1884_v34 = vadd.f32 %v1880_v9, %v1863_v21 }
 0x23a   : > { %v1962_v44 = vpop.permute.xlu0 %1961 }
 0x23b   : > { %v1901_v51 = vpop.permute.xlu1 %1900  ;;  %v1967_v22 = vadd.f32 %v1962_v44, %v1946_v62 }
 0x23c   : > { %v1905_v16 = vadd.f32 %v1901_v51, %v1884_v34 }
 0x23e   : > { %v1983_v13 = vpop.permute.xlu0 %1982 }
 0x23f   : > { %v1922_v24 = vpop.permute.xlu1 %1921  ;;  %v1988_v46 = vadd.f32 %v1983_v13, %v1967_v22 }
 0x240   : > { %v1926_v58 = vadd.f32 %v1922_v24, %v1905_v16 }
 0x242   : > { %v1997_v40 = vpop.permute.xlu0 %1996 }
 0x243   : > { %v1943_v20 = vpop.permute.xlu1 %1942  ;;  %v2002_v6 = vadd.f32 %v1997_v40, %v1988_v46 }
 0x244   : > { %v1947_v27 = vadd.f32 %v1943_v20, %v1926_v58 }
 0x246   : > { %v2018_v42 = vpop.permute.xlu0 %2017 }
 0x247   : > { %v1964_v25 = vpop.permute.xlu1 %1963  ;;  %v2023_v59 = vadd.f32 %v2018_v42, %v2002_v6 }
 0x248   : > { %v1968_v33 = vadd.f32 %v1964_v25, %v1947_v27 }
 0x24a   : > { %v2039_v15 = vpop.permute.xlu0 %2038 }
 0x24b   : > { %v1985_v18 = vpop.permute.xlu1 %1984  ;;  %v2044_v60 = vadd.f32 %v2039_v15, %v2023_v59 }
 0x24c   : > { %v1989_v63 = vadd.f32 %v1985_v18, %v1968_v33  ;;  %v2271_v18 = vstv %s2270_s26 }
 0x24e   : > { %v2060_v50 = vpop.permute.xlu0 %2059 }
 0x24f   : > { %v1999_v38 = vpop.permute.xlu1 %1998  ;;  %v2065_v41 = vadd.f32 %v2060_v50, %v2044_v60 }
 0x250   : > { %v2003_v7 = vadd.f32 %v1999_v38, %v1989_v63 }
 0x252   : > { %v2081_v14 = vpop.permute.xlu0 %2080 }
 0x253   : > { %v2020_v10 = vpop.permute.xlu1 %2019  ;;  %v2086_v28 = vadd.f32 %v2081_v14, %v2065_v41 }
 0x254   : > { %v2024_v40 = vadd.f32 %v2020_v10, %v2003_v7 }
 0x256   : > { %v2102_v43 = vpop.permute.xlu0 %2101 }
 0x257   : > { %v2041_v55 = vpop.permute.xlu1 %2040  ;;  %v2107_v5 = vadd.f32 %v2102_v43, %v2086_v28 }
 0x258   : > { %v2045_v51 = vadd.f32 %v2041_v55, %v2024_v40 }
 0x25a   : > { %v2123_v29 = vpop.permute.xlu0 %2122 }
 0x25b   : > { %v2062_v23 = vpop.permute.xlu1 %2061  ;;  %v2128_v13 = vadd.f32 %v2123_v29, %v2107_v5 }
 0x25c   : > { %v2066_v42 = vadd.f32 %v2062_v23, %v2045_v51 }
 0x25e   : > { %v2137_v32 = vpop.permute.xlu0 %2136 }
 0x25f   : > { %v2083_v11 = vpop.permute.xlu1 %2082  ;;  %v2142_v9 = vadd.f32 %v2137_v32, %v2128_v13 }
 0x260   : > { %v2087_v49 = vadd.f32 %v2083_v11, %v2066_v42 }
 0x262   : > { %v2158_v1 = vpop.permute.xlu0 %2157 }
 0x263   : > { %v2104_v45 = vpop.permute.xlu1 %2103  ;;  %v2163_v47 = vadd.f32 %v2158_v1, %v2142_v9 }
 0x264   : > { %v2108_v4 = vadd.f32 %v2104_v45, %v2087_v49 }
 0x266   : > { %v2179_v44 = vpop.permute.xlu0 %2178 }
 0x267   : > { %v2125_v52 = vpop.permute.xlu1 %2124  ;;  %v2184_v24 = vadd.f32 %v2179_v44, %v2163_v47 }
 0x268   : > { %v2129_v26 = vadd.f32 %v2125_v52, %v2108_v4 }
 0x26a   : > { %v2200_v48 = vpop.permute.xlu0 %2199 }
 0x26b   : > { %v2139_v0 = vpop.permute.xlu1 %2138  ;;  %v2205_v20 = vadd.f32 %v2200_v48, %v2184_v24 }
 0x26c   : > { %v2143_v50 = vadd.f32 %v2139_v0, %v2129_v26  ;;  %v2365_v0 = vlaneseq }
 0x26e   : > { %v2221_v57 = vpop.permute.xlu0 %2220 }
 0x26f   : > { %v2160_v61 = vpop.permute.xlu1 %2159  ;;  %v2226_v39 = vadd.f32 %v2221_v57, %v2205_v20  ;;  %v2366_v57 = vshrl.u32 %v2365_v0, 7 }
 0x270   : > { %v2164_v38 = vadd.f32 %v2160_v61, %v2143_v50 }
 0x272   : > { %v2242_v25 = vpop.permute.xlu0 %2241 }
 0x273   : > { %v2181_v53 = vpop.permute.xlu1 %2180  ;;  %v2247_v15 = vadd.f32 %v2242_v25, %v2226_v39 }
 0x274   : > { %v2185_v56 = vadd.f32 %v2181_v53, %v2164_v38 }
 0x276   : > { %v2263_v37 = vpop.permute.xlu0 %2262 }
 0x277   : > { %v2268_v36 = vadd.f32 %v2263_v37, %v2247_v15  ;;  %v2202_v35 = vpop.permute.xlu1 %2201  ;;  %v2367_v15 = vsub.s32 0, %v2366_v57 }
 0x278   : > { %v2206_v14 = vadd.f32 %v2202_v35, %v2185_v56 }
 0x279   : > { %v2272_v12 = vadd.f32 %v2271_v18, %v2268_v36 }
 0x27b   : > { %v2555_v2 = vmul.f32 -1.442695, %v2272_v12  ;;  %v2223_v30 = vpop.permute.xlu1 %2222 }
 0x27c   : > { %v2227_v10 = vadd.f32 %v2223_v30, %v2206_v14 }
 0x27d   : > { %2603 = vpow2.f32 %v2555_v2  ;;  %v2373_v2 = vld [vmem:[%s2728_s24] sm:$0xff] }
 0x27f   : > { %v2244_v8 = vpop.permute.xlu1 %2243 }
 0x280   : > { %v2248_v54 = vadd.f32 %v2244_v8, %v2227_v10 }
 0x283   : > { %v2265_v17 = vpop.permute.xlu1 %2264 }
 0x284   : > { %v2269_v31 = vadd.f32 %v2265_v17, %v2248_v54 }
 0x286   : > { %v2273_v43 = vadd.f32 %v2271_v18, %v2269_v31 }
 0x288   : > { %v2556_v62 = vmul.f32 -1.442695, %v2273_v43 }
 0x28a   : > { %v2604_v55 = vpop.eup %2603  ;;  %2605 = vpow2.f32 %v2556_v62 }
 0x28b   : > { %v2280_v19 = vadd.f32 1.0, %v2604_v55 }
 0x28d   : > { %2607 = vrcp.f32 %v2280_v19 }
 0x297   : > { %v2606_v22 = vpop.eup %2605 }
 0x298   : > { %v2281_v3 = vadd.f32 1.0, %v2606_v22 }
 0x29a   : > { %v2608_v29 = vpop.eup %2607  ;;  %2609 = vrcp.f32 %v2281_v3 }
 0x29b   : > { %v2287_v46 = vrot.slane %v2608_v29, 1  ;;  %v2291_v23 = vrot.slane %v2608_v29, 2  ;;  %v2295_v21 = vrot.slane %v2608_v29, 3  ;;  %v2299_v34 = vrot.slane %v2608_v29, 4 }
 0x29c   : > { %v2303_v59 = vrot.slane %v2608_v29, 5  ;;  %v2307_v16 = vrot.slane %v2608_v29, 6  ;;  %v2311_v58 = vrot.slane %v2608_v29, 7 }
 0x29d   : > { %2288 = vrot.lane.b32.xlu0 %v2287_v46, %s2660_s8 }
 0x2a1   : > { %2292 = vrot.lane.b32.xlu0 %v2291_v23, %s2661_s5 }
 0x2a5   : > { %2296 = vrot.lane.b32.xlu0 %v2295_v21, %s2662_s6 }
 0x2a7   : > { %v2610_v6 = vpop.eup %2609 }
 0x2a8   : > { %v2316_v32 = vrot.slane %v2610_v6, 1  ;;  %v2320_v11 = vrot.slane %v2610_v6, 2  ;;  %v2324_v60 = vrot.slane %v2610_v6, 3  ;;  %v2328_v1 = vrot.slane %v2610_v6, 4 }
 0x2a9   : > { %2300 = vrot.lane.b32.xlu0 %v2299_v34, %s2663_s7  ;;  %v2332_v41 = vrot.slane %v2610_v6, 5  ;;  %v2336_v45 = vrot.slane %v2610_v6, 6  ;;  %v2340_v27 = vrot.slane %v2610_v6, 7 }
 0x2aa   : > { %2317 = vrot.lane.b32.xlu1 %v2316_v32, %s2660_s8 }
 0x2ad   : > { %2304 = vrot.lane.b32.xlu0 %v2303_v59, %s2664_s9 }
 0x2ae   : > { %2321 = vrot.lane.b32.xlu1 %v2320_v11, %s2661_s5 }
 0x2b1   : > { %2308 = vrot.lane.b32.xlu0 %v2307_v16, %s2665_s11 }
 0x2b2   : > { %2325 = vrot.lane.b32.xlu1 %v2324_v60, %s2662_s6 }
 0x2b5   : > { %2312 = vrot.lane.b32.xlu0 %v2311_v58, %s2666_s13 }
 0x2b6   : > { %2329 = vrot.lane.b32.xlu1 %v2328_v1, %s2663_s7 }
 0x2ba   : > { %2333 = vrot.lane.b32.xlu1 %v2332_v41, %s2664_s9 }
 0x2be   : > { %2337 = vrot.lane.b32.xlu1 %v2336_v45, %s2665_s11 }
 0x2c2   : > { %2341 = vrot.lane.b32.xlu1 %v2340_v27, %s2666_s13 }
 0x30f   : > { %v2289_v28 = vpop.permute.xlu0 %2288 }
 0x310   : > { %v2345_v47 = vsel %vm2344_vm7, %v2608_v29, %v2289_v28 }
 0x313   : > { %v2293_v33 = vpop.permute.xlu0 %2292 }
 0x314   : > { %v2347_v51 = vsel %vm2346_vm8, %v2345_v47, %v2293_v33 }
 0x317   : > { %v2297_v44 = vpop.permute.xlu0 %2296 }
 0x318   : > { %v2349_v24 = vsel %vm2348_vm9, %v2347_v51, %v2297_v44 }
 0x31b   : > { %v2301_v52 = vpop.permute.xlu0 %2300 }
 0x31c   : > { %v2318_v5 = vpop.permute.xlu1 %2317  ;;  %v2351_v42 = vsel %vm2350_vm10, %v2349_v24, %v2301_v52 }
 0x31d   : > { %v2358_v61 = vsel %vm2344_vm7, %v2610_v6, %v2318_v5 }
 0x31f   : > { %v2305_v13 = vpop.permute.xlu0 %2304 }
 0x320   : > { %v2322_v63 = vpop.permute.xlu1 %2321  ;;  %v2353_v39 = vsel %vm2352_vm11, %v2351_v42, %v2305_v13 }
 0x321   : > { %v2359_v20 = vsel %vm2346_vm8, %v2358_v61, %v2322_v63 }
 0x323   : > { %v2309_v9 = vpop.permute.xlu0 %2308 }
 0x324   : > { %v2326_v7 = vpop.permute.xlu1 %2325  ;;  %v2355_v4 = vsel %vm2354_vm12, %v2353_v39, %v2309_v9 }
 0x325   : > { %v2360_v53 = vsel %vm2348_vm9, %v2359_v20, %v2326_v7 }
 0x327   : > { %v2313_v49 = vpop.permute.xlu0 %2312 }
 0x328   : > { %v2330_v48 = vpop.permute.xlu1 %2329  ;;  %v2357_v18 = vsel %vm2356_vm13, %v2355_v4, %v2313_v49 }
 0x329   : > { %v2361_v26 = vsel %vm2350_vm10, %v2360_v53, %v2330_v48  ;;  %v2368_v12 = vrot.slane %v2357_v18, %v2367_v15 }
 0x32c   : > { %v2334_v40 = vpop.permute.xlu1 %2333 }
 0x32d   : > { %v2362_v37 = vsel %vm2352_vm11, %v2361_v26, %v2334_v40 }
 0x330   : > { %v2338_v25 = vpop.permute.xlu1 %2337 }
 0x331   : > { %v2363_v36 = vsel %vm2354_vm12, %v2362_v37, %v2338_v25 }
 0x334   : > { %v2342_v35 = vpop.permute.xlu1 %2341 }
 0x335   : > { %v2364_v50 = vsel %vm2356_vm13, %v2363_v36, %v2342_v35 }
 0x336   : > { %v2372_v38 = vrot.slane %v2364_v50, %v2367_v15 }
 0x338   : > { %v2376_v30 = vcombine.low %v2368_v12, %v2372_v38 }
 0x33a   : > { %v2378_v56 = vmul.f32 %v2376_v30, %v2373_v2 }
 0x33c   : > { %2379 = vst [vmem:[%s185_s10] sm:$0xff] %v2378_v56 }
 0x33d PF: > { %s15_s14 = sadd.s32 1, %s2642_s14  }
 0x33e   : > { %p12_p1 = scmp.ge.s32.totalorder %s15_s14, 4  }
 0x340   :  { %14 = sbr.rel (!%p12_p1) target bundleno = 3 (0x3), region = 68 }
 0x345   :  { %2401 = vsyncpa [#allocation5], 1 }
 0x346   :  { %2403 = vsyncpa [#allocation5 + $0x1], 1 }

</bundles_post_ra>
